<compile_context>
chip_gen: v5e
topology: v5e:2x2
jax: 0.10.0
libtpu: 0.0.40
codegen_flags: <defaults>
</compile_context>

<pallas_src>
import functools

import numpy as np

import jax
import jax.numpy as jnp
from jax import lax
from jax.experimental import pallas as pl
from jax.experimental.pallas import tpu as pltpu


# ----------------------------- helpers ------------------------------------- #
def _round_up(x, m):
    return ((x + m - 1) // m) * m


def _conv_hw(h, stride, ksize=4, pad=1):
    return (h + 2 * pad - ksize) // stride + 1


def spectral_normalize(w, key, n_iter=5):
    """Divide conv weight by its largest singular value (power iteration)."""
    wm = w.reshape(w.shape[0], -1)
    u = jax.random.normal(key, (wm.shape[0],), dtype=jnp.float32)
    u = u / (jnp.linalg.norm(u) + 1e-12)
    v = None
    for _ in range(n_iter):
        v = wm.T @ u
        v = v / (jnp.linalg.norm(v) + 1e-12)
        u = wm @ v
        u = u / (jnp.linalg.norm(u) + 1e-12)
    sigma = u @ (wm @ v)
    return w / sigma


# ----------------------------- Pallas kernel -------------------------------- #
def conv_tap_kernel(*refs, Ke, OH, OWp, apply_leaky, emit_stats):
    """Direct conv for one sample: accumulate Ke*Ke shifted-window matmuls.

    refs (inputs then outputs):
      x_ref : (IH, IW, Cin)   f32   conv input (spatially padded, maybe s2d'd)
      w_ref : (Ke*Ke, Cin, Cout) bf16  per-tap weight matrices
      b_ref : (1, Cout)       f32   bias
      [m_ref: (OH*OWp, 1)     f32   valid-column mask, only when emit_stats]
      y_ref : (OH, OWp, Cout)       conv output (+ optional LeakyReLU)
      [sum_ref, ssq_ref : (1, Cout) f32  per-sample BN statistics]
    """
    if emit_stats:
        x_ref, w_ref, b_ref, m_ref, y_ref, sum_ref, ssq_ref = refs
    else:
        x_ref, w_ref, b_ref, y_ref = refs

    Cout = y_ref.shape[-1]
    M = OH * OWp

    acc = jnp.zeros((M, Cout), jnp.float32)
    for dh in range(Ke):
        for dw in range(Ke):
            # shifted NHWC window of the (already padded) input
            xt = x_ref[pl.ds(dh, OH), pl.ds(dw, OWp), :]          # (OH, OWp, Cin)
            xt = xt.reshape(M, xt.shape[-1]).astype(jnp.bfloat16)  # bf16 MXU feed
            wt = w_ref[dh * Ke + dw]                               # (Cin, Cout) bf16
            acc = acc + jnp.dot(xt, wt, preferred_element_type=jnp.float32)

    y = acc + b_ref[...]                                           # (M, Cout) f32

    if emit_stats:
        yv = y * m_ref[...]            # zero out padded (alignment-only) columns
        sum_ref[...] = jnp.sum(yv, axis=0, keepdims=True)
        ssq_ref[...] = jnp.sum(yv * yv, axis=0, keepdims=True)

    if apply_leaky:
        y = jnp.where(y >= 0.0, y, 0.2 * y)

    y_ref[...] = y.reshape(OH, OWp, Cout).astype(y_ref.dtype)


# ----------------------------- kernel wrapper -------------------------------- #
def conv_layer(x, taps, bias, *, Ke, OH, OW, apply_leaky, emit_stats,
               out_dtype=jnp.float32):
    """x: (N, IH, IW, Cin) f32 glued input.  Returns y (N, OH, OWp, Cout)
    [+ per-sample sum / sumsq stats of shape (N, 1, Cout)]."""
    N, IH, IW, Cin = x.shape
    T, Cin_w, Cout = taps.shape
    assert T == Ke * Ke and Cin_w == Cin, (taps.shape, Ke, Cin)
    OWp = _round_up(OW, 8)
    assert IH >= OH + Ke - 1 and IW >= OWp + Ke - 1, (x.shape, OH, OWp, Ke)

    kern = functools.partial(conv_tap_kernel, Ke=Ke, OH=OH, OWp=OWp,
                             apply_leaky=apply_leaky, emit_stats=emit_stats)

    in_specs = [
        pl.BlockSpec((None, IH, IW, Cin), lambda n: (n, 0, 0, 0)),
        pl.BlockSpec((T, Cin, Cout), lambda n: (0, 0, 0)),
        pl.BlockSpec((1, Cout), lambda n: (0, 0)),
    ]
    args = [x, taps, bias]
    out_shape = [jax.ShapeDtypeStruct((N, OH, OWp, Cout), out_dtype)]
    out_specs = [pl.BlockSpec((None, OH, OWp, Cout), lambda n: (n, 0, 0, 0))]

    if emit_stats:
        # static mask selecting the OW real output columns out of OWp
        mask = np.tile((np.arange(OWp) < OW).astype(np.float32), OH).reshape(-1, 1)
        in_specs.append(pl.BlockSpec((OH * OWp, 1), lambda n: (0, 0)))
        args.append(jnp.asarray(mask))
        out_shape += [jax.ShapeDtypeStruct((N, 1, Cout), jnp.float32)] * 2
        out_specs += [pl.BlockSpec((None, 1, Cout), lambda n: (n, 0, 0))] * 2

    res = pl.pallas_call(
        kern,
        out_shape=tuple(out_shape),
        grid=(N,),
        in_specs=in_specs,
        out_specs=tuple(out_specs),
        compiler_params=pltpu.CompilerParams(
            dimension_semantics=("parallel",),
            vmem_limit_bytes=32 * 1024 * 1024,
        ),
    )(*args)

    if emit_stats:
        return res[0], res[1], res[2]
    return res[0]


# ----------------------------- layout glue (plain JAX, XLA-fused) ------------ #
def glue_input(y, *, s2d, OH, OW, Ke, bn=None):
    """Prepare the next conv's input: optional fused BN-affine + LeakyReLU,
    conv zero-pad (1), optional space-to-depth (stride-2 -> stride-1 rewrite),
    alignment padding.  All of this fuses into one XLA pass over y."""
    if bn is not None:
        a, b = bn
        z = y.astype(jnp.float32) * a + b
        y = jnp.where(z >= 0.0, z, 0.2 * z)
    x = jnp.pad(y.astype(jnp.float32), ((0, 0), (1, 1), (1, 1), (0, 0)))
    if s2d:
        n, h, w, c = x.shape
        x = jnp.pad(x, ((0, 0), (0, h % 2), (0, w % 2), (0, 0)))
        n, h, w, c = x.shape
        x = x.reshape(n, h // 2, 2, w // 2, 2, c)
        x = x.transpose(0, 1, 3, 2, 4, 5).reshape(n, h // 2, w // 2, 4 * c)
    n, ih, iw, c = x.shape
    owp = _round_up(OW, 8)
    ih_req, iw_req = OH + Ke - 1, owp + Ke - 1
    x = jnp.pad(x, ((0, 0), (0, max(0, ih_req - ih)),
                    (0, max(0, iw_req - iw)), (0, 0)))
    return x


def bn_affine_from_stats(ssum, ssq, gamma, beta, count, eps=1e-5):
    """Turn per-sample sum/sumsq (from the conv kernel) into the per-channel
    BatchNorm affine (training-mode batch stats, biased variance)."""
    s = jnp.sum(ssum, axis=0).reshape(-1)
    q = jnp.sum(ssq, axis=0).reshape(-1)
    mean = s / count
    var = q / count - mean * mean
    a = gamma / jnp.sqrt(var + eps)
    b = beta - mean * a
    return a, b


# ----------------------------- forward --------------------------------------- #
def patchgan_forward(x_nchw, kp):
    n, _, h, w = x_nchw.shape
    x = jnp.transpose(x_nchw, (0, 2, 3, 1))          # NHWC once at entry

    # conv1 (stride 2) + LeakyReLU fused in the kernel epilogue
    oh1, ow1 = _conv_hw(h, 2), _conv_hw(w, 2)
    g1 = glue_input(x, s2d=True, OH=oh1, OW=ow1, Ke=2)
    y1 = conv_layer(g1, kp["t1"], kp["b1"], Ke=2, OH=oh1, OW=ow1,
                    apply_leaky=True, emit_stats=False)
    x1 = y1[:, :, :ow1, :]

    # conv2 (stride 2, spectral-normed) -> BN stats emitted by the kernel
    oh2, ow2 = _conv_hw(oh1, 2), _conv_hw(ow1, 2)
    g2 = glue_input(x1, s2d=True, OH=oh2, OW=ow2, Ke=2)
    y2, s2, q2 = conv_layer(g2, kp["t2"], kp["b2"], Ke=2, OH=oh2, OW=ow2,
                            apply_leaky=False, emit_stats=True)
    a2, c2 = bn_affine_from_stats(s2, q2, kp["g2"], kp["be2"], n * oh2 * ow2)
    x2 = y2[:, :, :ow2, :]

    # conv3 (stride 2) ; BN2 + LeakyReLU applied inside glue_input
    oh3, ow3 = _conv_hw(oh2, 2), _conv_hw(ow2, 2)
    g3 = glue_input(x2, s2d=True, OH=oh3, OW=ow3, Ke=2, bn=(a2, c2))
    y3, s3, q3 = conv_layer(g3, kp["t3"], kp["b3"], Ke=2, OH=oh3, OW=ow3,
                            apply_leaky=False, emit_stats=True)
    a3, c3 = bn_affine_from_stats(s3, q3, kp["g3"], kp["be3"], n * oh3 * ow3)
    x3 = y3[:, :, :ow3, :]

    # conv4 (stride 1)
    oh4, ow4 = _conv_hw(oh3, 1), _conv_hw(ow3, 1)
    g4 = glue_input(x3, s2d=False, OH=oh4, OW=ow4, Ke=4, bn=(a3, c3))
    y4, s4, q4 = conv_layer(g4, kp["t4"], kp["b4"], Ke=4, OH=oh4, OW=ow4,
                            apply_leaky=False, emit_stats=True)
    a4, c4 = bn_affine_from_stats(s4, q4, kp["g4"], kp["be4"], n * oh4 * ow4)
    x4 = y4[:, :, :ow4, :]

    # conv5 (stride 1), no norm, no activation
    oh5, ow5 = _conv_hw(oh4, 1), _conv_hw(ow4, 1)
    g5 = glue_input(x4, s2d=False, OH=oh5, OW=ow5, Ke=4, bn=(a4, c4))
    y5 = conv_layer(g5, kp["t5"], kp["b5"], Ke=4, OH=oh5, OW=ow5,
                    apply_leaky=False, emit_stats=False)
    out = y5[:, :, :ow5, :]
    return jnp.transpose(out, (0, 3, 1, 2))           # NCHW once at exit


# ----------------------------- parameter prep -------------------------------- #
def make_tap_weights_stride2(w):
    """(Cout, Cin, 4, 4) OIHW, stride-2 conv -> 2x2 taps over space-to-depth
    input: returns (4, 4*Cin, Cout), tap index = dh*2 + dw, channel order
    (ph, pw, cin) matching glue_input's space-to-depth channel layout."""
    cout, cin, k, _ = w.shape
    assert k == 4
    taps = []
    for dh in range(2):
        for dw in range(2):
            sub = w[:, :, 2 * dh:2 * dh + 2, 2 * dw:2 * dw + 2]   # (Cout,Cin,ph,pw)
            taps.append(sub.transpose(2, 3, 1, 0).reshape(4 * cin, cout))
    return jnp.stack(taps)


def make_tap_weights_stride1(w):
    """(Cout, Cin, K, K) OIHW, stride-1 conv -> (K*K, Cin, Cout), tap = kh*K+kw."""
    cout, cin, k, _ = w.shape
    return w.transpose(2, 3, 1, 0).reshape(k * k, cin, cout)


def prepare_kernel_params(p):
    kp = {
        "t1": make_tap_weights_stride2(p["w1"]).astype(jnp.bfloat16),
        "t2": make_tap_weights_stride2(p["w2"]).astype(jnp.bfloat16),
        "t3": make_tap_weights_stride2(p["w3"]).astype(jnp.bfloat16),
        "t4": make_tap_weights_stride1(p["w4"]).astype(jnp.bfloat16),
        "t5": make_tap_weights_stride1(p["w5"]).astype(jnp.bfloat16),
    }
    for i in range(1, 6):
        kp[f"b{i}"] = p[f"b{i}"].reshape(1, -1).astype(jnp.float32)
    for i in (2, 3, 4):
        kp[f"g{i}"] = p[f"g{i}"]
        kp[f"be{i}"] = p[f"be{i}"]
    return kp


def make_params(key, num_in_ch=3, num_feat=16, ksize=4):
    ks = jax.random.split(key, 16)
    nf = num_feat

    def conv_w(k, cout, cin):
        return (0.05 * jax.random.normal(k, (cout, cin, ksize, ksize))).astype(jnp.float32)

    def conv_b(k, cout):
        return (0.05 * jax.random.normal(k, (cout,))).astype(jnp.float32)

    p = {
        "w1": conv_w(ks[0], nf, num_in_ch), "b1": conv_b(ks[1], nf),
        "w2": conv_w(ks[2], nf * 2, nf),    "b2": conv_b(ks[3], nf * 2),
        "w3": conv_w(ks[4], nf * 4, nf * 2), "b3": conv_b(ks[5], nf * 4),
        "w4": conv_w(ks[6], nf * 8, nf * 4), "b4": conv_b(ks[7], nf * 8),
        "w5": conv_w(ks[8], 1, nf * 8),      "b5": conv_b(ks[9], 1),
        "g2": jnp.ones((nf * 2,), jnp.float32), "be2": jnp.zeros((nf * 2,), jnp.float32),
        "g3": jnp.ones((nf * 4,), jnp.float32), "be3": jnp.zeros((nf * 4,), jnp.float32),
        "g4": jnp.ones((nf * 8,), jnp.float32), "be4": jnp.zeros((nf * 8,), jnp.float32),
    }
    # spectral_norm on conv2/3/4 weights, folded deterministically at setup
    # TODO(synk): spectral-norm power iteration has no Pallas equivalent; it is
    # parameter preprocessing done once in plain JAX.
    p["w2"] = spectral_normalize(p["w2"], ks[10])
    p["w3"] = spectral_normalize(p["w3"], ks[11])
    p["w4"] = spectral_normalize(p["w4"], ks[12])
    return p


# ----------------------------- pure-JAX reference ---------------------------- #
def _conv_ref(x, W, b, stride, pad):
    y = lax.conv_general_dilated(x, W, (stride, stride), [(pad, pad), (pad, pad)],
                                 dimension_numbers=("NCHW", "OIHW", "NCHW"))
    return y + b.reshape(1, -1, 1, 1)


def _bn_ref(y, g, be, eps=1e-5):
    mean = y.mean(axis=(0, 2, 3), keepdims=True)
    var = y.var(axis=(0, 2, 3), keepdims=True)
    return g.reshape(1, -1, 1, 1) * (y - mean) / jnp.sqrt(var + eps) + be.reshape(1, -1, 1, 1)


def _leaky(y):
    return jnp.where(y >= 0, y, 0.2 * y)


def patchgan_ref(x, p):
    x1 = _leaky(_conv_ref(x, p["w1"], p["b1"], 2, 1))
    x2 = _leaky(_bn_ref(_conv_ref(x1, p["w2"], p["b2"], 2, 1), p["g2"], p["be2"]))
    x3 = _leaky(_bn_ref(_conv_ref(x2, p["w3"], p["b3"], 2, 1), p["g3"], p["be3"]))
    x4 = _leaky(_bn_ref(_conv_ref(x3, p["w4"], p["b4"], 1, 1), p["g4"], p["be4"]))
    return _conv_ref(x4, p["w5"], p["b5"], 1, 1)


# ----------------------------- run -------------------------------------------- #
if __name__ == "__main__":
    key = jax.random.PRNGKey(0)
    kx, kparam = jax.random.split(key)

    # small but valid shapes: spatial must be >= 24 for the 5-layer stack
    x = jax.random.normal(kx, (2, 3, 32, 32), dtype=jnp.float32)  # NCHW
    params = make_params(kparam, num_in_ch=3, num_feat=16)
    kparams = prepare_kernel_params(params)

    fwd = jax.jit(patchgan_forward)
    out = jax.block_until_ready(fwd(x, kparams))

    ref = jax.block_until_ready(patchgan_ref(x, params))
    assert out.shape == ref.shape == (2, 1, 2, 2), (out.shape, ref.shape)
    # bf16 MXU operands (f32 accumulation) -> bf16-level tolerance vs f32 reference
    assert jnp.allclose(out, ref, rtol=1e-1, atol=1e-1), float(jnp.max(jnp.abs(out - ref)))

    print("KERNEL_OK")
</pallas_src>

<mosaic_0001>
module attributes {stable_mosaic.version = 11 : i64} {
  func.func @conv_tap_kernel(%arg0: i32, %arg1: memref<1x17x17x12xf32, #tpu.memory_space<vmem>>, %arg2: memref<4x12x16xbf16, #tpu.memory_space<vmem>>, %arg3: memref<1x16xf32, #tpu.memory_space<vmem>>, %arg4: memref<1x16x16x16xf32, #tpu.memory_space<vmem>>) attributes {dimension_semantics = [#tpu.dimension_semantics<parallel>], iteration_bounds = array<i64: 2>, scalar_prefetch = 0 : i64, scratch_operands = 0 : i64, tpu.core_type = #tpu.core_type<tc>, window_params = [{transform_indices = @transform_0, window_bounds = array<i64: 1, 17, 17, 12>}, {pipeline_mode = #tpu.pipeline_mode<synchronous>, transform_indices = @transform_1, window_bounds = array<i64: 4, 12, 16>}, {pipeline_mode = #tpu.pipeline_mode<synchronous>, transform_indices = @transform_2, window_bounds = array<i64: 1, 16>}, {transform_indices = @transform_3, window_bounds = array<i64: 1, 16, 16, 16>}]} {
    %cst = arith.constant 0.000000e+00 : f32
    %0 = vector.broadcast %cst : f32 to vector<256x16xf32>
    %c0 = arith.constant 0 : index
    %c0_0 = arith.constant 0 : index
    %c0_1 = arith.constant 0 : index
    %c0_2 = arith.constant 0 : index
    %1 = vector.load %arg1[%c0, %c0_0, %c0_1, %c0_2] : memref<1x17x17x12xf32, #tpu.memory_space<vmem>>, vector<1x16x16x12xf32>
    %2 = vector.shape_cast %1 : vector<1x16x16x12xf32> to vector<16x16x12xf32>
    %3 = vector.shape_cast %2 : vector<16x16x12xf32> to vector<256x12xf32>
    %4 = arith.truncf %3 : vector<256x12xf32> to vector<256x12xbf16>
    %c0_3 = arith.constant 0 : index
    %c0_4 = arith.constant 0 : index
    %c0_5 = arith.constant 0 : index
    %5 = vector.load %arg2[%c0_3, %c0_4, %c0_5] : memref<4x12x16xbf16, #tpu.memory_space<vmem>>, vector<1x12x16xbf16>
    %6 = vector.shape_cast %5 : vector<1x12x16xbf16> to vector<12x16xbf16>
    %cst_6 = arith.constant dense<0.000000e+00> : vector<256x16xf32>
    %7 = tpu.matmul %4, %6, %cst_6 {dimension_numbers = #tpu.dot_dimension_numbers<[1], [0], [0], [1], [0, 0, 1, 1], [], []>} : vector<256x12xbf16>, vector<12x16xbf16>, vector<256x16xf32> -> vector<256x16xf32>
    %8 = arith.addf %0, %7 : vector<256x16xf32>
    %c0_7 = arith.constant 0 : index
    %c0_8 = arith.constant 0 : index
    %c1 = arith.constant 1 : index
    %c0_9 = arith.constant 0 : index
    %9 = vector.load %arg1[%c0_7, %c0_8, %c1, %c0_9] : memref<1x17x17x12xf32, #tpu.memory_space<vmem>>, vector<1x16x16x12xf32>
    %10 = vector.shape_cast %9 : vector<1x16x16x12xf32> to vector<16x16x12xf32>
    %11 = vector.shape_cast %10 : vector<16x16x12xf32> to vector<256x12xf32>
    %12 = arith.truncf %11 : vector<256x12xf32> to vector<256x12xbf16>
    %c1_10 = arith.constant 1 : index
    %c0_11 = arith.constant 0 : index
    %c0_12 = arith.constant 0 : index
    %13 = vector.load %arg2[%c1_10, %c0_11, %c0_12] : memref<4x12x16xbf16, #tpu.memory_space<vmem>>, vector<1x12x16xbf16>
    %14 = vector.shape_cast %13 : vector<1x12x16xbf16> to vector<12x16xbf16>
    %cst_13 = arith.constant dense<0.000000e+00> : vector<256x16xf32>
    %15 = tpu.matmul %12, %14, %cst_13 {dimension_numbers = #tpu.dot_dimension_numbers<[1], [0], [0], [1], [0, 0, 1, 1], [], []>} : vector<256x12xbf16>, vector<12x16xbf16>, vector<256x16xf32> -> vector<256x16xf32>
    %16 = arith.addf %8, %15 : vector<256x16xf32>
    %c0_14 = arith.constant 0 : index
    %c1_15 = arith.constant 1 : index
    %c0_16 = arith.constant 0 : index
    %c0_17 = arith.constant 0 : index
    %17 = vector.load %arg1[%c0_14, %c1_15, %c0_16, %c0_17] : memref<1x17x17x12xf32, #tpu.memory_space<vmem>>, vector<1x16x16x12xf32>
    %18 = vector.shape_cast %17 : vector<1x16x16x12xf32> to vector<16x16x12xf32>
    %19 = vector.shape_cast %18 : vector<16x16x12xf32> to vector<256x12xf32>
    %20 = arith.truncf %19 : vector<256x12xf32> to vector<256x12xbf16>
    %c2 = arith.constant 2 : index
    %c0_18 = arith.constant 0 : index
    %c0_19 = arith.constant 0 : index
    %21 = vector.load %arg2[%c2, %c0_18, %c0_19] : memref<4x12x16xbf16, #tpu.memory_space<vmem>>, vector<1x12x16xbf16>
    %22 = vector.shape_cast %21 : vector<1x12x16xbf16> to vector<12x16xbf16>
    %cst_20 = arith.constant dense<0.000000e+00> : vector<256x16xf32>
    %23 = tpu.matmul %20, %22, %cst_20 {dimension_numbers = #tpu.dot_dimension_numbers<[1], [0], [0], [1], [0, 0, 1, 1], [], []>} : vector<256x12xbf16>, vector<12x16xbf16>, vector<256x16xf32> -> vector<256x16xf32>
    %24 = arith.addf %16, %23 : vector<256x16xf32>
    %c0_21 = arith.constant 0 : index
    %c1_22 = arith.constant 1 : index
    %c1_23 = arith.constant 1 : index
    %c0_24 = arith.constant 0 : index
    %25 = vector.load %arg1[%c0_21, %c1_22, %c1_23, %c0_24] : memref<1x17x17x12xf32, #tpu.memory_space<vmem>>, vector<1x16x16x12xf32>
    %26 = vector.shape_cast %25 : vector<1x16x16x12xf32> to vector<16x16x12xf32>
    %27 = vector.shape_cast %26 : vector<16x16x12xf32> to vector<256x12xf32>
    %28 = arith.truncf %27 : vector<256x12xf32> to vector<256x12xbf16>
    %c3 = arith.constant 3 : index
    %c0_25 = arith.constant 0 : index
    %c0_26 = arith.constant 0 : index
    %29 = vector.load %arg2[%c3, %c0_25, %c0_26] : memref<4x12x16xbf16, #tpu.memory_space<vmem>>, vector<1x12x16xbf16>
    %30 = vector.shape_cast %29 : vector<1x12x16xbf16> to vector<12x16xbf16>
    %cst_27 = arith.constant dense<0.000000e+00> : vector<256x16xf32>
    %31 = tpu.matmul %28, %30, %cst_27 {dimension_numbers = #tpu.dot_dimension_numbers<[1], [0], [0], [1], [0, 0, 1, 1], [], []>} : vector<256x12xbf16>, vector<12x16xbf16>, vector<256x16xf32> -> vector<256x16xf32>
    %32 = arith.addf %24, %31 : vector<256x16xf32>
    %c0_28 = arith.constant 0 : index
    %c0_29 = arith.constant 0 : index
    %33 = vector.load %arg3[%c0_28, %c0_29] : memref<1x16xf32, #tpu.memory_space<vmem>>, vector<1x16xf32>
    %34 = vector.broadcast %33 : vector<1x16xf32> to vector<256x16xf32>
    %35 = arith.addf %32, %34 : vector<256x16xf32>
    %cst_30 = arith.constant 0.000000e+00 : f32
    %36 = vector.broadcast %cst_30 : f32 to vector<256x16xf32>
    %37 = arith.cmpf oge, %35, %36 : vector<256x16xf32>
    %cst_31 = arith.constant 2.000000e-01 : f32
    %38 = vector.broadcast %cst_31 : f32 to vector<256x16xf32>
    %39 = arith.mulf %38, %35 : vector<256x16xf32>
    %40 = arith.select %37, %35, %39 : vector<256x16xi1>, vector<256x16xf32>
    %41 = vector.shape_cast %40 : vector<256x16xf32> to vector<16x16x16xf32>
    %c0_32 = arith.constant 0 : index
    %c0_33 = arith.constant 0 : index
    %c0_34 = arith.constant 0 : index
    %c0_35 = arith.constant 0 : index
    %42 = vector.load %arg4[%c0_32, %c0_33, %c0_34, %c0_35] : memref<1x16x16x16xf32, #tpu.memory_space<vmem>>, vector<1x16x16x16xf32>
    %43 = vector.shape_cast %42 : vector<1x16x16x16xf32> to vector<16x16x16xf32>
    %44 = vector.shape_cast %41 : vector<16x16x16xf32> to vector<1x16x16x16xf32>
    tpu.vector_store %arg4[%c0_32, %c0_33, %c0_34, %c0_35], %44 {strides = array<i32>} : memref<1x16x16x16xf32, #tpu.memory_space<vmem>>, vector<1x16x16x16xf32>,
    return
  }
  func.func @transform_0(%arg0: i32) -> (i32, i32, i32, i32) {
    %c0_i32 = arith.constant 0 : i32
    %c0_i32_0 = arith.constant 0 : i32
    %c0_i32_1 = arith.constant 0 : i32
    %c0_i32_2 = arith.constant 0 : i32
    return %arg0, %c0_i32, %c0_i32_0, %c0_i32_1 : i32, i32, i32, i32
  }
  func.func @transform_1(%arg0: i32) -> (i32, i32, i32) {
    %c0_i32 = arith.constant 0 : i32
    %c0_i32_0 = arith.constant 0 : i32
    %c0_i32_1 = arith.constant 0 : i32
    %c0_i32_2 = arith.constant 0 : i32
    return %c0_i32, %c0_i32_0, %c0_i32_1 : i32, i32, i32
  }
  func.func @transform_2(%arg0: i32) -> (i32, i32) {
    %c0_i32 = arith.constant 0 : i32
    %c0_i32_0 = arith.constant 0 : i32
    %c0_i32_1 = arith.constant 0 : i32
    return %c0_i32, %c0_i32_0 : i32, i32
  }
  func.func @transform_3(%arg0: i32) -> (i32, i32, i32, i32) {
    %c0_i32 = arith.constant 0 : i32
    %c0_i32_0 = arith.constant 0 : i32
    %c0_i32_1 = arith.constant 0 : i32
    %c0_i32_2 = arith.constant 0 : i32
    return %arg0, %c0_i32, %c0_i32_0, %c0_i32_1 : i32, i32, i32, i32
  }
}

module attributes {stable_mosaic.version = 11 : i64} {
  func.func @conv_tap_kernel(%arg0: i32, %arg1: memref<1x9x9x64xf32, #tpu.memory_space<vmem>>, %arg2: memref<4x64x32xbf16, #tpu.memory_space<vmem>>, %arg3: memref<1x32xf32, #tpu.memory_space<vmem>>, %arg4: memref<64x1xf32, #tpu.memory_space<vmem>>, %arg5: memref<1x8x8x32xf32, #tpu.memory_space<vmem>>, %arg6: memref<1x1x32xf32, #tpu.memory_space<vmem>>, %arg7: memref<1x1x32xf32, #tpu.memory_space<vmem>>) attributes {dimension_semantics = [#tpu.dimension_semantics<parallel>], iteration_bounds = array<i64: 2>, scalar_prefetch = 0 : i64, scratch_operands = 0 : i64, tpu.core_type = #tpu.core_type<tc>, window_params = [{transform_indices = @transform_0, window_bounds = array<i64: 1, 9, 9, 64>}, {pipeline_mode = #tpu.pipeline_mode<synchronous>, transform_indices = @transform_1, window_bounds = array<i64: 4, 64, 32>}, {pipeline_mode = #tpu.pipeline_mode<synchronous>, transform_indices = @transform_2, window_bounds = array<i64: 1, 32>}, {pipeline_mode = #tpu.pipeline_mode<synchronous>, transform_indices = @transform_3, window_bounds = array<i64: 64, 1>}, {transform_indices = @transform_4, window_bounds = array<i64: 1, 8, 8, 32>}, {transform_indices = @transform_5, window_bounds = array<i64: 1, 1, 32>}, {transform_indices = @transform_6, window_bounds = array<i64: 1, 1, 32>}]} {
    %cst = arith.constant 0.000000e+00 : f32
    %0 = vector.broadcast %cst : f32 to vector<64x32xf32>
    %c0 = arith.constant 0 : index
    %c0_0 = arith.constant 0 : index
    %c0_1 = arith.constant 0 : index
    %c0_2 = arith.constant 0 : index
    %1 = vector.load %arg1[%c0, %c0_0, %c0_1, %c0_2] : memref<1x9x9x64xf32, #tpu.memory_space<vmem>>, vector<1x8x8x64xf32>
    %2 = vector.shape_cast %1 : vector<1x8x8x64xf32> to vector<8x8x64xf32>
    %3 = vector.shape_cast %2 : vector<8x8x64xf32> to vector<64x64xf32>
    %4 = arith.truncf %3 : vector<64x64xf32> to vector<64x64xbf16>
    %c0_3 = arith.constant 0 : index
    %c0_4 = arith.constant 0 : index
    %c0_5 = arith.constant 0 : index
    %5 = vector.load %arg2[%c0_3, %c0_4, %c0_5] : memref<4x64x32xbf16, #tpu.memory_space<vmem>>, vector<1x64x32xbf16>
    %6 = vector.shape_cast %5 : vector<1x64x32xbf16> to vector<64x32xbf16>
    %cst_6 = arith.constant dense<0.000000e+00> : vector<64x32xf32>
    %7 = tpu.matmul %4, %6, %cst_6 {dimension_numbers = #tpu.dot_dimension_numbers<[1], [0], [0], [1], [0, 0, 1, 1], [], []>} : vector<64x64xbf16>, vector<64x32xbf16>, vector<64x32xf32> -> vector<64x32xf32>
    %8 = arith.addf %0, %7 : vector<64x32xf32>
    %c0_7 = arith.constant 0 : index
    %c0_8 = arith.constant 0 : index
    %c1 = arith.constant 1 : index
    %c0_9 = arith.constant 0 : index
    %9 = vector.load %arg1[%c0_7, %c0_8, %c1, %c0_9] : memref<1x9x9x64xf32, #tpu.memory_space<vmem>>, vector<1x8x8x64xf32>
    %10 = vector.shape_cast %9 : vector<1x8x8x64xf32> to vector<8x8x64xf32>
    %11 = vector.shape_cast %10 : vector<8x8x64xf32> to vector<64x64xf32>
    %12 = arith.truncf %11 : vector<64x64xf32> to vector<64x64xbf16>
    %c1_10 = arith.constant 1 : index
    %c0_11 = arith.constant 0 : index
    %c0_12 = arith.constant 0 : index
    %13 = vector.load %arg2[%c1_10, %c0_11, %c0_12] : memref<4x64x32xbf16, #tpu.memory_space<vmem>>, vector<1x64x32xbf16>
    %14 = vector.shape_cast %13 : vector<1x64x32xbf16> to vector<64x32xbf16>
    %cst_13 = arith.constant dense<0.000000e+00> : vector<64x32xf32>
    %15 = tpu.matmul %12, %14, %cst_13 {dimension_numbers = #tpu.dot_dimension_numbers<[1], [0], [0], [1], [0, 0, 1, 1], [], []>} : vector<64x64xbf16>, vector<64x32xbf16>, vector<64x32xf32> -> vector<64x32xf32>
    %16 = arith.addf %8, %15 : vector<64x32xf32>
    %c0_14 = arith.constant 0 : index
    %c1_15 = arith.constant 1 : index
    %c0_16 = arith.constant 0 : index
    %c0_17 = arith.constant 0 : index
    %17 = vector.load %arg1[%c0_14, %c1_15, %c0_16, %c0_17] : memref<1x9x9x64xf32, #tpu.memory_space<vmem>>, vector<1x8x8x64xf32>
    %18 = vector.shape_cast %17 : vector<1x8x8x64xf32> to vector<8x8x64xf32>
    %19 = vector.shape_cast %18 : vector<8x8x64xf32> to vector<64x64xf32>
    %20 = arith.truncf %19 : vector<64x64xf32> to vector<64x64xbf16>
    %c2 = arith.constant 2 : index
    %c0_18 = arith.constant 0 : index
    %c0_19 = arith.constant 0 : index
    %21 = vector.load %arg2[%c2, %c0_18, %c0_19] : memref<4x64x32xbf16, #tpu.memory_space<vmem>>, vector<1x64x32xbf16>
    %22 = vector.shape_cast %21 : vector<1x64x32xbf16> to vector<64x32xbf16>
    %cst_20 = arith.constant dense<0.000000e+00> : vector<64x32xf32>
    %23 = tpu.matmul %20, %22, %cst_20 {dimension_numbers = #tpu.dot_dimension_numbers<[1], [0], [0], [1], [0, 0, 1, 1], [], []>} : vector<64x64xbf16>, vector<64x32xbf16>, vector<64x32xf32> -> vector<64x32xf32>
    %24 = arith.addf %16, %23 : vector<64x32xf32>
    %c0_21 = arith.constant 0 : index
    %c1_22 = arith.constant 1 : index
    %c1_23 = arith.constant 1 : index
    %c0_24 = arith.constant 0 : index
    %25 = vector.load %arg1[%c0_21, %c1_22, %c1_23, %c0_24] : memref<1x9x9x64xf32, #tpu.memory_space<vmem>>, vector<1x8x8x64xf32>
    %26 = vector.shape_cast %25 : vector<1x8x8x64xf32> to vector<8x8x64xf32>
    %27 = vector.shape_cast %26 : vector<8x8x64xf32> to vector<64x64xf32>
    %28 = arith.truncf %27 : vector<64x64xf32> to vector<64x64xbf16>
    %c3 = arith.constant 3 : index
    %c0_25 = arith.constant 0 : index
    %c0_26 = arith.constant 0 : index
    %29 = vector.load %arg2[%c3, %c0_25, %c0_26] : memref<4x64x32xbf16, #tpu.memory_space<vmem>>, vector<1x64x32xbf16>
    %30 = vector.shape_cast %29 : vector<1x64x32xbf16> to vector<64x32xbf16>
    %cst_27 = arith.constant dense<0.000000e+00> : vector<64x32xf32>
    %31 = tpu.matmul %28, %30, %cst_27 {dimension_numbers = #tpu.dot_dimension_numbers<[1], [0], [0], [1], [0, 0, 1, 1], [], []>} : vector<64x64xbf16>, vector<64x32xbf16>, vector<64x32xf32> -> vector<64x32xf32>
    %32 = arith.addf %24, %31 : vector<64x32xf32>
    %c0_28 = arith.constant 0 : index
    %c0_29 = arith.constant 0 : index
    %33 = vector.load %arg3[%c0_28, %c0_29] : memref<1x32xf32, #tpu.memory_space<vmem>>, vector<1x32xf32>
    %34 = vector.broadcast %33 : vector<1x32xf32> to vector<64x32xf32>
    %35 = arith.addf %32, %34 : vector<64x32xf32>
    %c0_30 = arith.constant 0 : index
    %c0_31 = arith.constant 0 : index
    %36 = vector.load %arg4[%c0_30, %c0_31] : memref<64x1xf32, #tpu.memory_space<vmem>>, vector<64x1xf32>
    %37 = vector.broadcast %36 : vector<64x1xf32> to vector<64x32xf32>
    %38 = arith.mulf %35, %37 : vector<64x32xf32>
    %cst_32 = arith.constant dense<0.000000e+00> : vector<32xf32>
    %39 = vector.multi_reduction <add>, %38, %cst_32 [0] : vector<64x32xf32> to vector<32xf32>
    %40 = vector.shape_cast %39 : vector<32xf32> to vector<1x32xf32>
    %c0_33 = arith.constant 0 : index
    %c0_34 = arith.constant 0 : index
    %c0_35 = arith.constant 0 : index
    %41 = vector.load %arg6[%c0_33, %c0_34, %c0_35] : memref<1x1x32xf32, #tpu.memory_space<vmem>>, vector<1x1x32xf32>
    %42 = vector.shape_cast %41 : vector<1x1x32xf32> to vector<1x32xf32>
    %43 = vector.shape_cast %40 : vector<1x32xf32> to vector<1x1x32xf32>
    tpu.vector_store %arg6[%c0_33, %c0_34, %c0_35], %43 {strides = array<i32>} : memref<1x1x32xf32, #tpu.memory_space<vmem>>, vector<1x1x32xf32>,
    %44 = arith.mulf %38, %38 : vector<64x32xf32>
    %cst_36 = arith.constant dense<0.000000e+00> : vector<32xf32>
    %45 = vector.multi_reduction <add>, %44, %cst_36 [0] : vector<64x32xf32> to vector<32xf32>
    %46 = vector.shape_cast %45 : vector<32xf32> to vector<1x32xf32>
    %c0_37 = arith.constant 0 : index
    %c0_38 = arith.constant 0 : index
    %c0_39 = arith.constant 0 : index
    %47 = vector.load %arg7[%c0_37, %c0_38, %c0_39] : memref<1x1x32xf32, #tpu.memory_space<vmem>>, vector<1x1x32xf32>
    %48 = vector.shape_cast %47 : vector<1x1x32xf32> to vector<1x32xf32>
    %49 = vector.shape_cast %46 : vector<1x32xf32> to vector<1x1x32xf32>
    tpu.vector_store %arg7[%c0_37, %c0_38, %c0_39], %49 {strides = array<i32>} : memref<1x1x32xf32, #tpu.memory_space<vmem>>, vector<1x1x32xf32>,
    %50 = vector.shape_cast %35 : vector<64x32xf32> to vector<8x8x32xf32>
    %c0_40 = arith.constant 0 : index
    %c0_41 = arith.constant 0 : index
    %c0_42 = arith.constant 0 : index
    %c0_43 = arith.constant 0 : index
    %51 = vector.load %arg5[%c0_40, %c0_41, %c0_42, %c0_43] : memref<1x8x8x32xf32, #tpu.memory_space<vmem>>, vector<1x8x8x32xf32>
    %52 = vector.shape_cast %51 : vector<1x8x8x32xf32> to vector<8x8x32xf32>
    %53 = vector.shape_cast %50 : vector<8x8x32xf32> to vector<1x8x8x32xf32>
    tpu.vector_store %arg5[%c0_40, %c0_41, %c0_42, %c0_43], %53 {strides = array<i32>} : memref<1x8x8x32xf32, #tpu.memory_space<vmem>>, vector<1x8x8x32xf32>,
    return
  }
  func.func @transform_0(%arg0: i32) -> (i32, i32, i32, i32) {
    %c0_i32 = arith.constant 0 : i32
    %c0_i32_0 = arith.constant 0 : i32
    %c0_i32_1 = arith.constant 0 : i32
    %c0_i32_2 = arith.constant 0 : i32
    return %arg0, %c0_i32, %c0_i32_0, %c0_i32_1 : i32, i32, i32, i32
  }
  func.func @transform_1(%arg0: i32) -> (i32, i32, i32) {
    %c0_i32 = arith.constant 0 : i32
    %c0_i32_0 = arith.constant 0 : i32
    %c0_i32_1 = arith.constant 0 : i32
    %c0_i32_2 = arith.constant 0 : i32
    return %c0_i32, %c0_i32_0, %c0_i32_1 : i32, i32, i32
  }
  func.func @transform_2(%arg0: i32) -> (i32, i32) {
    %c0_i32 = arith.constant 0 : i32
    %c0_i32_0 = arith.constant 0 : i32
    %c0_i32_1 = arith.constant 0 : i32
    return %c0_i32, %c0_i32_0 : i32, i32
  }
  func.func @transform_3(%arg0: i32) -> (i32, i32) {
    %c0_i32 = arith.constant 0 : i32
    %c0_i32_0 = arith.constant 0 : i32
    %c0_i32_1 = arith.constant 0 : i32
    return %c0_i32, %c0_i32_0 : i32, i32
  }
  func.func @transform_4(%arg0: i32) -> (i32, i32, i32, i32) {
    %c0_i32 = arith.constant 0 : i32
    %c0_i32_0 = arith.constant 0 : i32
    %c0_i32_1 = arith.constant 0 : i32
    %c0_i32_2 = arith.constant 0 : i32
    return %arg0, %c0_i32, %c0_i32_0, %c0_i32_1 : i32, i32, i32, i32
  }
  func.func @transform_5(%arg0: i32) -> (i32, i32, i32) {
    %c0_i32 = arith.constant 0 : i32
    %c0_i32_0 = arith.constant 0 : i32
    %c0_i32_1 = arith.constant 0 : i32
    return %arg0, %c0_i32, %c0_i32_0 : i32, i32, i32
  }
  func.func @transform_6(%arg0: i32) -> (i32, i32, i32) {
    %c0_i32 = arith.constant 0 : i32
    %c0_i32_0 = arith.constant 0 : i32
    %c0_i32_1 = arith.constant 0 : i32
    return %arg0, %c0_i32, %c0_i32_0 : i32, i32, i32
  }
}

module attributes {stable_mosaic.version = 11 : i64} {
  func.func @conv_tap_kernel(%arg0: i32, %arg1: memref<1x5x9x128xf32, #tpu.memory_space<vmem>>, %arg2: memref<4x128x64xbf16, #tpu.memory_space<vmem>>, %arg3: memref<1x64xf32, #tpu.memory_space<vmem>>, %arg4: memref<32x1xf32, #tpu.memory_space<vmem>>, %arg5: memref<1x4x8x64xf32, #tpu.memory_space<vmem>>, %arg6: memref<1x1x64xf32, #tpu.memory_space<vmem>>, %arg7: memref<1x1x64xf32, #tpu.memory_space<vmem>>) attributes {dimension_semantics = [#tpu.dimension_semantics<parallel>], iteration_bounds = array<i64: 2>, scalar_prefetch = 0 : i64, scratch_operands = 0 : i64, tpu.core_type = #tpu.core_type<tc>, window_params = [{transform_indices = @transform_0, window_bounds = array<i64: 1, 5, 9, 128>}, {pipeline_mode = #tpu.pipeline_mode<synchronous>, transform_indices = @transform_1, window_bounds = array<i64: 4, 128, 64>}, {pipeline_mode = #tpu.pipeline_mode<synchronous>, transform_indices = @transform_2, window_bounds = array<i64: 1, 64>}, {pipeline_mode = #tpu.pipeline_mode<synchronous>, transform_indices = @transform_3, window_bounds = array<i64: 32, 1>}, {transform_indices = @transform_4, window_bounds = array<i64: 1, 4, 8, 64>}, {transform_indices = @transform_5, window_bounds = array<i64: 1, 1, 64>}, {transform_indices = @transform_6, window_bounds = array<i64: 1, 1, 64>}]} {
    %cst = arith.constant 0.000000e+00 : f32
    %0 = vector.broadcast %cst : f32 to vector<32x64xf32>
    %c0 = arith.constant 0 : index
    %c0_0 = arith.constant 0 : index
    %c0_1 = arith.constant 0 : index
    %c0_2 = arith.constant 0 : index
    %1 = vector.load %arg1[%c0, %c0_0, %c0_1, %c0_2] : memref<1x5x9x128xf32, #tpu.memory_space<vmem>>, vector<1x4x8x128xf32>
    %2 = vector.shape_cast %1 : vector<1x4x8x128xf32> to vector<4x8x128xf32>
    %3 = vector.shape_cast %2 : vector<4x8x128xf32> to vector<32x128xf32>
    %4 = arith.truncf %3 : vector<32x128xf32> to vector<32x128xbf16>
    %c0_3 = arith.constant 0 : index
    %c0_4 = arith.constant 0 : index
    %c0_5 = arith.constant 0 : index
    %5 = vector.load %arg2[%c0_3, %c0_4, %c0_5] : memref<4x128x64xbf16, #tpu.memory_space<vmem>>, vector<1x128x64xbf16>
    %6 = vector.shape_cast %5 : vector<1x128x64xbf16> to vector<128x64xbf16>
    %cst_6 = arith.constant dense<0.000000e+00> : vector<32x64xf32>
    %7 = tpu.matmul %4, %6, %cst_6 {dimension_numbers = #tpu.dot_dimension_numbers<[1], [0], [0], [1], [0, 0, 1, 1], [], []>} : vector<32x128xbf16>, vector<128x64xbf16>, vector<32x64xf32> -> vector<32x64xf32>
    %8 = arith.addf %0, %7 : vector<32x64xf32>
    %c0_7 = arith.constant 0 : index
    %c0_8 = arith.constant 0 : index
    %c1 = arith.constant 1 : index
    %c0_9 = arith.constant 0 : index
    %9 = vector.load %arg1[%c0_7, %c0_8, %c1, %c0_9] : memref<1x5x9x128xf32, #tpu.memory_space<vmem>>, vector<1x4x8x128xf32>
    %10 = vector.shape_cast %9 : vector<1x4x8x128xf32> to vector<4x8x128xf32>
    %11 = vector.shape_cast %10 : vector<4x8x128xf32> to vector<32x128xf32>
    %12 = arith.truncf %11 : vector<32x128xf32> to vector<32x128xbf16>
    %c1_10 = arith.constant 1 : index
    %c0_11 = arith.constant 0 : index
    %c0_12 = arith.constant 0 : index
    %13 = vector.load %arg2[%c1_10, %c0_11, %c0_12] : memref<4x128x64xbf16, #tpu.memory_space<vmem>>, vector<1x128x64xbf16>
    %14 = vector.shape_cast %13 : vector<1x128x64xbf16> to vector<128x64xbf16>
    %cst_13 = arith.constant dense<0.000000e+00> : vector<32x64xf32>
    %15 = tpu.matmul %12, %14, %cst_13 {dimension_numbers = #tpu.dot_dimension_numbers<[1], [0], [0], [1], [0, 0, 1, 1], [], []>} : vector<32x128xbf16>, vector<128x64xbf16>, vector<32x64xf32> -> vector<32x64xf32>
    %16 = arith.addf %8, %15 : vector<32x64xf32>
    %c0_14 = arith.constant 0 : index
    %c1_15 = arith.constant 1 : index
    %c0_16 = arith.constant 0 : index
    %c0_17 = arith.constant 0 : index
    %17 = vector.load %arg1[%c0_14, %c1_15, %c0_16, %c0_17] : memref<1x5x9x128xf32, #tpu.memory_space<vmem>>, vector<1x4x8x128xf32>
    %18 = vector.shape_cast %17 : vector<1x4x8x128xf32> to vector<4x8x128xf32>
    %19 = vector.shape_cast %18 : vector<4x8x128xf32> to vector<32x128xf32>
    %20 = arith.truncf %19 : vector<32x128xf32> to vector<32x128xbf16>
    %c2 = arith.constant 2 : index
    %c0_18 = arith.constant 0 : index
    %c0_19 = arith.constant 0 : index
    %21 = vector.load %arg2[%c2, %c0_18, %c0_19] : memref<4x128x64xbf16, #tpu.memory_space<vmem>>, vector<1x128x64xbf16>
    %22 = vector.shape_cast %21 : vector<1x128x64xbf16> to vector<128x64xbf16>
    %cst_20 = arith.constant dense<0.000000e+00> : vector<32x64xf32>
    %23 = tpu.matmul %20, %22, %cst_20 {dimension_numbers = #tpu.dot_dimension_numbers<[1], [0], [0], [1], [0, 0, 1, 1], [], []>} : vector<32x128xbf16>, vector<128x64xbf16>, vector<32x64xf32> -> vector<32x64xf32>
    %24 = arith.addf %16, %23 : vector<32x64xf32>
    %c0_21 = arith.constant 0 : index
    %c1_22 = arith.constant 1 : index
    %c1_23 = arith.constant 1 : index
    %c0_24 = arith.constant 0 : index
    %25 = vector.load %arg1[%c0_21, %c1_22, %c1_23, %c0_24] : memref<1x5x9x128xf32, #tpu.memory_space<vmem>>, vector<1x4x8x128xf32>
    %26 = vector.shape_cast %25 : vector<1x4x8x128xf32> to vector<4x8x128xf32>
    %27 = vector.shape_cast %26 : vector<4x8x128xf32> to vector<32x128xf32>
    %28 = arith.truncf %27 : vector<32x128xf32> to vector<32x128xbf16>
    %c3 = arith.constant 3 : index
    %c0_25 = arith.constant 0 : index
    %c0_26 = arith.constant 0 : index
    %29 = vector.load %arg2[%c3, %c0_25, %c0_26] : memref<4x128x64xbf16, #tpu.memory_space<vmem>>, vector<1x128x64xbf16>
    %30 = vector.shape_cast %29 : vector<1x128x64xbf16> to vector<128x64xbf16>
    %cst_27 = arith.constant dense<0.000000e+00> : vector<32x64xf32>
    %31 = tpu.matmul %28, %30, %cst_27 {dimension_numbers = #tpu.dot_dimension_numbers<[1], [0], [0], [1], [0, 0, 1, 1], [], []>} : vector<32x128xbf16>, vector<128x64xbf16>, vector<32x64xf32> -> vector<32x64xf32>
    %32 = arith.addf %24, %31 : vector<32x64xf32>
    %c0_28 = arith.constant 0 : index
    %c0_29 = arith.constant 0 : index
    %33 = vector.load %arg3[%c0_28, %c0_29] : memref<1x64xf32, #tpu.memory_space<vmem>>, vector<1x64xf32>
    %34 = vector.broadcast %33 : vector<1x64xf32> to vector<32x64xf32>
    %35 = arith.addf %32, %34 : vector<32x64xf32>
    %c0_30 = arith.constant 0 : index
    %c0_31 = arith.constant 0 : index
    %36 = vector.load %arg4[%c0_30, %c0_31] : memref<32x1xf32, #tpu.memory_space<vmem>>, vector<32x1xf32>
    %37 = vector.broadcast %36 : vector<32x1xf32> to vector<32x64xf32>
    %38 = arith.mulf %35, %37 : vector<32x64xf32>
    %cst_32 = arith.constant dense<0.000000e+00> : vector<64xf32>
    %39 = vector.multi_reduction <add>, %38, %cst_32 [0] : vector<32x64xf32> to vector<64xf32>
    %40 = vector.shape_cast %39 : vector<64xf32> to vector<1x64xf32>
    %c0_33 = arith.constant 0 : index
    %c0_34 = arith.constant 0 : index
    %c0_35 = arith.constant 0 : index
    %41 = vector.load %arg6[%c0_33, %c0_34, %c0_35] : memref<1x1x64xf32, #tpu.memory_space<vmem>>, vector<1x1x64xf32>
    %42 = vector.shape_cast %41 : vector<1x1x64xf32> to vector<1x64xf32>
    %43 = vector.shape_cast %40 : vector<1x64xf32> to vector<1x1x64xf32>
    tpu.vector_store %arg6[%c0_33, %c0_34, %c0_35], %43 {strides = array<i32>} : memref<1x1x64xf32, #tpu.memory_space<vmem>>, vector<1x1x64xf32>,
    %44 = arith.mulf %38, %38 : vector<32x64xf32>
    %cst_36 = arith.constant dense<0.000000e+00> : vector<64xf32>
    %45 = vector.multi_reduction <add>, %44, %cst_36 [0] : vector<32x64xf32> to vector<64xf32>
    %46 = vector.shape_cast %45 : vector<64xf32> to vector<1x64xf32>
    %c0_37 = arith.constant 0 : index
    %c0_38 = arith.constant 0 : index
    %c0_39 = arith.constant 0 : index
    %47 = vector.load %arg7[%c0_37, %c0_38, %c0_39] : memref<1x1x64xf32, #tpu.memory_space<vmem>>, vector<1x1x64xf32>
    %48 = vector.shape_cast %47 : vector<1x1x64xf32> to vector<1x64xf32>
    %49 = vector.shape_cast %46 : vector<1x64xf32> to vector<1x1x64xf32>
    tpu.vector_store %arg7[%c0_37, %c0_38, %c0_39], %49 {strides = array<i32>} : memref<1x1x64xf32, #tpu.memory_space<vmem>>, vector<1x1x64xf32>,
    %50 = vector.shape_cast %35 : vector<32x64xf32> to vector<4x8x64xf32>
    %c0_40 = arith.constant 0 : index
    %c0_41 = arith.constant 0 : index
    %c0_42 = arith.constant 0 : index
    %c0_43 = arith.constant 0 : index
    %51 = vector.load %arg5[%c0_40, %c0_41, %c0_42, %c0_43] : memref<1x4x8x64xf32, #tpu.memory_space<vmem>>, vector<1x4x8x64xf32>
    %52 = vector.shape_cast %51 : vector<1x4x8x64xf32> to vector<4x8x64xf32>
    %53 = vector.shape_cast %50 : vector<4x8x64xf32> to vector<1x4x8x64xf32>
    tpu.vector_store %arg5[%c0_40, %c0_41, %c0_42, %c0_43], %53 {strides = array<i32>} : memref<1x4x8x64xf32, #tpu.memory_space<vmem>>, vector<1x4x8x64xf32>,
    return
  }
  func.func @transform_0(%arg0: i32) -> (i32, i32, i32, i32) {
    %c0_i32 = arith.constant 0 : i32
    %c0_i32_0 = arith.constant 0 : i32
    %c0_i32_1 = arith.constant 0 : i32
    %c0_i32_2 = arith.constant 0 : i32
    return %arg0, %c0_i32, %c0_i32_0, %c0_i32_1 : i32, i32, i32, i32
  }
  func.func @transform_1(%arg0: i32) -> (i32, i32, i32) {
    %c0_i32 = arith.constant 0 : i32
    %c0_i32_0 = arith.constant 0 : i32
    %c0_i32_1 = arith.constant 0 : i32
    %c0_i32_2 = arith.constant 0 : i32
    return %c0_i32, %c0_i32_0, %c0_i32_1 : i32, i32, i32
  }
  func.func @transform_2(%arg0: i32) -> (i32, i32) {
    %c0_i32 = arith.constant 0 : i32
    %c0_i32_0 = arith.constant 0 : i32
    %c0_i32_1 = arith.constant 0 : i32
    return %c0_i32, %c0_i32_0 : i32, i32
  }
  func.func @transform_3(%arg0: i32) -> (i32, i32) {
    %c0_i32 = arith.constant 0 : i32
    %c0_i32_0 = arith.constant 0 : i32
    %c0_i32_1 = arith.constant 0 : i32
    return %c0_i32, %c0_i32_0 : i32, i32
  }
  func.func @transform_4(%arg0: i32) -> (i32, i32, i32, i32) {
    %c0_i32 = arith.constant 0 : i32
    %c0_i32_0 = arith.constant 0 : i32
    %c0_i32_1 = arith.constant 0 : i32
    %c0_i32_2 = arith.constant 0 : i32
    return %arg0, %c0_i32, %c0_i32_0, %c0_i32_1 : i32, i32, i32, i32
  }
  func.func @transform_5(%arg0: i32) -> (i32, i32, i32) {
    %c0_i32 = arith.constant 0 : i32
    %c0_i32_0 = arith.constant 0 : i32
    %c0_i32_1 = arith.constant 0 : i32
    return %arg0, %c0_i32, %c0_i32_0 : i32, i32, i32
  }
  func.func @transform_6(%arg0: i32) -> (i32, i32, i32) {
    %c0_i32 = arith.constant 0 : i32
    %c0_i32_0 = arith.constant 0 : i32
    %c0_i32_1 = arith.constant 0 : i32
    return %arg0, %c0_i32, %c0_i32_0 : i32, i32, i32
  }
}

module attributes {stable_mosaic.version = 11 : i64} {
  func.func @conv_tap_kernel(%arg0: i32, %arg1: memref<1x6x11x64xf32, #tpu.memory_space<vmem>>, %arg2: memref<16x64x128xbf16, #tpu.memory_space<vmem>>, %arg3: memref<1x128xf32, #tpu.memory_space<vmem>>, %arg4: memref<24x1xf32, #tpu.memory_space<vmem>>, %arg5: memref<1x3x8x128xf32, #tpu.memory_space<vmem>>, %arg6: memref<1x1x128xf32, #tpu.memory_space<vmem>>, %arg7: memref<1x1x128xf32, #tpu.memory_space<vmem>>) attributes {dimension_semantics = [#tpu.dimension_semantics<parallel>], iteration_bounds = array<i64: 2>, scalar_prefetch = 0 : i64, scratch_operands = 0 : i64, tpu.core_type = #tpu.core_type<tc>, window_params = [{transform_indices = @transform_0, window_bounds = array<i64: 1, 6, 11, 64>}, {pipeline_mode = #tpu.pipeline_mode<synchronous>, transform_indices = @transform_1, window_bounds = array<i64: 16, 64, 128>}, {pipeline_mode = #tpu.pipeline_mode<synchronous>, transform_indices = @transform_2, window_bounds = array<i64: 1, 128>}, {pipeline_mode = #tpu.pipeline_mode<synchronous>, transform_indices = @transform_3, window_bounds = array<i64: 24, 1>}, {transform_indices = @transform_4, window_bounds = array<i64: 1, 3, 8, 128>}, {transform_indices = @transform_5, window_bounds = array<i64: 1, 1, 128>}, {transform_indices = @transform_6, window_bounds = array<i64: 1, 1, 128>}]} {
    %cst = arith.constant 0.000000e+00 : f32
    %0 = vector.broadcast %cst : f32 to vector<24x128xf32>
    %c0 = arith.constant 0 : index
    %c0_0 = arith.constant 0 : index
    %c0_1 = arith.constant 0 : index
    %c0_2 = arith.constant 0 : index
    %1 = vector.load %arg1[%c0, %c0_0, %c0_1, %c0_2] : memref<1x6x11x64xf32, #tpu.memory_space<vmem>>, vector<1x3x8x64xf32>
    %2 = vector.shape_cast %1 : vector<1x3x8x64xf32> to vector<3x8x64xf32>
    %3 = vector.shape_cast %2 : vector<3x8x64xf32> to vector<24x64xf32>
    %4 = arith.truncf %3 : vector<24x64xf32> to vector<24x64xbf16>
    %c0_3 = arith.constant 0 : index
    %c0_4 = arith.constant 0 : index
    %c0_5 = arith.constant 0 : index
    %5 = vector.load %arg2[%c0_3, %c0_4, %c0_5] : memref<16x64x128xbf16, #tpu.memory_space<vmem>>, vector<1x64x128xbf16>
    %6 = vector.shape_cast %5 : vector<1x64x128xbf16> to vector<64x128xbf16>
    %cst_6 = arith.constant dense<0.000000e+00> : vector<24x128xf32>
    %7 = tpu.matmul %4, %6, %cst_6 {dimension_numbers = #tpu.dot_dimension_numbers<[1], [0], [0], [1], [0, 0, 1, 1], [], []>} : vector<24x64xbf16>, vector<64x128xbf16>, vector<24x128xf32> -> vector<24x128xf32>
    %8 = arith.addf %0, %7 : vector<24x128xf32>
    %c0_7 = arith.constant 0 : index
    %c0_8 = arith.constant 0 : index
    %c1 = arith.constant 1 : index
    %c0_9 = arith.constant 0 : index
    %9 = vector.load %arg1[%c0_7, %c0_8, %c1, %c0_9] : memref<1x6x11x64xf32, #tpu.memory_space<vmem>>, vector<1x3x8x64xf32>
    %10 = vector.shape_cast %9 : vector<1x3x8x64xf32> to vector<3x8x64xf32>
    %11 = vector.shape_cast %10 : vector<3x8x64xf32> to vector<24x64xf32>
    %12 = arith.truncf %11 : vector<24x64xf32> to vector<24x64xbf16>
    %c1_10 = arith.constant 1 : index
    %c0_11 = arith.constant 0 : index
    %c0_12 = arith.constant 0 : index
    %13 = vector.load %arg2[%c1_10, %c0_11, %c0_12] : memref<16x64x128xbf16, #tpu.memory_space<vmem>>, vector<1x64x128xbf16>
    %14 = vector.shape_cast %13 : vector<1x64x128xbf16> to vector<64x128xbf16>
    %cst_13 = arith.constant dense<0.000000e+00> : vector<24x128xf32>
    %15 = tpu.matmul %12, %14, %cst_13 {dimension_numbers = #tpu.dot_dimension_numbers<[1], [0], [0], [1], [0, 0, 1, 1], [], []>} : vector<24x64xbf16>, vector<64x128xbf16>, vector<24x128xf32> -> vector<24x128xf32>
    %16 = arith.addf %8, %15 : vector<24x128xf32>
    %c0_14 = arith.constant 0 : index
    %c0_15 = arith.constant 0 : index
    %c2 = arith.constant 2 : index
    %c0_16 = arith.constant 0 : index
    %17 = vector.load %arg1[%c0_14, %c0_15, %c2, %c0_16] : memref<1x6x11x64xf32, #tpu.memory_space<vmem>>, vector<1x3x8x64xf32>
    %18 = vector.shape_cast %17 : vector<1x3x8x64xf32> to vector<3x8x64xf32>
    %19 = vector.shape_cast %18 : vector<3x8x64xf32> to vector<24x64xf32>
    %20 = arith.truncf %19 : vector<24x64xf32> to vector<24x64xbf16>
    %c2_17 = arith.constant 2 : index
    %c0_18 = arith.constant 0 : index
    %c0_19 = arith.constant 0 : index
    %21 = vector.load %arg2[%c2_17, %c0_18, %c0_19] : memref<16x64x128xbf16, #tpu.memory_space<vmem>>, vector<1x64x128xbf16>
    %22 = vector.shape_cast %21 : vector<1x64x128xbf16> to vector<64x128xbf16>
    %cst_20 = arith.constant dense<0.000000e+00> : vector<24x128xf32>
    %23 = tpu.matmul %20, %22, %cst_20 {dimension_numbers = #tpu.dot_dimension_numbers<[1], [0], [0], [1], [0, 0, 1, 1], [], []>} : vector<24x64xbf16>, vector<64x128xbf16>, vector<24x128xf32> -> vector<24x128xf32>
    %24 = arith.addf %16, %23 : vector<24x128xf32>
    %c0_21 = arith.constant 0 : index
    %c0_22 = arith.constant 0 : index
    %c3 = arith.constant 3 : index
    %c0_23 = arith.constant 0 : index
    %25 = vector.load %arg1[%c0_21, %c0_22, %c3, %c0_23] : memref<1x6x11x64xf32, #tpu.memory_space<vmem>>, vector<1x3x8x64xf32>
    %26 = vector.shape_cast %25 : vector<1x3x8x64xf32> to vector<3x8x64xf32>
    %27 = vector.shape_cast %26 : vector<3x8x64xf32> to vector<24x64xf32>
    %28 = arith.truncf %27 : vector<24x64xf32> to vector<24x64xbf16>
    %c3_24 = arith.constant 3 : index
    %c0_25 = arith.constant 0 : index
    %c0_26 = arith.constant 0 : index
    %29 = vector.load %arg2[%c3_24, %c0_25, %c0_26] : memref<16x64x128xbf16, #tpu.memory_space<vmem>>, vector<1x64x128xbf16>
    %30 = vector.shape_cast %29 : vector<1x64x128xbf16> to vector<64x128xbf16>
    %cst_27 = arith.constant dense<0.000000e+00> : vector<24x128xf32>
    %31 = tpu.matmul %28, %30, %cst_27 {dimension_numbers = #tpu.dot_dimension_numbers<[1], [0], [0], [1], [0, 0, 1, 1], [], []>} : vector<24x64xbf16>, vector<64x128xbf16>, vector<24x128xf32> -> vector<24x128xf32>
    %32 = arith.addf %24, %31 : vector<24x128xf32>
    %c0_28 = arith.constant 0 : index
    %c1_29 = arith.constant 1 : index
    %c0_30 = arith.constant 0 : index
    %c0_31 = arith.constant 0 : index
    %33 = vector.load %arg1[%c0_28, %c1_29, %c0_30, %c0_31] : memref<1x6x11x64xf32, #tpu.memory_space<vmem>>, vector<1x3x8x64xf32>
    %34 = vector.shape_cast %33 : vector<1x3x8x64xf32> to vector<3x8x64xf32>
    %35 = vector.shape_cast %34 : vector<3x8x64xf32> to vector<24x64xf32>
    %36 = arith.truncf %35 : vector<24x64xf32> to vector<24x64xbf16>
    %c4 = arith.constant 4 : index
    %c0_32 = arith.constant 0 : index
    %c0_33 = arith.constant 0 : index
    %37 = vector.load %arg2[%c4, %c0_32, %c0_33] : memref<16x64x128xbf16, #tpu.memory_space<vmem>>, vector<1x64x128xbf16>
    %38 = vector.shape_cast %37 : vector<1x64x128xbf16> to vector<64x128xbf16>
    %cst_34 = arith.constant dense<0.000000e+00> : vector<24x128xf32>
    %39 = tpu.matmul %36, %38, %cst_34 {dimension_numbers = #tpu.dot_dimension_numbers<[1], [0], [0], [1], [0, 0, 1, 1], [], []>} : vector<24x64xbf16>, vector<64x128xbf16>, vector<24x128xf32> -> vector<24x128xf32>
    %40 = arith.addf %32, %39 : vector<24x128xf32>
    %c0_35 = arith.constant 0 : index
    %c1_36 = arith.constant 1 : index
    %c1_37 = arith.constant 1 : index
    %c0_38 = arith.constant 0 : index
    %41 = vector.load %arg1[%c0_35, %c1_36, %c1_37, %c0_38] : memref<1x6x11x64xf32, #tpu.memory_space<vmem>>, vector<1x3x8x64xf32>
    %42 = vector.shape_cast %41 : vector<1x3x8x64xf32> to vector<3x8x64xf32>
    %43 = vector.shape_cast %42 : vector<3x8x64xf32> to vector<24x64xf32>
    %44 = arith.truncf %43 : vector<24x64xf32> to vector<24x64xbf16>
    %c5 = arith.constant 5 : index
    %c0_39 = arith.constant 0 : index
    %c0_40 = arith.constant 0 : index
    %45 = vector.load %arg2[%c5, %c0_39, %c0_40] : memref<16x64x128xbf16, #tpu.memory_space<vmem>>, vector<1x64x128xbf16>
    %46 = vector.shape_cast %45 : vector<1x64x128xbf16> to vector<64x128xbf16>
    %cst_41 = arith.constant dense<0.000000e+00> : vector<24x128xf32>
    %47 = tpu.matmul %44, %46, %cst_41 {dimension_numbers = #tpu.dot_dimension_numbers<[1], [0], [0], [1], [0, 0, 1, 1], [], []>} : vector<24x64xbf16>, vector<64x128xbf16>, vector<24x128xf32> -> vector<24x128xf32>
    %48 = arith.addf %40, %47 : vector<24x128xf32>
    %c0_42 = arith.constant 0 : index
    %c1_43 = arith.constant 1 : index
    %c2_44 = arith.constant 2 : index
    %c0_45 = arith.constant 0 : index
    %49 = vector.load %arg1[%c0_42, %c1_43, %c2_44, %c0_45] : memref<1x6x11x64xf32, #tpu.memory_space<vmem>>, vector<1x3x8x64xf32>
    %50 = vector.shape_cast %49 : vector<1x3x8x64xf32> to vector<3x8x64xf32>
    %51 = vector.shape_cast %50 : vector<3x8x64xf32> to vector<24x64xf32>
    %52 = arith.truncf %51 : vector<24x64xf32> to vector<24x64xbf16>
    %c6 = arith.constant 6 : index
    %c0_46 = arith.constant 0 : index
    %c0_47 = arith.constant 0 : index
    %53 = vector.load %arg2[%c6, %c0_46, %c0_47] : memref<16x64x128xbf16, #tpu.memory_space<vmem>>, vector<1x64x128xbf16>
    %54 = vector.shape_cast %53 : vector<1x64x128xbf16> to vector<64x128xbf16>
    %cst_48 = arith.constant dense<0.000000e+00> : vector<24x128xf32>
    %55 = tpu.matmul %52, %54, %cst_48 {dimension_numbers = #tpu.dot_dimension_numbers<[1], [0], [0], [1], [0, 0, 1, 1], [], []>} : vector<24x64xbf16>, vector<64x128xbf16>, vector<24x128xf32> -> vector<24x128xf32>
    %56 = arith.addf %48, %55 : vector<24x128xf32>
    %c0_49 = arith.constant 0 : index
    %c1_50 = arith.constant 1 : index
    %c3_51 = arith.constant 3 : index
    %c0_52 = arith.constant 0 : index
    %57 = vector.load %arg1[%c0_49, %c1_50, %c3_51, %c0_52] : memref<1x6x11x64xf32, #tpu.memory_space<vmem>>, vector<1x3x8x64xf32>
    %58 = vector.shape_cast %57 : vector<1x3x8x64xf32> to vector<3x8x64xf32>
    %59 = vector.shape_cast %58 : vector<3x8x64xf32> to vector<24x64xf32>
    %60 = arith.truncf %59 : vector<24x64xf32> to vector<24x64xbf16>
    %c7 = arith.constant 7 : index
    %c0_53 = arith.constant 0 : index
    %c0_54 = arith.constant 0 : index
    %61 = vector.load %arg2[%c7, %c0_53, %c0_54] : memref<16x64x128xbf16, #tpu.memory_space<vmem>>, vector<1x64x128xbf16>
    %62 = vector.shape_cast %61 : vector<1x64x128xbf16> to vector<64x128xbf16>
    %cst_55 = arith.constant dense<0.000000e+00> : vector<24x128xf32>
    %63 = tpu.matmul %60, %62, %cst_55 {dimension_numbers = #tpu.dot_dimension_numbers<[1], [0], [0], [1], [0, 0, 1, 1], [], []>} : vector<24x64xbf16>, vector<64x128xbf16>, vector<24x128xf32> -> vector<24x128xf32>
    %64 = arith.addf %56, %63 : vector<24x128xf32>
    %c0_56 = arith.constant 0 : index
    %c2_57 = arith.constant 2 : index
    %c0_58 = arith.constant 0 : index
    %c0_59 = arith.constant 0 : index
    %65 = vector.load %arg1[%c0_56, %c2_57, %c0_58, %c0_59] : memref<1x6x11x64xf32, #tpu.memory_space<vmem>>, vector<1x3x8x64xf32>
    %66 = vector.shape_cast %65 : vector<1x3x8x64xf32> to vector<3x8x64xf32>
    %67 = vector.shape_cast %66 : vector<3x8x64xf32> to vector<24x64xf32>
    %68 = arith.truncf %67 : vector<24x64xf32> to vector<24x64xbf16>
    %c8 = arith.constant 8 : index
    %c0_60 = arith.constant 0 : index
    %c0_61 = arith.constant 0 : index
    %69 = vector.load %arg2[%c8, %c0_60, %c0_61] : memref<16x64x128xbf16, #tpu.memory_space<vmem>>, vector<1x64x128xbf16>
    %70 = vector.shape_cast %69 : vector<1x64x128xbf16> to vector<64x128xbf16>
    %cst_62 = arith.constant dense<0.000000e+00> : vector<24x128xf32>
    %71 = tpu.matmul %68, %70, %cst_62 {dimension_numbers = #tpu.dot_dimension_numbers<[1], [0], [0], [1], [0, 0, 1, 1], [], []>} : vector<24x64xbf16>, vector<64x128xbf16>, vector<24x128xf32> -> vector<24x128xf32>
    %72 = arith.addf %64, %71 : vector<24x128xf32>
    %c0_63 = arith.constant 0 : index
    %c2_64 = arith.constant 2 : index
    %c1_65 = arith.constant 1 : index
    %c0_66 = arith.constant 0 : index
    %73 = vector.load %arg1[%c0_63, %c2_64, %c1_65, %c0_66] : memref<1x6x11x64xf32, #tpu.memory_space<vmem>>, vector<1x3x8x64xf32>
    %74 = vector.shape_cast %73 : vector<1x3x8x64xf32> to vector<3x8x64xf32>
    %75 = vector.shape_cast %74 : vector<3x8x64xf32> to vector<24x64xf32>
    %76 = arith.truncf %75 : vector<24x64xf32> to vector<24x64xbf16>
    %c9 = arith.constant 9 : index
    %c0_67 = arith.constant 0 : index
    %c0_68 = arith.constant 0 : index
    %77 = vector.load %arg2[%c9, %c0_67, %c0_68] : memref<16x64x128xbf16, #tpu.memory_space<vmem>>, vector<1x64x128xbf16>
    %78 = vector.shape_cast %77 : vector<1x64x128xbf16> to vector<64x128xbf16>
    %cst_69 = arith.constant dense<0.000000e+00> : vector<24x128xf32>
    %79 = tpu.matmul %76, %78, %cst_69 {dimension_numbers = #tpu.dot_dimension_numbers<[1], [0], [0], [1], [0, 0, 1, 1], [], []>} : vector<24x64xbf16>, vector<64x128xbf16>, vector<24x128xf32> -> vector<24x128xf32>
    %80 = arith.addf %72, %79 : vector<24x128xf32>
    %c0_70 = arith.constant 0 : index
    %c2_71 = arith.constant 2 : index
    %c2_72 = arith.constant 2 : index
    %c0_73 = arith.constant 0 : index
    %81 = vector.load %arg1[%c0_70, %c2_71, %c2_72, %c0_73] : memref<1x6x11x64xf32, #tpu.memory_space<vmem>>, vector<1x3x8x64xf32>
    %82 = vector.shape_cast %81 : vector<1x3x8x64xf32> to vector<3x8x64xf32>
    %83 = vector.shape_cast %82 : vector<3x8x64xf32> to vector<24x64xf32>
    %84 = arith.truncf %83 : vector<24x64xf32> to vector<24x64xbf16>
    %c10 = arith.constant 10 : index
    %c0_74 = arith.constant 0 : index
    %c0_75 = arith.constant 0 : index
    %85 = vector.load %arg2[%c10, %c0_74, %c0_75] : memref<16x64x128xbf16, #tpu.memory_space<vmem>>, vector<1x64x128xbf16>
    %86 = vector.shape_cast %85 : vector<1x64x128xbf16> to vector<64x128xbf16>
    %cst_76 = arith.constant dense<0.000000e+00> : vector<24x128xf32>
    %87 = tpu.matmul %84, %86, %cst_76 {dimension_numbers = #tpu.dot_dimension_numbers<[1], [0], [0], [1], [0, 0, 1, 1], [], []>} : vector<24x64xbf16>, vector<64x128xbf16>, vector<24x128xf32> -> vector<24x128xf32>
    %88 = arith.addf %80, %87 : vector<24x128xf32>
    %c0_77 = arith.constant 0 : index
    %c2_78 = arith.constant 2 : index
    %c3_79 = arith.constant 3 : index
    %c0_80 = arith.constant 0 : index
    %89 = vector.load %arg1[%c0_77, %c2_78, %c3_79, %c0_80] : memref<1x6x11x64xf32, #tpu.memory_space<vmem>>, vector<1x3x8x64xf32>
    %90 = vector.shape_cast %89 : vector<1x3x8x64xf32> to vector<3x8x64xf32>
    %91 = vector.shape_cast %90 : vector<3x8x64xf32> to vector<24x64xf32>
    %92 = arith.truncf %91 : vector<24x64xf32> to vector<24x64xbf16>
    %c11 = arith.constant 11 : index
    %c0_81 = arith.constant 0 : index
    %c0_82 = arith.constant 0 : index
    %93 = vector.load %arg2[%c11, %c0_81, %c0_82] : memref<16x64x128xbf16, #tpu.memory_space<vmem>>, vector<1x64x128xbf16>
    %94 = vector.shape_cast %93 : vector<1x64x128xbf16> to vector<64x128xbf16>
    %cst_83 = arith.constant dense<0.000000e+00> : vector<24x128xf32>
    %95 = tpu.matmul %92, %94, %cst_83 {dimension_numbers = #tpu.dot_dimension_numbers<[1], [0], [0], [1], [0, 0, 1, 1], [], []>} : vector<24x64xbf16>, vector<64x128xbf16>, vector<24x128xf32> -> vector<24x128xf32>
    %96 = arith.addf %88, %95 : vector<24x128xf32>
    %c0_84 = arith.constant 0 : index
    %c3_85 = arith.constant 3 : index
    %c0_86 = arith.constant 0 : index
    %c0_87 = arith.constant 0 : index
    %97 = vector.load %arg1[%c0_84, %c3_85, %c0_86, %c0_87] : memref<1x6x11x64xf32, #tpu.memory_space<vmem>>, vector<1x3x8x64xf32>
    %98 = vector.shape_cast %97 : vector<1x3x8x64xf32> to vector<3x8x64xf32>
    %99 = vector.shape_cast %98 : vector<3x8x64xf32> to vector<24x64xf32>
    %100 = arith.truncf %99 : vector<24x64xf32> to vector<24x64xbf16>
    %c12 = arith.constant 12 : index
    %c0_88 = arith.constant 0 : index
    %c0_89 = arith.constant 0 : index
    %101 = vector.load %arg2[%c12, %c0_88, %c0_89] : memref<16x64x128xbf16, #tpu.memory_space<vmem>>, vector<1x64x128xbf16>
    %102 = vector.shape_cast %101 : vector<1x64x128xbf16> to vector<64x128xbf16>
    %cst_90 = arith.constant dense<0.000000e+00> : vector<24x128xf32>
    %103 = tpu.matmul %100, %102, %cst_90 {dimension_numbers = #tpu.dot_dimension_numbers<[1], [0], [0], [1], [0, 0, 1, 1], [], []>} : vector<24x64xbf16>, vector<64x128xbf16>, vector<24x128xf32> -> vector<24x128xf32>
    %104 = arith.addf %96, %103 : vector<24x128xf32>
    %c0_91 = arith.constant 0 : index
    %c3_92 = arith.constant 3 : index
    %c1_93 = arith.constant 1 : index
    %c0_94 = arith.constant 0 : index
    %105 = vector.load %arg1[%c0_91, %c3_92, %c1_93, %c0_94] : memref<1x6x11x64xf32, #tpu.memory_space<vmem>>, vector<1x3x8x64xf32>
    %106 = vector.shape_cast %105 : vector<1x3x8x64xf32> to vector<3x8x64xf32>
    %107 = vector.shape_cast %106 : vector<3x8x64xf32> to vector<24x64xf32>
    %108 = arith.truncf %107 : vector<24x64xf32> to vector<24x64xbf16>
    %c13 = arith.constant 13 : index
    %c0_95 = arith.constant 0 : index
    %c0_96 = arith.constant 0 : index
    %109 = vector.load %arg2[%c13, %c0_95, %c0_96] : memref<16x64x128xbf16, #tpu.memory_space<vmem>>, vector<1x64x128xbf16>
    %110 = vector.shape_cast %109 : vector<1x64x128xbf16> to vector<64x128xbf16>
    %cst_97 = arith.constant dense<0.000000e+00> : vector<24x128xf32>
    %111 = tpu.matmul %108, %110, %cst_97 {dimension_numbers = #tpu.dot_dimension_numbers<[1], [0], [0], [1], [0, 0, 1, 1], [], []>} : vector<24x64xbf16>, vector<64x128xbf16>, vector<24x128xf32> -> vector<24x128xf32>
    %112 = arith.addf %104, %111 : vector<24x128xf32>
    %c0_98 = arith.constant 0 : index
    %c3_99 = arith.constant 3 : index
    %c2_100 = arith.constant 2 : index
    %c0_101 = arith.constant 0 : index
    %113 = vector.load %arg1[%c0_98, %c3_99, %c2_100, %c0_101] : memref<1x6x11x64xf32, #tpu.memory_space<vmem>>, vector<1x3x8x64xf32>
    %114 = vector.shape_cast %113 : vector<1x3x8x64xf32> to vector<3x8x64xf32>
    %115 = vector.shape_cast %114 : vector<3x8x64xf32> to vector<24x64xf32>
    %116 = arith.truncf %115 : vector<24x64xf32> to vector<24x64xbf16>
    %c14 = arith.constant 14 : index
    %c0_102 = arith.constant 0 : index
    %c0_103 = arith.constant 0 : index
    %117 = vector.load %arg2[%c14, %c0_102, %c0_103] : memref<16x64x128xbf16, #tpu.memory_space<vmem>>, vector<1x64x128xbf16>
    %118 = vector.shape_cast %117 : vector<1x64x128xbf16> to vector<64x128xbf16>
    %cst_104 = arith.constant dense<0.000000e+00> : vector<24x128xf32>
    %119 = tpu.matmul %116, %118, %cst_104 {dimension_numbers = #tpu.dot_dimension_numbers<[1], [0], [0], [1], [0, 0, 1, 1], [], []>} : vector<24x64xbf16>, vector<64x128xbf16>, vector<24x128xf32> -> vector<24x128xf32>
    %120 = arith.addf %112, %119 : vector<24x128xf32>
    %c0_105 = arith.constant 0 : index
    %c3_106 = arith.constant 3 : index
    %c3_107 = arith.constant 3 : index
    %c0_108 = arith.constant 0 : index
    %121 = vector.load %arg1[%c0_105, %c3_106, %c3_107, %c0_108] : memref<1x6x11x64xf32, #tpu.memory_space<vmem>>, vector<1x3x8x64xf32>
    %122 = vector.shape_cast %121 : vector<1x3x8x64xf32> to vector<3x8x64xf32>
    %123 = vector.shape_cast %122 : vector<3x8x64xf32> to vector<24x64xf32>
    %124 = arith.truncf %123 : vector<24x64xf32> to vector<24x64xbf16>
    %c15 = arith.constant 15 : index
    %c0_109 = arith.constant 0 : index
    %c0_110 = arith.constant 0 : index
    %125 = vector.load %arg2[%c15, %c0_109, %c0_110] : memref<16x64x128xbf16, #tpu.memory_space<vmem>>, vector<1x64x128xbf16>
    %126 = vector.shape_cast %125 : vector<1x64x128xbf16> to vector<64x128xbf16>
    %cst_111 = arith.constant dense<0.000000e+00> : vector<24x128xf32>
    %127 = tpu.matmul %124, %126, %cst_111 {dimension_numbers = #tpu.dot_dimension_numbers<[1], [0], [0], [1], [0, 0, 1, 1], [], []>} : vector<24x64xbf16>, vector<64x128xbf16>, vector<24x128xf32> -> vector<24x128xf32>
    %128 = arith.addf %120, %127 : vector<24x128xf32>
    %c0_112 = arith.constant 0 : index
    %c0_113 = arith.constant 0 : index
    %129 = vector.load %arg3[%c0_112, %c0_113] : memref<1x128xf32, #tpu.memory_space<vmem>>, vector<1x128xf32>
    %130 = vector.broadcast %129 : vector<1x128xf32> to vector<24x128xf32>
    %131 = arith.addf %128, %130 : vector<24x128xf32>
    %c0_114 = arith.constant 0 : index
    %c0_115 = arith.constant 0 : index
    %132 = vector.load %arg4[%c0_114, %c0_115] : memref<24x1xf32, #tpu.memory_space<vmem>>, vector<24x1xf32>
    %133 = vector.broadcast %132 : vector<24x1xf32> to vector<24x128xf32>
    %134 = arith.mulf %131, %133 : vector<24x128xf32>
    %cst_116 = arith.constant dense<0.000000e+00> : vector<128xf32>
    %135 = vector.multi_reduction <add>, %134, %cst_116 [0] : vector<24x128xf32> to vector<128xf32>
    %136 = vector.shape_cast %135 : vector<128xf32> to vector<1x128xf32>
    %c0_117 = arith.constant 0 : index
    %c0_118 = arith.constant 0 : index
    %c0_119 = arith.constant 0 : index
    %137 = vector.load %arg6[%c0_117, %c0_118, %c0_119] : memref<1x1x128xf32, #tpu.memory_space<vmem>>, vector<1x1x128xf32>
    %138 = vector.shape_cast %137 : vector<1x1x128xf32> to vector<1x128xf32>
    %139 = vector.shape_cast %136 : vector<1x128xf32> to vector<1x1x128xf32>
    tpu.vector_store %arg6[%c0_117, %c0_118, %c0_119], %139 {strides = array<i32>} : memref<1x1x128xf32, #tpu.memory_space<vmem>>, vector<1x1x128xf32>,
    %140 = arith.mulf %134, %134 : vector<24x128xf32>
    %cst_120 = arith.constant dense<0.000000e+00> : vector<128xf32>
    %141 = vector.multi_reduction <add>, %140, %cst_120 [0] : vector<24x128xf32> to vector<128xf32>
    %142 = vector.shape_cast %141 : vector<128xf32> to vector<1x128xf32>
    %c0_121 = arith.constant 0 : index
    %c0_122 = arith.constant 0 : index
    %c0_123 = arith.constant 0 : index
    %143 = vector.load %arg7[%c0_121, %c0_122, %c0_123] : memref<1x1x128xf32, #tpu.memory_space<vmem>>, vector<1x1x128xf32>
    %144 = vector.shape_cast %143 : vector<1x1x128xf32> to vector<1x128xf32>
    %145 = vector.shape_cast %142 : vector<1x128xf32> to vector<1x1x128xf32>
    tpu.vector_store %arg7[%c0_121, %c0_122, %c0_123], %145 {strides = array<i32>} : memref<1x1x128xf32, #tpu.memory_space<vmem>>, vector<1x1x128xf32>,
    %146 = vector.shape_cast %131 : vector<24x128xf32> to vector<3x8x128xf32>
    %c0_124 = arith.constant 0 : index
    %c0_125 = arith.constant 0 : index
    %c0_126 = arith.constant 0 : index
    %c0_127 = arith.constant 0 : index
    %147 = vector.load %arg5[%c0_124, %c0_125, %c0_126, %c0_127] : memref<1x3x8x128xf32, #tpu.memory_space<vmem>>, vector<1x3x8x128xf32>
    %148 = vector.shape_cast %147 : vector<1x3x8x128xf32> to vector<3x8x128xf32>
    %149 = vector.shape_cast %146 : vector<3x8x128xf32> to vector<1x3x8x128xf32>
    tpu.vector_store %arg5[%c0_124, %c0_125, %c0_126, %c0_127], %149 {strides = array<i32>} : memref<1x3x8x128xf32, #tpu.memory_space<vmem>>, vector<1x3x8x128xf32>,
    return
  }
  func.func @transform_0(%arg0: i32) -> (i32, i32, i32, i32) {
    %c0_i32 = arith.constant 0 : i32
    %c0_i32_0 = arith.constant 0 : i32
    %c0_i32_1 = arith.constant 0 : i32
    %c0_i32_2 = arith.constant 0 : i32
    return %arg0, %c0_i32, %c0_i32_0, %c0_i32_1 : i32, i32, i32, i32
  }
  func.func @transform_1(%arg0: i32) -> (i32, i32, i32) {
    %c0_i32 = arith.constant 0 : i32
    %c0_i32_0 = arith.constant 0 : i32
    %c0_i32_1 = arith.constant 0 : i32
    %c0_i32_2 = arith.constant 0 : i32
    return %c0_i32, %c0_i32_0, %c0_i32_1 : i32, i32, i32
  }
  func.func @transform_2(%arg0: i32) -> (i32, i32) {
    %c0_i32 = arith.constant 0 : i32
    %c0_i32_0 = arith.constant 0 : i32
    %c0_i32_1 = arith.constant 0 : i32
    return %c0_i32, %c0_i32_0 : i32, i32
  }
  func.func @transform_3(%arg0: i32) -> (i32, i32) {
    %c0_i32 = arith.constant 0 : i32
    %c0_i32_0 = arith.constant 0 : i32
    %c0_i32_1 = arith.constant 0 : i32
    return %c0_i32, %c0_i32_0 : i32, i32
  }
  func.func @transform_4(%arg0: i32) -> (i32, i32, i32, i32) {
    %c0_i32 = arith.constant 0 : i32
    %c0_i32_0 = arith.constant 0 : i32
    %c0_i32_1 = arith.constant 0 : i32
    %c0_i32_2 = arith.constant 0 : i32
    return %arg0, %c0_i32, %c0_i32_0, %c0_i32_1 : i32, i32, i32, i32
  }
  func.func @transform_5(%arg0: i32) -> (i32, i32, i32) {
    %c0_i32 = arith.constant 0 : i32
    %c0_i32_0 = arith.constant 0 : i32
    %c0_i32_1 = arith.constant 0 : i32
    return %arg0, %c0_i32, %c0_i32_0 : i32, i32, i32
  }
  func.func @transform_6(%arg0: i32) -> (i32, i32, i32) {
    %c0_i32 = arith.constant 0 : i32
    %c0_i32_0 = arith.constant 0 : i32
    %c0_i32_1 = arith.constant 0 : i32
    return %arg0, %c0_i32, %c0_i32_0 : i32, i32, i32
  }
}

module attributes {stable_mosaic.version = 11 : i64} {
  func.func @conv_tap_kernel(%arg0: i32, %arg1: memref<1x5x11x128xf32, #tpu.memory_space<vmem>>, %arg2: memref<16x128x1xbf16, #tpu.memory_space<vmem>>, %arg3: memref<1x1xf32, #tpu.memory_space<vmem>>, %arg4: memref<1x2x8x1xf32, #tpu.memory_space<vmem>>) attributes {dimension_semantics = [#tpu.dimension_semantics<parallel>], iteration_bounds = array<i64: 2>, scalar_prefetch = 0 : i64, scratch_operands = 0 : i64, tpu.core_type = #tpu.core_type<tc>, window_params = [{transform_indices = @transform_0, window_bounds = array<i64: 1, 5, 11, 128>}, {pipeline_mode = #tpu.pipeline_mode<synchronous>, transform_indices = @transform_1, window_bounds = array<i64: 16, 128, 1>}, {pipeline_mode = #tpu.pipeline_mode<synchronous>, transform_indices = @transform_2, window_bounds = array<i64: 1, 1>}, {transform_indices = @transform_3, window_bounds = array<i64: 1, 2, 8, 1>}]} {
    %cst = arith.constant 0.000000e+00 : f32
    %0 = vector.broadcast %cst : f32 to vector<16x1xf32>
    %c0 = arith.constant 0 : index
    %c0_0 = arith.constant 0 : index
    %c0_1 = arith.constant 0 : index
    %c0_2 = arith.constant 0 : index
    %1 = vector.load %arg1[%c0, %c0_0, %c0_1, %c0_2] : memref<1x5x11x128xf32, #tpu.memory_space<vmem>>, vector<1x2x8x128xf32>
    %2 = vector.shape_cast %1 : vector<1x2x8x128xf32> to vector<2x8x128xf32>
    %3 = vector.shape_cast %2 : vector<2x8x128xf32> to vector<16x128xf32>
    %4 = arith.truncf %3 : vector<16x128xf32> to vector<16x128xbf16>
    %c0_3 = arith.constant 0 : index
    %c0_4 = arith.constant 0 : index
    %c0_5 = arith.constant 0 : index
    %5 = vector.load %arg2[%c0_3, %c0_4, %c0_5] : memref<16x128x1xbf16, #tpu.memory_space<vmem>>, vector<1x128x1xbf16>
    %6 = vector.shape_cast %5 : vector<1x128x1xbf16> to vector<128x1xbf16>
    %cst_6 = arith.constant dense<0.000000e+00> : vector<16x1xf32>
    %7 = tpu.matmul %4, %6, %cst_6 {dimension_numbers = #tpu.dot_dimension_numbers<[1], [0], [0], [1], [0, 0, 1, 1], [], []>} : vector<16x128xbf16>, vector<128x1xbf16>, vector<16x1xf32> -> vector<16x1xf32>
    %8 = arith.addf %0, %7 : vector<16x1xf32>
    %c0_7 = arith.constant 0 : index
    %c0_8 = arith.constant 0 : index
    %c1 = arith.constant 1 : index
    %c0_9 = arith.constant 0 : index
    %9 = vector.load %arg1[%c0_7, %c0_8, %c1, %c0_9] : memref<1x5x11x128xf32, #tpu.memory_space<vmem>>, vector<1x2x8x128xf32>
    %10 = vector.shape_cast %9 : vector<1x2x8x128xf32> to vector<2x8x128xf32>
    %11 = vector.shape_cast %10 : vector<2x8x128xf32> to vector<16x128xf32>
    %12 = arith.truncf %11 : vector<16x128xf32> to vector<16x128xbf16>
    %c1_10 = arith.constant 1 : index
    %c0_11 = arith.constant 0 : index
    %c0_12 = arith.constant 0 : index
    %13 = vector.load %arg2[%c1_10, %c0_11, %c0_12] : memref<16x128x1xbf16, #tpu.memory_space<vmem>>, vector<1x128x1xbf16>
    %14 = vector.shape_cast %13 : vector<1x128x1xbf16> to vector<128x1xbf16>
    %cst_13 = arith.constant dense<0.000000e+00> : vector<16x1xf32>
    %15 = tpu.matmul %12, %14, %cst_13 {dimension_numbers = #tpu.dot_dimension_numbers<[1], [0], [0], [1], [0, 0, 1, 1], [], []>} : vector<16x128xbf16>, vector<128x1xbf16>, vector<16x1xf32> -> vector<16x1xf32>
    %16 = arith.addf %8, %15 : vector<16x1xf32>
    %c0_14 = arith.constant 0 : index
    %c0_15 = arith.constant 0 : index
    %c2 = arith.constant 2 : index
    %c0_16 = arith.constant 0 : index
    %17 = vector.load %arg1[%c0_14, %c0_15, %c2, %c0_16] : memref<1x5x11x128xf32, #tpu.memory_space<vmem>>, vector<1x2x8x128xf32>
    %18 = vector.shape_cast %17 : vector<1x2x8x128xf32> to vector<2x8x128xf32>
    %19 = vector.shape_cast %18 : vector<2x8x128xf32> to vector<16x128xf32>
    %20 = arith.truncf %19 : vector<16x128xf32> to vector<16x128xbf16>
    %c2_17 = arith.constant 2 : index
    %c0_18 = arith.constant 0 : index
    %c0_19 = arith.constant 0 : index
    %21 = vector.load %arg2[%c2_17, %c0_18, %c0_19] : memref<16x128x1xbf16, #tpu.memory_space<vmem>>, vector<1x128x1xbf16>
    %22 = vector.shape_cast %21 : vector<1x128x1xbf16> to vector<128x1xbf16>
    %cst_20 = arith.constant dense<0.000000e+00> : vector<16x1xf32>
    %23 = tpu.matmul %20, %22, %cst_20 {dimension_numbers = #tpu.dot_dimension_numbers<[1], [0], [0], [1], [0, 0, 1, 1], [], []>} : vector<16x128xbf16>, vector<128x1xbf16>, vector<16x1xf32> -> vector<16x1xf32>
    %24 = arith.addf %16, %23 : vector<16x1xf32>
    %c0_21 = arith.constant 0 : index
    %c0_22 = arith.constant 0 : index
    %c3 = arith.constant 3 : index
    %c0_23 = arith.constant 0 : index
    %25 = vector.load %arg1[%c0_21, %c0_22, %c3, %c0_23] : memref<1x5x11x128xf32, #tpu.memory_space<vmem>>, vector<1x2x8x128xf32>
    %26 = vector.shape_cast %25 : vector<1x2x8x128xf32> to vector<2x8x128xf32>
    %27 = vector.shape_cast %26 : vector<2x8x128xf32> to vector<16x128xf32>
    %28 = arith.truncf %27 : vector<16x128xf32> to vector<16x128xbf16>
    %c3_24 = arith.constant 3 : index
    %c0_25 = arith.constant 0 : index
    %c0_26 = arith.constant 0 : index
    %29 = vector.load %arg2[%c3_24, %c0_25, %c0_26] : memref<16x128x1xbf16, #tpu.memory_space<vmem>>, vector<1x128x1xbf16>
    %30 = vector.shape_cast %29 : vector<1x128x1xbf16> to vector<128x1xbf16>
    %cst_27 = arith.constant dense<0.000000e+00> : vector<16x1xf32>
    %31 = tpu.matmul %28, %30, %cst_27 {dimension_numbers = #tpu.dot_dimension_numbers<[1], [0], [0], [1], [0, 0, 1, 1], [], []>} : vector<16x128xbf16>, vector<128x1xbf16>, vector<16x1xf32> -> vector<16x1xf32>
    %32 = arith.addf %24, %31 : vector<16x1xf32>
    %c0_28 = arith.constant 0 : index
    %c1_29 = arith.constant 1 : index
    %c0_30 = arith.constant 0 : index
    %c0_31 = arith.constant 0 : index
    %33 = vector.load %arg1[%c0_28, %c1_29, %c0_30, %c0_31] : memref<1x5x11x128xf32, #tpu.memory_space<vmem>>, vector<1x2x8x128xf32>
    %34 = vector.shape_cast %33 : vector<1x2x8x128xf32> to vector<2x8x128xf32>
    %35 = vector.shape_cast %34 : vector<2x8x128xf32> to vector<16x128xf32>
    %36 = arith.truncf %35 : vector<16x128xf32> to vector<16x128xbf16>
    %c4 = arith.constant 4 : index
    %c0_32 = arith.constant 0 : index
    %c0_33 = arith.constant 0 : index
    %37 = vector.load %arg2[%c4, %c0_32, %c0_33] : memref<16x128x1xbf16, #tpu.memory_space<vmem>>, vector<1x128x1xbf16>
    %38 = vector.shape_cast %37 : vector<1x128x1xbf16> to vector<128x1xbf16>
    %cst_34 = arith.constant dense<0.000000e+00> : vector<16x1xf32>
    %39 = tpu.matmul %36, %38, %cst_34 {dimension_numbers = #tpu.dot_dimension_numbers<[1], [0], [0], [1], [0, 0, 1, 1], [], []>} : vector<16x128xbf16>, vector<128x1xbf16>, vector<16x1xf32> -> vector<16x1xf32>
    %40 = arith.addf %32, %39 : vector<16x1xf32>
    %c0_35 = arith.constant 0 : index
    %c1_36 = arith.constant 1 : index
    %c1_37 = arith.constant 1 : index
    %c0_38 = arith.constant 0 : index
    %41 = vector.load %arg1[%c0_35, %c1_36, %c1_37, %c0_38] : memref<1x5x11x128xf32, #tpu.memory_space<vmem>>, vector<1x2x8x128xf32>
    %42 = vector.shape_cast %41 : vector<1x2x8x128xf32> to vector<2x8x128xf32>
    %43 = vector.shape_cast %42 : vector<2x8x128xf32> to vector<16x128xf32>
    %44 = arith.truncf %43 : vector<16x128xf32> to vector<16x128xbf16>
    %c5 = arith.constant 5 : index
    %c0_39 = arith.constant 0 : index
    %c0_40 = arith.constant 0 : index
    %45 = vector.load %arg2[%c5, %c0_39, %c0_40] : memref<16x128x1xbf16, #tpu.memory_space<vmem>>, vector<1x128x1xbf16>
    %46 = vector.shape_cast %45 : vector<1x128x1xbf16> to vector<128x1xbf16>
    %cst_41 = arith.constant dense<0.000000e+00> : vector<16x1xf32>
    %47 = tpu.matmul %44, %46, %cst_41 {dimension_numbers = #tpu.dot_dimension_numbers<[1], [0], [0], [1], [0, 0, 1, 1], [], []>} : vector<16x128xbf16>, vector<128x1xbf16>, vector<16x1xf32> -> vector<16x1xf32>
    %48 = arith.addf %40, %47 : vector<16x1xf32>
    %c0_42 = arith.constant 0 : index
    %c1_43 = arith.constant 1 : index
    %c2_44 = arith.constant 2 : index
    %c0_45 = arith.constant 0 : index
    %49 = vector.load %arg1[%c0_42, %c1_43, %c2_44, %c0_45] : memref<1x5x11x128xf32, #tpu.memory_space<vmem>>, vector<1x2x8x128xf32>
    %50 = vector.shape_cast %49 : vector<1x2x8x128xf32> to vector<2x8x128xf32>
    %51 = vector.shape_cast %50 : vector<2x8x128xf32> to vector<16x128xf32>
    %52 = arith.truncf %51 : vector<16x128xf32> to vector<16x128xbf16>
    %c6 = arith.constant 6 : index
    %c0_46 = arith.constant 0 : index
    %c0_47 = arith.constant 0 : index
    %53 = vector.load %arg2[%c6, %c0_46, %c0_47] : memref<16x128x1xbf16, #tpu.memory_space<vmem>>, vector<1x128x1xbf16>
    %54 = vector.shape_cast %53 : vector<1x128x1xbf16> to vector<128x1xbf16>
    %cst_48 = arith.constant dense<0.000000e+00> : vector<16x1xf32>
    %55 = tpu.matmul %52, %54, %cst_48 {dimension_numbers = #tpu.dot_dimension_numbers<[1], [0], [0], [1], [0, 0, 1, 1], [], []>} : vector<16x128xbf16>, vector<128x1xbf16>, vector<16x1xf32> -> vector<16x1xf32>
    %56 = arith.addf %48, %55 : vector<16x1xf32>
    %c0_49 = arith.constant 0 : index
    %c1_50 = arith.constant 1 : index
    %c3_51 = arith.constant 3 : index
    %c0_52 = arith.constant 0 : index
    %57 = vector.load %arg1[%c0_49, %c1_50, %c3_51, %c0_52] : memref<1x5x11x128xf32, #tpu.memory_space<vmem>>, vector<1x2x8x128xf32>
    %58 = vector.shape_cast %57 : vector<1x2x8x128xf32> to vector<2x8x128xf32>
    %59 = vector.shape_cast %58 : vector<2x8x128xf32> to vector<16x128xf32>
    %60 = arith.truncf %59 : vector<16x128xf32> to vector<16x128xbf16>
    %c7 = arith.constant 7 : index
    %c0_53 = arith.constant 0 : index
    %c0_54 = arith.constant 0 : index
    %61 = vector.load %arg2[%c7, %c0_53, %c0_54] : memref<16x128x1xbf16, #tpu.memory_space<vmem>>, vector<1x128x1xbf16>
    %62 = vector.shape_cast %61 : vector<1x128x1xbf16> to vector<128x1xbf16>
    %cst_55 = arith.constant dense<0.000000e+00> : vector<16x1xf32>
    %63 = tpu.matmul %60, %62, %cst_55 {dimension_numbers = #tpu.dot_dimension_numbers<[1], [0], [0], [1], [0, 0, 1, 1], [], []>} : vector<16x128xbf16>, vector<128x1xbf16>, vector<16x1xf32> -> vector<16x1xf32>
    %64 = arith.addf %56, %63 : vector<16x1xf32>
    %c0_56 = arith.constant 0 : index
    %c2_57 = arith.constant 2 : index
    %c0_58 = arith.constant 0 : index
    %c0_59 = arith.constant 0 : index
    %65 = vector.load %arg1[%c0_56, %c2_57, %c0_58, %c0_59] : memref<1x5x11x128xf32, #tpu.memory_space<vmem>>, vector<1x2x8x128xf32>
    %66 = vector.shape_cast %65 : vector<1x2x8x128xf32> to vector<2x8x128xf32>
    %67 = vector.shape_cast %66 : vector<2x8x128xf32> to vector<16x128xf32>
    %68 = arith.truncf %67 : vector<16x128xf32> to vector<16x128xbf16>
    %c8 = arith.constant 8 : index
    %c0_60 = arith.constant 0 : index
    %c0_61 = arith.constant 0 : index
    %69 = vector.load %arg2[%c8, %c0_60, %c0_61] : memref<16x128x1xbf16, #tpu.memory_space<vmem>>, vector<1x128x1xbf16>
    %70 = vector.shape_cast %69 : vector<1x128x1xbf16> to vector<128x1xbf16>
    %cst_62 = arith.constant dense<0.000000e+00> : vector<16x1xf32>
    %71 = tpu.matmul %68, %70, %cst_62 {dimension_numbers = #tpu.dot_dimension_numbers<[1], [0], [0], [1], [0, 0, 1, 1], [], []>} : vector<16x128xbf16>, vector<128x1xbf16>, vector<16x1xf32> -> vector<16x1xf32>
    %72 = arith.addf %64, %71 : vector<16x1xf32>
    %c0_63 = arith.constant 0 : index
    %c2_64 = arith.constant 2 : index
    %c1_65 = arith.constant 1 : index
    %c0_66 = arith.constant 0 : index
    %73 = vector.load %arg1[%c0_63, %c2_64, %c1_65, %c0_66] : memref<1x5x11x128xf32, #tpu.memory_space<vmem>>, vector<1x2x8x128xf32>
    %74 = vector.shape_cast %73 : vector<1x2x8x128xf32> to vector<2x8x128xf32>
    %75 = vector.shape_cast %74 : vector<2x8x128xf32> to vector<16x128xf32>
    %76 = arith.truncf %75 : vector<16x128xf32> to vector<16x128xbf16>
    %c9 = arith.constant 9 : index
    %c0_67 = arith.constant 0 : index
    %c0_68 = arith.constant 0 : index
    %77 = vector.load %arg2[%c9, %c0_67, %c0_68] : memref<16x128x1xbf16, #tpu.memory_space<vmem>>, vector<1x128x1xbf16>
    %78 = vector.shape_cast %77 : vector<1x128x1xbf16> to vector<128x1xbf16>
    %cst_69 = arith.constant dense<0.000000e+00> : vector<16x1xf32>
    %79 = tpu.matmul %76, %78, %cst_69 {dimension_numbers = #tpu.dot_dimension_numbers<[1], [0], [0], [1], [0, 0, 1, 1], [], []>} : vector<16x128xbf16>, vector<128x1xbf16>, vector<16x1xf32> -> vector<16x1xf32>
    %80 = arith.addf %72, %79 : vector<16x1xf32>
    %c0_70 = arith.constant 0 : index
    %c2_71 = arith.constant 2 : index
    %c2_72 = arith.constant 2 : index
    %c0_73 = arith.constant 0 : index
    %81 = vector.load %arg1[%c0_70, %c2_71, %c2_72, %c0_73] : memref<1x5x11x128xf32, #tpu.memory_space<vmem>>, vector<1x2x8x128xf32>
    %82 = vector.shape_cast %81 : vector<1x2x8x128xf32> to vector<2x8x128xf32>
    %83 = vector.shape_cast %82 : vector<2x8x128xf32> to vector<16x128xf32>
    %84 = arith.truncf %83 : vector<16x128xf32> to vector<16x128xbf16>
    %c10 = arith.constant 10 : index
    %c0_74 = arith.constant 0 : index
    %c0_75 = arith.constant 0 : index
    %85 = vector.load %arg2[%c10, %c0_74, %c0_75] : memref<16x128x1xbf16, #tpu.memory_space<vmem>>, vector<1x128x1xbf16>
    %86 = vector.shape_cast %85 : vector<1x128x1xbf16> to vector<128x1xbf16>
    %cst_76 = arith.constant dense<0.000000e+00> : vector<16x1xf32>
    %87 = tpu.matmul %84, %86, %cst_76 {dimension_numbers = #tpu.dot_dimension_numbers<[1], [0], [0], [1], [0, 0, 1, 1], [], []>} : vector<16x128xbf16>, vector<128x1xbf16>, vector<16x1xf32> -> vector<16x1xf32>
    %88 = arith.addf %80, %87 : vector<16x1xf32>
    %c0_77 = arith.constant 0 : index
    %c2_78 = arith.constant 2 : index
    %c3_79 = arith.constant 3 : index
    %c0_80 = arith.constant 0 : index
    %89 = vector.load %arg1[%c0_77, %c2_78, %c3_79, %c0_80] : memref<1x5x11x128xf32, #tpu.memory_space<vmem>>, vector<1x2x8x128xf32>
    %90 = vector.shape_cast %89 : vector<1x2x8x128xf32> to vector<2x8x128xf32>
    %91 = vector.shape_cast %90 : vector<2x8x128xf32> to vector<16x128xf32>
    %92 = arith.truncf %91 : vector<16x128xf32> to vector<16x128xbf16>
    %c11 = arith.constant 11 : index
    %c0_81 = arith.constant 0 : index
    %c0_82 = arith.constant 0 : index
    %93 = vector.load %arg2[%c11, %c0_81, %c0_82] : memref<16x128x1xbf16, #tpu.memory_space<vmem>>, vector<1x128x1xbf16>
    %94 = vector.shape_cast %93 : vector<1x128x1xbf16> to vector<128x1xbf16>
    %cst_83 = arith.constant dense<0.000000e+00> : vector<16x1xf32>
    %95 = tpu.matmul %92, %94, %cst_83 {dimension_numbers = #tpu.dot_dimension_numbers<[1], [0], [0], [1], [0, 0, 1, 1], [], []>} : vector<16x128xbf16>, vector<128x1xbf16>, vector<16x1xf32> -> vector<16x1xf32>
    %96 = arith.addf %88, %95 : vector<16x1xf32>
    %c0_84 = arith.constant 0 : index
    %c3_85 = arith.constant 3 : index
    %c0_86 = arith.constant 0 : index
    %c0_87 = arith.constant 0 : index
    %97 = vector.load %arg1[%c0_84, %c3_85, %c0_86, %c0_87] : memref<1x5x11x128xf32, #tpu.memory_space<vmem>>, vector<1x2x8x128xf32>
    %98 = vector.shape_cast %97 : vector<1x2x8x128xf32> to vector<2x8x128xf32>
    %99 = vector.shape_cast %98 : vector<2x8x128xf32> to vector<16x128xf32>
    %100 = arith.truncf %99 : vector<16x128xf32> to vector<16x128xbf16>
    %c12 = arith.constant 12 : index
    %c0_88 = arith.constant 0 : index
    %c0_89 = arith.constant 0 : index
    %101 = vector.load %arg2[%c12, %c0_88, %c0_89] : memref<16x128x1xbf16, #tpu.memory_space<vmem>>, vector<1x128x1xbf16>
    %102 = vector.shape_cast %101 : vector<1x128x1xbf16> to vector<128x1xbf16>
    %cst_90 = arith.constant dense<0.000000e+00> : vector<16x1xf32>
    %103 = tpu.matmul %100, %102, %cst_90 {dimension_numbers = #tpu.dot_dimension_numbers<[1], [0], [0], [1], [0, 0, 1, 1], [], []>} : vector<16x128xbf16>, vector<128x1xbf16>, vector<16x1xf32> -> vector<16x1xf32>
    %104 = arith.addf %96, %103 : vector<16x1xf32>
    %c0_91 = arith.constant 0 : index
    %c3_92 = arith.constant 3 : index
    %c1_93 = arith.constant 1 : index
    %c0_94 = arith.constant 0 : index
    %105 = vector.load %arg1[%c0_91, %c3_92, %c1_93, %c0_94] : memref<1x5x11x128xf32, #tpu.memory_space<vmem>>, vector<1x2x8x128xf32>
    %106 = vector.shape_cast %105 : vector<1x2x8x128xf32> to vector<2x8x128xf32>
    %107 = vector.shape_cast %106 : vector<2x8x128xf32> to vector<16x128xf32>
    %108 = arith.truncf %107 : vector<16x128xf32> to vector<16x128xbf16>
    %c13 = arith.constant 13 : index
    %c0_95 = arith.constant 0 : index
    %c0_96 = arith.constant 0 : index
    %109 = vector.load %arg2[%c13, %c0_95, %c0_96] : memref<16x128x1xbf16, #tpu.memory_space<vmem>>, vector<1x128x1xbf16>
    %110 = vector.shape_cast %109 : vector<1x128x1xbf16> to vector<128x1xbf16>
    %cst_97 = arith.constant dense<0.000000e+00> : vector<16x1xf32>
    %111 = tpu.matmul %108, %110, %cst_97 {dimension_numbers = #tpu.dot_dimension_numbers<[1], [0], [0], [1], [0, 0, 1, 1], [], []>} : vector<16x128xbf16>, vector<128x1xbf16>, vector<16x1xf32> -> vector<16x1xf32>
    %112 = arith.addf %104, %111 : vector<16x1xf32>
    %c0_98 = arith.constant 0 : index
    %c3_99 = arith.constant 3 : index
    %c2_100 = arith.constant 2 : index
    %c0_101 = arith.constant 0 : index
    %113 = vector.load %arg1[%c0_98, %c3_99, %c2_100, %c0_101] : memref<1x5x11x128xf32, #tpu.memory_space<vmem>>, vector<1x2x8x128xf32>
    %114 = vector.shape_cast %113 : vector<1x2x8x128xf32> to vector<2x8x128xf32>
    %115 = vector.shape_cast %114 : vector<2x8x128xf32> to vector<16x128xf32>
    %116 = arith.truncf %115 : vector<16x128xf32> to vector<16x128xbf16>
    %c14 = arith.constant 14 : index
    %c0_102 = arith.constant 0 : index
    %c0_103 = arith.constant 0 : index
    %117 = vector.load %arg2[%c14, %c0_102, %c0_103] : memref<16x128x1xbf16, #tpu.memory_space<vmem>>, vector<1x128x1xbf16>
    %118 = vector.shape_cast %117 : vector<1x128x1xbf16> to vector<128x1xbf16>
    %cst_104 = arith.constant dense<0.000000e+00> : vector<16x1xf32>
    %119 = tpu.matmul %116, %118, %cst_104 {dimension_numbers = #tpu.dot_dimension_numbers<[1], [0], [0], [1], [0, 0, 1, 1], [], []>} : vector<16x128xbf16>, vector<128x1xbf16>, vector<16x1xf32> -> vector<16x1xf32>
    %120 = arith.addf %112, %119 : vector<16x1xf32>
    %c0_105 = arith.constant 0 : index
    %c3_106 = arith.constant 3 : index
    %c3_107 = arith.constant 3 : index
    %c0_108 = arith.constant 0 : index
    %121 = vector.load %arg1[%c0_105, %c3_106, %c3_107, %c0_108] : memref<1x5x11x128xf32, #tpu.memory_space<vmem>>, vector<1x2x8x128xf32>
    %122 = vector.shape_cast %121 : vector<1x2x8x128xf32> to vector<2x8x128xf32>
    %123 = vector.shape_cast %122 : vector<2x8x128xf32> to vector<16x128xf32>
    %124 = arith.truncf %123 : vector<16x128xf32> to vector<16x128xbf16>
    %c15 = arith.constant 15 : index
    %c0_109 = arith.constant 0 : index
    %c0_110 = arith.constant 0 : index
    %125 = vector.load %arg2[%c15, %c0_109, %c0_110] : memref<16x128x1xbf16, #tpu.memory_space<vmem>>, vector<1x128x1xbf16>
    %126 = vector.shape_cast %125 : vector<1x128x1xbf16> to vector<128x1xbf16>
    %cst_111 = arith.constant dense<0.000000e+00> : vector<16x1xf32>
    %127 = tpu.matmul %124, %126, %cst_111 {dimension_numbers = #tpu.dot_dimension_numbers<[1], [0], [0], [1], [0, 0, 1, 1], [], []>} : vector<16x128xbf16>, vector<128x1xbf16>, vector<16x1xf32> -> vector<16x1xf32>
    %128 = arith.addf %120, %127 : vector<16x1xf32>
    %c0_112 = arith.constant 0 : index
    %c0_113 = arith.constant 0 : index
    %129 = vector.load %arg3[%c0_112, %c0_113] : memref<1x1xf32, #tpu.memory_space<vmem>>, vector<1x1xf32>
    %130 = vector.broadcast %129 : vector<1x1xf32> to vector<16x1xf32>
    %131 = arith.addf %128, %130 : vector<16x1xf32>
    %132 = vector.shape_cast %131 : vector<16x1xf32> to vector<2x8x1xf32>
    %c0_114 = arith.constant 0 : index
    %c0_115 = arith.constant 0 : index
    %c0_116 = arith.constant 0 : index
    %c0_117 = arith.constant 0 : index
    %133 = vector.load %arg4[%c0_114, %c0_115, %c0_116, %c0_117] : memref<1x2x8x1xf32, #tpu.memory_space<vmem>>, vector<1x2x8x1xf32>
    %134 = vector.shape_cast %133 : vector<1x2x8x1xf32> to vector<2x8x1xf32>
    %135 = vector.shape_cast %132 : vector<2x8x1xf32> to vector<1x2x8x1xf32>
    tpu.vector_store %arg4[%c0_114, %c0_115, %c0_116, %c0_117], %135 {strides = array<i32>} : memref<1x2x8x1xf32, #tpu.memory_space<vmem>>, vector<1x2x8x1xf32>,
    return
  }
  func.func @transform_0(%arg0: i32) -> (i32, i32, i32, i32) {
    %c0_i32 = arith.constant 0 : i32
    %c0_i32_0 = arith.constant 0 : i32
    %c0_i32_1 = arith.constant 0 : i32
    %c0_i32_2 = arith.constant 0 : i32
    return %arg0, %c0_i32, %c0_i32_0, %c0_i32_1 : i32, i32, i32, i32
  }
  func.func @transform_1(%arg0: i32) -> (i32, i32, i32) {
    %c0_i32 = arith.constant 0 : i32
    %c0_i32_0 = arith.constant 0 : i32
    %c0_i32_1 = arith.constant 0 : i32
    %c0_i32_2 = arith.constant 0 : i32
    return %c0_i32, %c0_i32_0, %c0_i32_1 : i32, i32, i32
  }
  func.func @transform_2(%arg0: i32) -> (i32, i32) {
    %c0_i32 = arith.constant 0 : i32
    %c0_i32_0 = arith.constant 0 : i32
    %c0_i32_1 = arith.constant 0 : i32
    return %c0_i32, %c0_i32_0 : i32, i32
  }
  func.func @transform_3(%arg0: i32) -> (i32, i32, i32, i32) {
    %c0_i32 = arith.constant 0 : i32
    %c0_i32_0 = arith.constant 0 : i32
    %c0_i32_1 = arith.constant 0 : i32
    %c0_i32_2 = arith.constant 0 : i32
    return %arg0, %c0_i32, %c0_i32_0, %c0_i32_1 : i32, i32, i32, i32
  }
}

</mosaic_0001>

<bundles_post_ra>
// kernel: patchgan_forward.5
= control target key start
LH: loop header
LB: loop body
LE: loop exit
PB: predicated region body
PF: predicated region fallthrough
CT: control target
= control target key end

     0   :  { %s1445_s12 = smov 0   ;;  %s1731_s0 = inlined_call_operand.vmem [shape: f32[2,17,17,12], index: 0, kind: input, shape index: {}]   ;;  %s1732_s1 = inlined_call_operand.vmem [shape: bf16[4,12,16], index: 1, kind: input, shape index: {}]   ;;  %s1733_s2 = inlined_call_operand.vmem [shape: f32[1,16], index: 2, kind: input, shape index: {}]   ;;  %s1734_s3 = inlined_call_operand.vmem [shape: f32[2,16,16,16], index: 3, kind: output, shape index: {}]  }
   0x1 LB: > { %s1242_s13 = sadd.s32 4294967295, %s1423_s12   ;;  %p1246_p0 = scmp.ge.s32.totalorder %s1423_s12, 1  ;;  %s1423_s12 = sphi %s1445_s12, %s13_s12  }
   0x2   : > { %p137_p1 = scmp.lt.s32.totalorder %s1423_s12, 3 }
   0x4   : > { %p138_p2 = pnand %p1246_p0, %p137_p1 }
   0x5   : > { %p161_p3 = scmp.lt.s32.totalorder (!%p138_p2), %s1242_s13, 1 }
   0x6   : > { %141 = sbr.rel (%p138_p2) target bundleno = 412 (0x19c), region = 32 }
   0xb   : > { %v1254_v0 = vld [vmem:[%s1732_s1 + $0x8] sm:$0xf]  ;;  %v1404_v1 = vld [vmem:[%s1732_s1 + $0x8] sm:$0x30]  ;;  %vm327_vm0 = vcmask 1045504   ;;  %s1736_s13 = smov (!%p161_p3, %s1242_s13), 1 }
   0xc   : > { %v1255_v2 = vor.u32 %v1404_v1, %v1254_v0  ;;  %v1274_v3 = vld [vmem:[%s1732_s1] sm:$0xf]  ;;  %v1403_v4 = vld [vmem:[%s1732_s1] sm:$0x30]  ;;  %v1328_v5 = vld [vmem:[%s1732_s1 + $0x10] sm:$0xf] }
   0xd   : > { %v1275_v6 = vor.u32 %v1403_v4, %v1274_v3  ;;  %v1405_v7 = vld [vmem:[%s1732_s1 + $0x10] sm:$0x30]  ;;  %v1382_v8 = vld [vmem:[%s1732_s1 + $0x18] sm:$0xf]  ;;  %v1406_v9 = vld [vmem:[%s1732_s1 + $0x18] sm:$0x30] }
   0xe   : > { %v329_v10 = vsel %vm327_vm0, %v1255_v2, 0  ;;  %v1329_v11 = vor.u32 %v1405_v7, %v1328_v5  ;;  %v1383_v12 = vor.u32 %v1406_v9, %v1382_v8  ;;  %s1407_s30 = smul.u32 408, %s1736_s13  ;;  %vm278_vm1 = vcmask 97280   ;;  %s1402_s9 = sshll.u32 %s1736_s13, 8 }
   0xf   : > { %338 = vmatpush.bf16.msra.mxu0 %v329_v10  ;;  %v474_v13 = vsel %vm327_vm0, %v1275_v6, 0  ;;  %s1577_s14 = scalar_lea.vmem %s1734_s3, %s1402_s9  ;;  %vm1154_vm3 = vcmask 130048  }
  0x10   : > { %483 = vmatpush.bf16.msra.mxu1 %v474_v13  ;;  %v671_v14 = vsel %vm327_vm0, %v1329_v11, 0  ;;  %v899_v15 = vsel %vm327_vm0, %v1383_v12, 0  ;;  %s1487_s6 = scalar_lea.vmem %s1731_s0, %s1407_s30 }
  0x11   : > { %680 = vmatpush.bf16.msra.mxu2 %v671_v14  ;;  %908 = vmatpush.bf16.msra.mxu3 %v899_v15  ;;  %v222_v16 = vld [vmem:[%s1487_s6 + $0x1] sm:$0xff]  ;;  %v223_v17 = vld [vmem:[%s1487_s6 + $0x9] sm:$0xff]  ;;  %v1292_v21 = vld [vmem:[%s1487_s6 + $0x18] sm:$0xff] }
  0x12   : > { %v172_v18 = vld [vmem:[%s1487_s6] sm:$0xff]  ;;  %v254_v19 = vpack.c.bf16 %v223_v17, %v222_v16  ;;  %v173_v20 = vld [vmem:[%s1487_s6 + $0x8] sm:$0xff]  ;;  %v1294_v28 = vld [vmem:[%s1487_s6 + $0x30] sm:$0xff] }
  0x13   : > { %v1293_v22 = vld [vmem:[%s1487_s6 + $0x20] sm:$0xff]  ;;  %v204_v23 = vpack.c.bf16 %v173_v20, %v172_v18  ;;  %v1295_v29 = vld [vmem:[%s1487_s6 + $0x38] sm:$0xff]  ;;  %v1296_v34 = vld [vmem:[%s1487_s6 + $0x48] sm:$0xff] }
  0x14   : > { %v598_v24 = vpack.c.bf16 %v1293_v22, %v1292_v21  ;;  %v1346_v25 = vld [vmem:[%s1487_s6 + $0x19] sm:$0xff]  ;;  %v1347_v26 = vld [vmem:[%s1487_s6 + $0x21] sm:$0xff]  ;;  %1256 = vmatmul.msk.bf16.vlgmr.msra.gmra.mxu0 %vm278_vm1, %v254_v19  ;;  %v1348_v30 = vld [vmem:[%s1487_s6 + $0x31] sm:$0xff]  ;;  %v599_v32 = vpack.c.bf16 %v1295_v29, %v1294_v28 }
  0x15   : > { %v826_v27 = vpack.c.bf16 %v1347_v26, %v1346_v25  ;;  %1276 = vmatmul.msk.bf16.vlgmr.msra.gmra.mxu1 %vm278_vm1, %v204_v23  ;;  %v1349_v31 = vld [vmem:[%s1487_s6 + $0x39] sm:$0xff]  ;;  %v1297_v35 = vld [vmem:[%s1487_s6 + $0x50] sm:$0xff]  ;;  %v1299_v41 = vld [vmem:[%s1487_s6 + $0x68] sm:$0xff] }
  0x16   : > { %1330 = vmatmul.msk.bf16.vlgmr.msra.gmra.mxu2 %vm278_vm1, %v598_v24  ;;  %v827_v33 = vpack.c.bf16 %v1349_v31, %v1348_v30  ;;  %v1350_v36 = vld [vmem:[%s1487_s6 + $0x49] sm:$0xff]  ;;  %v1351_v37 = vld [vmem:[%s1487_s6 + $0x51] sm:$0xff]  ;;  %v600_v38 = vpack.c.bf16 %v1297_v35, %v1296_v34  ;;  %v1298_v40 = vld [vmem:[%s1487_s6 + $0x60] sm:$0xff] }
  0x17   : > { %1384 = vmatmul.msk.bf16.vlgmr.msra.gmra.mxu3 %vm278_vm1, %v826_v27  ;;  %v828_v39 = vpack.c.bf16 %v1351_v37, %v1350_v36  ;;  %v1352_v42 = vld [vmem:[%s1487_s6 + $0x61] sm:$0xff]  ;;  %v1353_v43 = vld [vmem:[%s1487_s6 + $0x69] sm:$0xff]  ;;  %v601_v44 = vpack.c.bf16 %v1299_v41, %v1298_v40  ;;  %v1300_v46 = vld [vmem:[%s1487_s6 + $0x78] sm:$0xff] }
  0x18   : > { %v829_v45 = vpack.c.bf16 %v1353_v43, %v1352_v42  ;;  %v1301_v47 = vld [vmem:[%s1487_s6 + $0x80] sm:$0xff]  ;;  %v1302_v52 = vld [vmem:[%s1487_s6 + $0x90] sm:$0xff]  ;;  %v1303_v53 = vld [vmem:[%s1487_s6 + $0x98] sm:$0xff] }
  0x19   : > { %v1354_v48 = vld [vmem:[%s1487_s6 + $0x79] sm:$0xff]  ;;  %v1355_v49 = vld [vmem:[%s1487_s6 + $0x81] sm:$0xff]  ;;  %v602_v50 = vpack.c.bf16 %v1301_v47, %v1300_v46  ;;  %v1356_v54 = vld [vmem:[%s1487_s6 + $0x91] sm:$0xff]  ;;  %v603_v56 = vpack.c.bf16 %v1303_v53, %v1302_v52 }
  0x1a   : > { %v830_v51 = vpack.c.bf16 %v1355_v49, %v1354_v48  ;;  %v1357_v55 = vld [vmem:[%s1487_s6 + $0x99] sm:$0xff]  ;;  %v1304_v58 = vld [vmem:[%s1487_s6 + $0xa8] sm:$0xff]  ;;  %v1305_v59 = vld [vmem:[%s1487_s6 + $0xb0] sm:$0xff] }
  0x1b   : > { %v831_v57 = vpack.c.bf16 %v1357_v55, %v1356_v54  ;;  %v1358_v60 = vld [vmem:[%s1487_s6 + $0xa9] sm:$0xff]  ;;  %v1359_v61 = vld [vmem:[%s1487_s6 + $0xb1] sm:$0xff]  ;;  %v604_v62 = vpack.c.bf16 %v1305_v59, %v1304_v58  ;;  %v1306_v0 = vld [vmem:[%s1487_s6 + $0xc0] sm:$0xff] }
  0x1c   : > { %v832_v63 = vpack.c.bf16 %v1359_v61, %v1358_v60  ;;  %v1307_v1 = vld [vmem:[%s1487_s6 + $0xc8] sm:$0xff]  ;;  %v1308_v6 = vld [vmem:[%s1487_s6 + $0xd8] sm:$0xff]  ;;  %v1309_v7 = vld [vmem:[%s1487_s6 + $0xe0] sm:$0xff] }
  0x1d   : > { %v1360_v2 = vld [vmem:[%s1487_s6 + $0xc1] sm:$0xff]  ;;  %v1361_v3 = vld [vmem:[%s1487_s6 + $0xc9] sm:$0xff]  ;;  %v605_v4 = vpack.c.bf16 %v1307_v1, %v1306_v0  ;;  %v1362_v8 = vld [vmem:[%s1487_s6 + $0xd9] sm:$0xff]  ;;  %v606_v11 = vpack.c.bf16 %v1309_v7, %v1308_v6 }
  0x1e   : > { %v833_v5 = vpack.c.bf16 %v1361_v3, %v1360_v2  ;;  %v1363_v9 = vld [vmem:[%s1487_s6 + $0xe1] sm:$0xff]  ;;  %v1568_v18 = vld [vmem:[%s1733_s2] ss:$0 sm:$0xff]  ;;  %v1310_v23 = vld [vmem:[%s1487_s6 + $0xf0] sm:$0xff] }
  0x1f   : > { %v834_v13 = vpack.c.bf16 %v1363_v9, %v1362_v8  ;;  %v1365_v28 = vld [vmem:[%s1487_s6 + $0xf9] sm:$0xff]  ;;  %v1312_v49 = vld [vmem:[%s1487_s6 + $0x108] sm:$0xff]  ;;  %v1367_v54 = vld [vmem:[%s1487_s6 + $0x111] sm:$0xff] }
  0x20   : > { %v1366_v53 = vld [vmem:[%s1487_s6 + $0x109] sm:$0xff] }
  0x24   : > { %1257 = vmatmul.msk.bf16.gmra.mxu0 %vm278_vm1, %v826_v27  ;;  %v1364_v27 = vld [vmem:[%s1487_s6 + $0xf1] sm:$0xff] }
  0x25   : > { %1277 = vmatmul.msk.bf16.gmra.mxu1 %vm278_vm1, %v598_v24  ;;  %v1311_v24 = vld [vmem:[%s1487_s6 + $0xf8] sm:$0xff]  ;;  %v835_v36 = vpack.c.bf16 %v1365_v28, %v1364_v27 }
  0x26   : > { %1331 = vmatmul.msk.bf16.gmra.mxu2 %vm278_vm1, %v599_v32  ;;  %v607_v34 = vpack.c.bf16 %v1311_v24, %v1310_v23 }
  0x27   : > { %1385 = vmatmul.msk.bf16.gmra.mxu3 %vm278_vm1, %v827_v33 }
  0x34   : > { %1258 = vmatmul.msk.bf16.gmra.mxu0 %vm278_vm1, %v827_v33 }
  0x35   : > { %1278 = vmatmul.msk.bf16.gmra.mxu1 %vm278_vm1, %v599_v32 }
  0x36   : > { %1332 = vmatmul.msk.bf16.gmra.mxu2 %vm278_vm1, %v600_v38 }
  0x37   : > { %1386 = vmatmul.msk.bf16.gmra.mxu3 %vm278_vm1, %v828_v39 }
  0x44   : > { %1259 = vmatmul.msk.bf16.gmra.mxu0 %vm278_vm1, %v828_v39 }
  0x45   : > { %1279 = vmatmul.msk.bf16.gmra.mxu1 %vm278_vm1, %v600_v38 }
  0x46   : > { %1333 = vmatmul.msk.bf16.gmra.mxu2 %vm278_vm1, %v601_v44 }
  0x47   : > { %1387 = vmatmul.msk.bf16.gmra.mxu3 %vm278_vm1, %v829_v45 }
  0x54   : > { %1260 = vmatmul.msk.bf16.gmra.mxu0 %vm278_vm1, %v829_v45 }
  0x55   : > { %1280 = vmatmul.msk.bf16.gmra.mxu1 %vm278_vm1, %v601_v44 }
  0x56   : > { %1334 = vmatmul.msk.bf16.gmra.mxu2 %vm278_vm1, %v602_v50 }
  0x57   : > { %1388 = vmatmul.msk.bf16.gmra.mxu3 %vm278_vm1, %v830_v51 }
  0x64   : > { %1261 = vmatmul.msk.bf16.gmra.mxu0 %vm278_vm1, %v830_v51 }
  0x65   : > { %1281 = vmatmul.msk.bf16.gmra.mxu1 %vm278_vm1, %v602_v50  ;;  %v1313_v50 = vld [vmem:[%s1487_s6 + $0x110] sm:$0xff] }
  0x66   : > { %1335 = vmatmul.msk.bf16.gmra.mxu2 %vm278_vm1, %v603_v56  ;;  %v608_v60 = vpack.c.bf16 %v1313_v50, %v1312_v49 }
  0x67   : > { %1389 = vmatmul.msk.bf16.gmra.mxu3 %vm278_vm1, %v831_v57 }
  0x74   : > { %1262 = vmatmul.msk.bf16.gmra.mxu0 %vm278_vm1, %v831_v57 }
  0x75   : > { %1282 = vmatmul.msk.bf16.gmra.mxu1 %vm278_vm1, %v603_v56 }
  0x76   : > { %1336 = vmatmul.msk.bf16.gmra.mxu2 %vm278_vm1, %v604_v62 }
  0x77   : > { %1390 = vmatmul.msk.bf16.gmra.mxu3 %vm278_vm1, %v832_v63 }
  0x84   : > { %1263 = vmatmul.msk.bf16.gmra.mxu0 %vm278_vm1, %v832_v63 }
  0x85   : > { %1283 = vmatmul.msk.bf16.gmra.mxu1 %vm278_vm1, %v604_v62  ;;  %v836_v62 = vpack.c.bf16 %v1367_v54, %v1366_v53 }
  0x86   : > { %1337 = vmatmul.msk.bf16.gmra.mxu2 %vm278_vm1, %v605_v4 }
  0x87   : > { %1391 = vmatmul.msk.bf16.gmra.mxu3 %vm278_vm1, %v833_v5 }
  0x91   : > { %v340_v10 = vpop.f32.mrf.mxu0 }
  0x92   : > { %v485_v12 = vpop.f32.mrf.mxu1 }
  0x93   : > { %v486_v14 = vadd.f32 %v485_v12, %v340_v10  ;;  %v1315_v12 = vld [vmem:[%s1487_s6 + $0x128] sm:$0xff] }
  0x94   : > { %1264 = vmatmul.msk.bf16.gmra.mxu0 %vm278_vm1, %v833_v5 }
  0x95   : > { %1284 = vmatmul.msk.bf16.gmra.mxu1 %vm278_vm1, %v605_v4 }
  0x96   : > { %1338 = vmatmul.msk.bf16.gmra.mxu2 %vm278_vm1, %v606_v11 }
  0x97   : > { %1392 = vmatmul.msk.bf16.gmra.mxu3 %vm278_vm1, %v834_v13 }
  0x99   : > { %v682_v15 = vpop.f32.mrf.mxu2  ;;  %v342_v19 = vpop.f32.mrf.mxu0 }
  0x9a   : > { %v762_v16 = vadd.f32 %v682_v15, %v486_v14  ;;  %v910_v17 = vpop.f32.mrf.mxu3  ;;  %v487_v20 = vpop.f32.mrf.mxu1  ;;  %v1368_v15 = vld [vmem:[%s1487_s6 + $0x121] sm:$0xff] }
  0x9b   : > { %v488_v26 = vadd.f32 %v487_v20, %v342_v19 }
  0x9c   : > { %v990_v21 = vadd.f32 %v910_v17, %v762_v16  ;;  %v1369_v16 = vld [vmem:[%s1487_s6 + $0x129] sm:$0xff] }
  0x9e   : > { %v1026_v22 = vadd.f32 %v1568_v18, %v990_v21 }
  0xa0   : > { %vm1058_vm2 = vcmp.ge.f32.partialorder %v1026_v22, 0.0  ;;  %v1090_v25 = vmul.f32 0.2, %v1026_v22 }
  0xa1   : > { %v684_v29 = vpop.f32.mrf.mxu2  ;;  %v345_v33 = vpop.f32.mrf.mxu0 }
  0xa2   : > { %v1122_v30 = vsel %vm1058_vm2, %v1026_v22, %v1090_v25  ;;  %v763_v31 = vadd.f32 %v684_v29, %v488_v26  ;;  %v912_v32 = vpop.f32.mrf.mxu3  ;;  %v490_v35 = vpop.f32.mrf.mxu1  ;;  %v837_v25 = vpack.c.bf16 %v1369_v16, %v1368_v15 }
  0xa3   : > { %1155 = vst.msk [vmem:[%s1577_s14] sm:$0xff] %vm1154_vm3, %v1122_v30  ;;  %v491_v39 = vadd.f32 %v490_v35, %v345_v33 }
  0xa4   : > { %v991_v37 = vadd.f32 %v912_v32, %v763_v31  ;;  %1265 = vmatmul.msk.bf16.gmra.mxu0 %vm278_vm1, %v834_v13 }
  0xa5   : > { %1285 = vmatmul.msk.bf16.gmra.mxu1 %vm278_vm1, %v606_v11  ;;  %v1314_v11 = vld [vmem:[%s1487_s6 + $0x120] sm:$0xff] }
  0xa6   : > { %v1027_v38 = vadd.f32 %v1568_v18, %v991_v37  ;;  %1339 = vmatmul.msk.bf16.gmra.mxu2 %vm278_vm1, %v607_v34  ;;  %v609_v23 = vpack.c.bf16 %v1315_v12, %v1314_v11 }
  0xa7   : > { %1393 = vmatmul.msk.bf16.gmra.mxu3 %vm278_vm1, %v835_v36 }
  0xa8   : > { %vm1059_vm4 = vcmp.ge.f32.partialorder %v1027_v38, 0.0  ;;  %v1091_v40 = vmul.f32 0.2, %v1027_v38 }
  0xa9   : > { %v687_v41 = vpop.f32.mrf.mxu2  ;;  %v347_v45 = vpop.f32.mrf.mxu0 }
  0xaa   : > { %v1123_v42 = vsel %vm1059_vm4, %v1027_v38, %v1091_v40  ;;  %v764_v43 = vadd.f32 %v687_v41, %v491_v39  ;;  %v915_v44 = vpop.f32.mrf.mxu3  ;;  %v492_v46 = vpop.f32.mrf.mxu1  ;;  %v1316_v38 = vld [vmem:[%s1487_s6 + $0x138] sm:$0xff]  ;;  %v1317_v39 = vld [vmem:[%s1487_s6 + $0x140] sm:$0xff] }
  0xab   : > { %1156 = vst.msk [vmem:[%s1577_s14 + $0x8] sm:$0xff] %vm1154_vm3, %v1123_v42  ;;  %v493_v52 = vadd.f32 %v492_v46, %v347_v45  ;;  %v1370_v42 = vld [vmem:[%s1487_s6 + $0x139] sm:$0xff]  ;;  %v610_v49 = vpack.c.bf16 %v1317_v39, %v1316_v38 }
  0xac   : > { %v992_v47 = vadd.f32 %v915_v44, %v764_v43  ;;  %v1371_v43 = vld [vmem:[%s1487_s6 + $0x141] sm:$0xff] }
  0xae   : > { %v1028_v48 = vadd.f32 %v1568_v18, %v992_v47 }
  0xb0   : > { %vm1060_vm5 = vcmp.ge.f32.partialorder %v1028_v48, 0.0  ;;  %v1092_v51 = vmul.f32 0.2, %v1028_v48 }
  0xb1   : > { %v689_v55 = vpop.f32.mrf.mxu2  ;;  %v350_v59 = vpop.f32.mrf.mxu0 }
  0xb2   : > { %v1124_v56 = vsel %vm1060_vm5, %v1028_v48, %v1092_v51  ;;  %v765_v57 = vadd.f32 %v689_v55, %v493_v52  ;;  %v917_v58 = vpop.f32.mrf.mxu3  ;;  %v495_v61 = vpop.f32.mrf.mxu1  ;;  %v838_v51 = vpack.c.bf16 %v1371_v43, %v1370_v42 }
  0xb3   : > { %1157 = vst.msk [vmem:[%s1577_s14 + $0x10] sm:$0xff] %vm1154_vm3, %v1124_v56  ;;  %v496_v1 = vadd.f32 %v495_v61, %v350_v59 }
  0xb4   : > { %v993_v63 = vadd.f32 %v917_v58, %v765_v57  ;;  %1266 = vmatmul.msk.bf16.gmra.mxu0 %vm278_vm1, %v835_v36 }
  0xb5   : > { %1286 = vmatmul.msk.bf16.gmra.mxu1 %vm278_vm1, %v607_v34 }
  0xb6   : > { %v1029_v0 = vadd.f32 %v1568_v18, %v993_v63  ;;  %1340 = vmatmul.msk.bf16.gmra.mxu2 %vm278_vm1, %v608_v60 }
  0xb7   : > { %1394 = vmatmul.msk.bf16.gmra.mxu3 %vm278_vm1, %v836_v62 }
  0xb8   : > { %vm1061_vm6 = vcmp.ge.f32.partialorder %v1029_v0, 0.0  ;;  %v1093_v2 = vmul.f32 0.2, %v1029_v0 }
  0xb9   : > { %v692_v3 = vpop.f32.mrf.mxu2  ;;  %v352_v7 = vpop.f32.mrf.mxu0 }
  0xba   : > { %v1125_v4 = vsel %vm1061_vm6, %v1029_v0, %v1093_v2  ;;  %v766_v5 = vadd.f32 %v692_v3, %v496_v1  ;;  %v920_v6 = vpop.f32.mrf.mxu3  ;;  %v497_v8 = vpop.f32.mrf.mxu1  ;;  %v1318_v0 = vld [vmem:[%s1487_s6 + $0x150] sm:$0xff]  ;;  %v1319_v1 = vld [vmem:[%s1487_s6 + $0x158] sm:$0xff] }
  0xbb   : > { %1158 = vst.msk [vmem:[%s1577_s14 + $0x18] sm:$0xff] %vm1154_vm3, %v1125_v4  ;;  %v498_v14 = vadd.f32 %v497_v8, %v352_v7  ;;  %v1372_v4 = vld [vmem:[%s1487_s6 + $0x151] sm:$0xff]  ;;  %v611_v11 = vpack.c.bf16 %v1319_v1, %v1318_v0 }
  0xbc   : > { %v994_v9 = vadd.f32 %v920_v6, %v766_v5  ;;  %v1373_v5 = vld [vmem:[%s1487_s6 + $0x159] sm:$0xff] }
  0xbe   : > { %v1030_v10 = vadd.f32 %v1568_v18, %v994_v9 }
  0xc0   : > { %vm1062_vm7 = vcmp.ge.f32.partialorder %v1030_v10, 0.0  ;;  %v1094_v13 = vmul.f32 0.2, %v1030_v10 }
  0xc1   : > { %v694_v17 = vpop.f32.mrf.mxu2  ;;  %v355_v22 = vpop.f32.mrf.mxu0 }
  0xc2   : > { %v1126_v19 = vsel %vm1062_vm7, %v1030_v10, %v1094_v13  ;;  %v767_v20 = vadd.f32 %v694_v17, %v498_v14  ;;  %v922_v21 = vpop.f32.mrf.mxu3  ;;  %v500_v24 = vpop.f32.mrf.mxu1  ;;  %v839_v13 = vpack.c.bf16 %v1373_v5, %v1372_v4 }
  0xc3   : > { %1159 = vst.msk [vmem:[%s1577_s14 + $0x20] sm:$0xff] %vm1154_vm3, %v1126_v19  ;;  %v501_v28 = vadd.f32 %v500_v24, %v355_v22 }
  0xc4   : > { %v995_v26 = vadd.f32 %v922_v21, %v767_v20  ;;  %1267 = vmatmul.msk.bf16.gmra.mxu0 %vm278_vm1, %v836_v62 }
  0xc5   : > { %1287 = vmatmul.msk.bf16.gmra.mxu1 %vm278_vm1, %v608_v60 }
  0xc6   : > { %v1031_v27 = vadd.f32 %v1568_v18, %v995_v26  ;;  %1341 = vmatmul.msk.bf16.gmra.mxu2 %vm278_vm1, %v609_v23 }
  0xc7   : > { %1395 = vmatmul.msk.bf16.gmra.mxu3 %vm278_vm1, %v837_v25 }
  0xc8   : > { %vm1063_vm8 = vcmp.ge.f32.partialorder %v1031_v27, 0.0  ;;  %v1095_v29 = vmul.f32 0.2, %v1031_v27 }
  0xc9   : > { %v697_v30 = vpop.f32.mrf.mxu2  ;;  %v357_v34 = vpop.f32.mrf.mxu0 }
  0xca   : > { %v1127_v31 = vsel %vm1063_vm8, %v1031_v27, %v1095_v29  ;;  %v768_v32 = vadd.f32 %v697_v30, %v501_v28  ;;  %v925_v33 = vpop.f32.mrf.mxu3  ;;  %v502_v35 = vpop.f32.mrf.mxu1  ;;  %v1320_v27 = vld [vmem:[%s1487_s6 + $0x168] sm:$0xff]  ;;  %v1321_v28 = vld [vmem:[%s1487_s6 + $0x170] sm:$0xff] }
  0xcb   : > { %1160 = vst.msk [vmem:[%s1577_s14 + $0x28] sm:$0xff] %vm1154_vm3, %v1127_v31  ;;  %v503_v41 = vadd.f32 %v502_v35, %v357_v34  ;;  %v1374_v31 = vld [vmem:[%s1487_s6 + $0x169] sm:$0xff]  ;;  %v612_v38 = vpack.c.bf16 %v1321_v28, %v1320_v27 }
  0xcc   : > { %v996_v36 = vadd.f32 %v925_v33, %v768_v32  ;;  %v1375_v32 = vld [vmem:[%s1487_s6 + $0x171] sm:$0xff] }
  0xce   : > { %v1032_v37 = vadd.f32 %v1568_v18, %v996_v36 }
  0xd0   : > { %vm1064_vm9 = vcmp.ge.f32.partialorder %v1032_v37, 0.0  ;;  %v1096_v40 = vmul.f32 0.2, %v1032_v37 }
  0xd1   : > { %v699_v44 = vpop.f32.mrf.mxu2  ;;  %v360_v48 = vpop.f32.mrf.mxu0 }
  0xd2   : > { %v1128_v45 = vsel %vm1064_vm9, %v1032_v37, %v1096_v40  ;;  %v769_v46 = vadd.f32 %v699_v44, %v503_v41  ;;  %v927_v47 = vpop.f32.mrf.mxu3  ;;  %v505_v50 = vpop.f32.mrf.mxu1  ;;  %v840_v40 = vpack.c.bf16 %v1375_v32, %v1374_v31 }
  0xd3   : > { %1161 = vst.msk [vmem:[%s1577_s14 + $0x30] sm:$0xff] %vm1154_vm3, %v1128_v45  ;;  %v506_v54 = vadd.f32 %v505_v50, %v360_v48 }
  0xd4   : > { %v997_v52 = vadd.f32 %v927_v47, %v769_v46  ;;  %1268 = vmatmul.msk.bf16.gmra.mxu0 %vm278_vm1, %v837_v25 }
  0xd5   : > { %1288 = vmatmul.msk.bf16.gmra.mxu1 %vm278_vm1, %v609_v23 }
  0xd6   : > { %v1033_v53 = vadd.f32 %v1568_v18, %v997_v52  ;;  %1342 = vmatmul.msk.bf16.gmra.mxu2 %vm278_vm1, %v610_v49 }
  0xd7   : > { %1396 = vmatmul.msk.bf16.gmra.mxu3 %vm278_vm1, %v838_v51 }
  0xd8   : > { %vm1065_vm10 = vcmp.ge.f32.partialorder %v1033_v53, 0.0  ;;  %v1097_v55 = vmul.f32 0.2, %v1033_v53 }
  0xd9   : > { %v702_v56 = vpop.f32.mrf.mxu2  ;;  %v362_v60 = vpop.f32.mrf.mxu0 }
  0xda   : > { %v1129_v57 = vsel %vm1065_vm10, %v1033_v53, %v1097_v55  ;;  %v770_v58 = vadd.f32 %v702_v56, %v506_v54  ;;  %v930_v59 = vpop.f32.mrf.mxu3  ;;  %v507_v61 = vpop.f32.mrf.mxu1  ;;  %v1322_v53 = vld [vmem:[%s1487_s6 + $0x180] sm:$0xff]  ;;  %v1323_v54 = vld [vmem:[%s1487_s6 + $0x188] sm:$0xff] }
  0xdb   : > { %1162 = vst.msk [vmem:[%s1577_s14 + $0x38] sm:$0xff] %vm1154_vm3, %v1129_v57  ;;  %v508_v3 = vadd.f32 %v507_v61, %v362_v60  ;;  %v1376_v57 = vld [vmem:[%s1487_s6 + $0x181] sm:$0xff]  ;;  %v613_v0 = vpack.c.bf16 %v1323_v54, %v1322_v53 }
  0xdc   : > { %v998_v62 = vadd.f32 %v930_v59, %v770_v58  ;;  %v1377_v58 = vld [vmem:[%s1487_s6 + $0x189] sm:$0xff] }
  0xde   : > { %v1034_v63 = vadd.f32 %v1568_v18, %v998_v62 }
  0xe0   : > { %vm1066_vm11 = vcmp.ge.f32.partialorder %v1034_v63, 0.0  ;;  %v1098_v2 = vmul.f32 0.2, %v1034_v63 }
  0xe1   : > { %v704_v6 = vpop.f32.mrf.mxu2  ;;  %v365_v10 = vpop.f32.mrf.mxu0 }
  0xe2   : > { %v1130_v7 = vsel %vm1066_vm11, %v1034_v63, %v1098_v2  ;;  %v771_v8 = vadd.f32 %v704_v6, %v508_v3  ;;  %v932_v9 = vpop.f32.mrf.mxu3  ;;  %v510_v12 = vpop.f32.mrf.mxu1  ;;  %v841_v2 = vpack.c.bf16 %v1377_v58, %v1376_v57 }
  0xe3   : > { %1163 = vst.msk [vmem:[%s1577_s14 + $0x40] sm:$0xff] %vm1154_vm3, %v1130_v7  ;;  %v511_v16 = vadd.f32 %v510_v12, %v365_v10 }
  0xe4   : > { %v999_v14 = vadd.f32 %v932_v9, %v771_v8  ;;  %1269 = vmatmul.msk.bf16.gmra.mxu0 %vm278_vm1, %v838_v51 }
  0xe5   : > { %1289 = vmatmul.msk.bf16.gmra.mxu1 %vm278_vm1, %v610_v49 }
  0xe6   : > { %v1035_v15 = vadd.f32 %v1568_v18, %v999_v14  ;;  %1343 = vmatmul.msk.bf16.gmra.mxu2 %vm278_vm1, %v611_v11 }
  0xe7   : > { %1397 = vmatmul.msk.bf16.gmra.mxu3 %vm278_vm1, %v839_v13 }
  0xe8   : > { %vm1067_vm12 = vcmp.ge.f32.partialorder %v1035_v15, 0.0  ;;  %v1099_v17 = vmul.f32 0.2, %v1035_v15 }
  0xe9   : > { %v707_v19 = vpop.f32.mrf.mxu2  ;;  %v367_v23 = vpop.f32.mrf.mxu0 }
  0xea   : > { %v1131_v20 = vsel %vm1067_vm12, %v1035_v15, %v1099_v17  ;;  %v772_v21 = vadd.f32 %v707_v19, %v511_v16  ;;  %v935_v22 = vpop.f32.mrf.mxu3  ;;  %v512_v24 = vpop.f32.mrf.mxu1 }
  0xeb   : > { %1164 = vst.msk [vmem:[%s1577_s14 + $0x48] sm:$0xff] %vm1154_vm3, %v1131_v20  ;;  %v513_v30 = vadd.f32 %v512_v24, %v367_v23 }
  0xec   : > { %v1000_v25 = vadd.f32 %v935_v22, %v772_v21 }
  0xee   : > { %v1036_v26 = vadd.f32 %v1568_v18, %v1000_v25 }
  0xf0   : > { %vm1068_vm13 = vcmp.ge.f32.partialorder %v1036_v26, 0.0  ;;  %v1100_v29 = vmul.f32 0.2, %v1036_v26 }
  0xf1   : > { %v709_v33 = vpop.f32.mrf.mxu2  ;;  %v370_v37 = vpop.f32.mrf.mxu0 }
  0xf2   : > { %v1132_v34 = vsel %vm1068_vm13, %v1036_v26, %v1100_v29  ;;  %v773_v35 = vadd.f32 %v709_v33, %v513_v30  ;;  %v937_v36 = vpop.f32.mrf.mxu3  ;;  %v515_v39 = vpop.f32.mrf.mxu1 }
  0xf3   : > { %1165 = vst.msk [vmem:[%s1577_s14 + $0x50] sm:$0xff] %vm1154_vm3, %v1132_v34  ;;  %v516_v43 = vadd.f32 %v515_v39, %v370_v37 }
  0xf4   : > { %v1001_v41 = vadd.f32 %v937_v36, %v773_v35  ;;  %1270 = vmatmul.msk.bf16.gmra.mxu0 %vm278_vm1, %v839_v13 }
  0xf5   : > { %1290 = vmatmul.msk.bf16.gmra.mxu1 %vm278_vm1, %v611_v11 }
  0xf6   : > { %v1037_v42 = vadd.f32 %v1568_v18, %v1001_v41  ;;  %1344 = vmatmul.msk.bf16.gmra.mxu2 %vm278_vm1, %v612_v38 }
  0xf7   : > { %1398 = vmatmul.msk.bf16.gmra.mxu3 %vm278_vm1, %v840_v40 }
  0xf8   : > { %vm1069_vm14 = vcmp.ge.f32.partialorder %v1037_v42, 0.0  ;;  %v1101_v44 = vmul.f32 0.2, %v1037_v42 }
  0xf9   : > { %v712_v45 = vpop.f32.mrf.mxu2  ;;  %v372_v49 = vpop.f32.mrf.mxu0 }
  0xfa   : > { %v1133_v46 = vsel %vm1069_vm14, %v1037_v42, %v1101_v44  ;;  %v774_v47 = vadd.f32 %v712_v45, %v516_v43  ;;  %v940_v48 = vpop.f32.mrf.mxu3  ;;  %v517_v50 = vpop.f32.mrf.mxu1 }
  0xfb   : > { %1166 = vst.msk [vmem:[%s1577_s14 + $0x58] sm:$0xff] %vm1154_vm3, %v1133_v46  ;;  %v518_v56 = vadd.f32 %v517_v50, %v372_v49 }
  0xfc   : > { %v1002_v51 = vadd.f32 %v940_v48, %v774_v47 }
  0xfe   : > { %v1038_v52 = vadd.f32 %v1568_v18, %v1002_v51 }
 0x100   : > { %vm1070_vm15 = vcmp.ge.f32.partialorder %v1038_v52, 0.0  ;;  %v1102_v55 = vmul.f32 0.2, %v1038_v52 }
 0x101   : > { %v714_v59 = vpop.f32.mrf.mxu2  ;;  %v375_v63 = vpop.f32.mrf.mxu0 }
 0x102   : > { %v1134_v60 = vsel %vm1070_vm15, %v1038_v52, %v1102_v55  ;;  %v775_v61 = vadd.f32 %v714_v59, %v518_v56  ;;  %v942_v62 = vpop.f32.mrf.mxu3  ;;  %v520_v1 = vpop.f32.mrf.mxu1 }
 0x103   : > { %1167 = vst.msk [vmem:[%s1577_s14 + $0x60] sm:$0xff] %vm1154_vm3, %v1134_v60  ;;  %v521_v5 = vadd.f32 %v520_v1, %v375_v63 }
 0x104   : > { %v1003_v3 = vadd.f32 %v942_v62, %v775_v61  ;;  %1271 = vmatmul.msk.bf16.gmra.mxu0 %vm278_vm1, %v840_v40 }
 0x105   : > { %1291 = vmatmul.msk.bf16.gmra.mxu1 %vm278_vm1, %v612_v38 }
 0x106   : > { %v1039_v4 = vadd.f32 %v1568_v18, %v1003_v3  ;;  %1345 = vmatmul.msk.bf16.gmra.mxu2 %vm278_vm1, %v613_v0 }
 0x107   : > { %1399 = vmatmul.msk.bf16.gmra.mxu3 %vm278_vm1, %v841_v2 }
 0x108   : > { %vm1071_vm0 = vcmp.ge.f32.partialorder %v1039_v4, 0.0  ;;  %v1103_v6 = vmul.f32 0.2, %v1039_v4 }
 0x109   : > { %v717_v7 = vpop.f32.mrf.mxu2  ;;  %v377_v11 = vpop.f32.mrf.mxu0 }
 0x10a   : > { %v1135_v8 = vsel %vm1071_vm0, %v1039_v4, %v1103_v6  ;;  %v776_v9 = vadd.f32 %v717_v7, %v521_v5  ;;  %v945_v10 = vpop.f32.mrf.mxu3  ;;  %v522_v12 = vpop.f32.mrf.mxu1 }
 0x10b   : > { %1168 = vst.msk [vmem:[%s1577_s14 + $0x68] sm:$0xff] %vm1154_vm3, %v1135_v8  ;;  %v523_v16 = vadd.f32 %v522_v12, %v377_v11 }
 0x10c   : > { %v1004_v13 = vadd.f32 %v945_v10, %v776_v9 }
 0x10e   : > { %v1040_v14 = vadd.f32 %v1568_v18, %v1004_v13 }
 0x110   : > { %vm1072_vm2 = vcmp.ge.f32.partialorder %v1040_v14, 0.0  ;;  %v1104_v15 = vmul.f32 0.2, %v1040_v14 }
 0x111   : > { %v719_v17 = vpop.f32.mrf.mxu2  ;;  %v380_v22 = vpop.f32.mrf.mxu0 }
 0x112   : > { %v1136_v19 = vsel %vm1072_vm2, %v1040_v14, %v1104_v15  ;;  %v777_v20 = vadd.f32 %v719_v17, %v523_v16  ;;  %v947_v21 = vpop.f32.mrf.mxu3  ;;  %v525_v23 = vpop.f32.mrf.mxu1 }
 0x113   : > { %1169 = vst.msk [vmem:[%s1577_s14 + $0x70] sm:$0xff] %vm1154_vm3, %v1136_v19  ;;  %v526_v26 = vadd.f32 %v525_v23, %v380_v22 }
 0x114   : > { %v1005_v24 = vadd.f32 %v947_v21, %v777_v20 }
 0x116   : > { %v1041_v25 = vadd.f32 %v1568_v18, %v1005_v24 }
 0x118   : > { %vm1073_vm1 = vcmp.ge.f32.partialorder %v1041_v25, 0.0  ;;  %v1105_v27 = vmul.f32 0.2, %v1041_v25 }
 0x119   : > { %v722_v28 = vpop.f32.mrf.mxu2  ;;  %v382_v32 = vpop.f32.mrf.mxu0 }
 0x11a   : > { %v1137_v29 = vsel %vm1073_vm1, %v1041_v25, %v1105_v27  ;;  %v778_v30 = vadd.f32 %v722_v28, %v526_v26  ;;  %v950_v31 = vpop.f32.mrf.mxu3  ;;  %v527_v33 = vpop.f32.mrf.mxu1 }
 0x11b   : > { %1170 = vst.msk [vmem:[%s1577_s14 + $0x78] sm:$0xff] %vm1154_vm3, %v1137_v29  ;;  %v528_v37 = vadd.f32 %v527_v33, %v382_v32 }
 0x11c   : > { %v1006_v34 = vadd.f32 %v950_v31, %v778_v30 }
 0x11e   : > { %v1042_v35 = vadd.f32 %v1568_v18, %v1006_v34 }
 0x120   : > { %vm1074_vm4 = vcmp.ge.f32.partialorder %v1042_v35, 0.0  ;;  %v1106_v36 = vmul.f32 0.2, %v1042_v35 }
 0x121   : > { %v724_v38 = vpop.f32.mrf.mxu2  ;;  %v385_v42 = vpop.f32.mrf.mxu0 }
 0x122   : > { %v1138_v39 = vsel %vm1074_vm4, %v1042_v35, %v1106_v36  ;;  %v779_v40 = vadd.f32 %v724_v38, %v528_v37  ;;  %v952_v41 = vpop.f32.mrf.mxu3  ;;  %v530_v43 = vpop.f32.mrf.mxu1 }
 0x123   : > { %1171 = vst.msk [vmem:[%s1577_s14 + $0x80] sm:$0xff] %vm1154_vm3, %v1138_v39  ;;  %v531_v46 = vadd.f32 %v530_v43, %v385_v42 }
 0x124   : > { %v1007_v44 = vadd.f32 %v952_v41, %v779_v40 }
 0x126   : > { %v1043_v45 = vadd.f32 %v1568_v18, %v1007_v44 }
 0x128   : > { %vm1075_vm5 = vcmp.ge.f32.partialorder %v1043_v45, 0.0  ;;  %v1107_v47 = vmul.f32 0.2, %v1043_v45 }
 0x129   : > { %v727_v48 = vpop.f32.mrf.mxu2  ;;  %v387_v52 = vpop.f32.mrf.mxu0 }
 0x12a   : > { %v1139_v49 = vsel %vm1075_vm5, %v1043_v45, %v1107_v47  ;;  %v780_v50 = vadd.f32 %v727_v48, %v531_v46  ;;  %v955_v51 = vpop.f32.mrf.mxu3  ;;  %v532_v53 = vpop.f32.mrf.mxu1 }
 0x12b   : > { %1172 = vst.msk [vmem:[%s1577_s14 + $0x88] sm:$0xff] %vm1154_vm3, %v1139_v49  ;;  %v533_v57 = vadd.f32 %v532_v53, %v387_v52 }
 0x12c   : > { %v1008_v54 = vadd.f32 %v955_v51, %v780_v50 }
 0x12e   : > { %v1044_v55 = vadd.f32 %v1568_v18, %v1008_v54 }
 0x130   : > { %vm1076_vm6 = vcmp.ge.f32.partialorder %v1044_v55, 0.0  ;;  %v1108_v56 = vmul.f32 0.2, %v1044_v55 }
 0x131   : > { %v729_v58 = vpop.f32.mrf.mxu2  ;;  %v390_v62 = vpop.f32.mrf.mxu0 }
 0x132   : > { %v1140_v59 = vsel %vm1076_vm6, %v1044_v55, %v1108_v56  ;;  %v781_v60 = vadd.f32 %v729_v58, %v533_v57  ;;  %v957_v61 = vpop.f32.mrf.mxu3  ;;  %v535_v63 = vpop.f32.mrf.mxu1 }
 0x133   : > { %1173 = vst.msk [vmem:[%s1577_s14 + $0x90] sm:$0xff] %vm1154_vm3, %v1140_v59  ;;  %v536_v2 = vadd.f32 %v535_v63, %v390_v62 }
 0x134   : > { %v1009_v0 = vadd.f32 %v957_v61, %v781_v60 }
 0x136   : > { %v1045_v1 = vadd.f32 %v1568_v18, %v1009_v0 }
 0x138   : > { %vm1077_vm7 = vcmp.ge.f32.partialorder %v1045_v1, 0.0  ;;  %v1109_v3 = vmul.f32 0.2, %v1045_v1 }
 0x139   : > { %v732_v4 = vpop.f32.mrf.mxu2  ;;  %v392_v8 = vpop.f32.mrf.mxu0 }
 0x13a   : > { %v1141_v5 = vsel %vm1077_vm7, %v1045_v1, %v1109_v3  ;;  %v782_v6 = vadd.f32 %v732_v4, %v536_v2  ;;  %v960_v7 = vpop.f32.mrf.mxu3  ;;  %v537_v9 = vpop.f32.mrf.mxu1 }
 0x13b   : > { %1174 = vst.msk [vmem:[%s1577_s14 + $0x98] sm:$0xff] %vm1154_vm3, %v1141_v5  ;;  %v538_v13 = vadd.f32 %v537_v9, %v392_v8 }
 0x13c   : > { %v1010_v10 = vadd.f32 %v960_v7, %v782_v6 }
 0x13e   : > { %v1046_v11 = vadd.f32 %v1568_v18, %v1010_v10 }
 0x140   : > { %vm1078_vm8 = vcmp.ge.f32.partialorder %v1046_v11, 0.0  ;;  %v1110_v12 = vmul.f32 0.2, %v1046_v11 }
 0x141   : > { %v734_v14 = vpop.f32.mrf.mxu2  ;;  %v395_v19 = vpop.f32.mrf.mxu0 }
 0x142   : > { %v1142_v15 = vsel %vm1078_vm8, %v1046_v11, %v1110_v12  ;;  %v783_v16 = vadd.f32 %v734_v14, %v538_v13  ;;  %v962_v17 = vpop.f32.mrf.mxu3  ;;  %v540_v20 = vpop.f32.mrf.mxu1 }
 0x143   : > { %1175 = vst.msk [vmem:[%s1577_s14 + $0xa0] sm:$0xff] %vm1154_vm3, %v1142_v15  ;;  %v541_v23 = vadd.f32 %v540_v20, %v395_v19 }
 0x144   : > { %v1011_v21 = vadd.f32 %v962_v17, %v783_v16 }
 0x146   : > { %v1047_v22 = vadd.f32 %v1568_v18, %v1011_v21 }
 0x148   : > { %vm1079_vm9 = vcmp.ge.f32.partialorder %v1047_v22, 0.0  ;;  %v1111_v24 = vmul.f32 0.2, %v1047_v22 }
 0x149   : > { %v737_v25 = vpop.f32.mrf.mxu2  ;;  %v397_v29 = vpop.f32.mrf.mxu0 }
 0x14a   : > { %v1143_v26 = vsel %vm1079_vm9, %v1047_v22, %v1111_v24  ;;  %v784_v27 = vadd.f32 %v737_v25, %v541_v23  ;;  %v965_v28 = vpop.f32.mrf.mxu3  ;;  %v542_v30 = vpop.f32.mrf.mxu1 }
 0x14b   : > { %1176 = vst.msk [vmem:[%s1577_s14 + $0xa8] sm:$0xff] %vm1154_vm3, %v1143_v26  ;;  %v543_v34 = vadd.f32 %v542_v30, %v397_v29 }
 0x14c   : > { %v1012_v31 = vadd.f32 %v965_v28, %v784_v27 }
 0x14e   : > { %v1048_v32 = vadd.f32 %v1568_v18, %v1012_v31 }
 0x150   : > { %vm1080_vm10 = vcmp.ge.f32.partialorder %v1048_v32, 0.0  ;;  %v1112_v33 = vmul.f32 0.2, %v1048_v32 }
 0x151   : > { %v739_v35 = vpop.f32.mrf.mxu2  ;;  %v400_v39 = vpop.f32.mrf.mxu0 }
 0x152   : > { %v1144_v36 = vsel %vm1080_vm10, %v1048_v32, %v1112_v33  ;;  %v785_v37 = vadd.f32 %v739_v35, %v543_v34  ;;  %v967_v38 = vpop.f32.mrf.mxu3  ;;  %v545_v40 = vpop.f32.mrf.mxu1 }
 0x153   : > { %1177 = vst.msk [vmem:[%s1577_s14 + $0xb0] sm:$0xff] %vm1154_vm3, %v1144_v36  ;;  %v546_v43 = vadd.f32 %v545_v40, %v400_v39 }
 0x154   : > { %v1013_v41 = vadd.f32 %v967_v38, %v785_v37 }
 0x156   : > { %v1049_v42 = vadd.f32 %v1568_v18, %v1013_v41 }
 0x158   : > { %vm1081_vm11 = vcmp.ge.f32.partialorder %v1049_v42, 0.0  ;;  %v1113_v44 = vmul.f32 0.2, %v1049_v42 }
 0x159   : > { %v742_v45 = vpop.f32.mrf.mxu2  ;;  %v402_v49 = vpop.f32.mrf.mxu0 }
 0x15a   : > { %v1145_v46 = vsel %vm1081_vm11, %v1049_v42, %v1113_v44  ;;  %v786_v47 = vadd.f32 %v742_v45, %v546_v43  ;;  %v970_v48 = vpop.f32.mrf.mxu3  ;;  %v547_v50 = vpop.f32.mrf.mxu1 }
 0x15b   : > { %1178 = vst.msk [vmem:[%s1577_s14 + $0xb8] sm:$0xff] %vm1154_vm3, %v1145_v46  ;;  %v548_v54 = vadd.f32 %v547_v50, %v402_v49 }
 0x15c   : > { %v1014_v51 = vadd.f32 %v970_v48, %v786_v47 }
 0x15e   : > { %v1050_v52 = vadd.f32 %v1568_v18, %v1014_v51 }
 0x160   : > { %vm1082_vm12 = vcmp.ge.f32.partialorder %v1050_v52, 0.0  ;;  %v1114_v53 = vmul.f32 0.2, %v1050_v52 }
 0x161   : > { %v744_v55 = vpop.f32.mrf.mxu2  ;;  %v405_v59 = vpop.f32.mrf.mxu0 }
 0x162   : > { %v1146_v56 = vsel %vm1082_vm12, %v1050_v52, %v1114_v53  ;;  %v787_v57 = vadd.f32 %v744_v55, %v548_v54  ;;  %v972_v58 = vpop.f32.mrf.mxu3  ;;  %v550_v60 = vpop.f32.mrf.mxu1 }
 0x163   : > { %1179 = vst.msk [vmem:[%s1577_s14 + $0xc0] sm:$0xff] %vm1154_vm3, %v1146_v56  ;;  %v551_v63 = vadd.f32 %v550_v60, %v405_v59 }
 0x164   : > { %v1015_v61 = vadd.f32 %v972_v58, %v787_v57 }
 0x166   : > { %v1051_v62 = vadd.f32 %v1568_v18, %v1015_v61 }
 0x168   : > { %vm1083_vm13 = vcmp.ge.f32.partialorder %v1051_v62, 0.0  ;;  %v1115_v0 = vmul.f32 0.2, %v1051_v62 }
 0x169   : > { %v747_v1 = vpop.f32.mrf.mxu2  ;;  %v407_v5 = vpop.f32.mrf.mxu0 }
 0x16a   : > { %v1147_v2 = vsel %vm1083_vm13, %v1051_v62, %v1115_v0  ;;  %v788_v3 = vadd.f32 %v747_v1, %v551_v63  ;;  %v975_v4 = vpop.f32.mrf.mxu3  ;;  %v552_v6 = vpop.f32.mrf.mxu1 }
 0x16b   : > { %1180 = vst.msk [vmem:[%s1577_s14 + $0xc8] sm:$0xff] %vm1154_vm3, %v1147_v2  ;;  %v553_v10 = vadd.f32 %v552_v6, %v407_v5 }
 0x16c   : > { %v1016_v7 = vadd.f32 %v975_v4, %v788_v3 }
 0x16e   : > { %v1052_v8 = vadd.f32 %v1568_v18, %v1016_v7 }
 0x170   : > { %vm1084_vm14 = vcmp.ge.f32.partialorder %v1052_v8, 0.0  ;;  %v1116_v9 = vmul.f32 0.2, %v1052_v8 }
 0x171   : > { %v749_v11 = vpop.f32.mrf.mxu2  ;;  %v410_v15 = vpop.f32.mrf.mxu0 }
 0x172   : > { %v1148_v12 = vsel %vm1084_vm14, %v1052_v8, %v1116_v9  ;;  %v789_v13 = vadd.f32 %v749_v11, %v553_v10  ;;  %v977_v14 = vpop.f32.mrf.mxu3  ;;  %v555_v16 = vpop.f32.mrf.mxu1 }
 0x173   : > { %1181 = vst.msk [vmem:[%s1577_s14 + $0xd0] sm:$0xff] %vm1154_vm3, %v1148_v12  ;;  %v556_v20 = vadd.f32 %v555_v16, %v410_v15 }
 0x174   : > { %v1017_v17 = vadd.f32 %v977_v14, %v789_v13 }
 0x176   : > { %v1053_v19 = vadd.f32 %v1568_v18, %v1017_v17 }
 0x178   : > { %vm1085_vm15 = vcmp.ge.f32.partialorder %v1053_v19, 0.0  ;;  %v1117_v21 = vmul.f32 0.2, %v1053_v19 }
 0x179   : > { %v752_v22 = vpop.f32.mrf.mxu2  ;;  %v412_v26 = vpop.f32.mrf.mxu0 }
 0x17a   : > { %v1149_v23 = vsel %vm1085_vm15, %v1053_v19, %v1117_v21  ;;  %v790_v24 = vadd.f32 %v752_v22, %v556_v20  ;;  %v980_v25 = vpop.f32.mrf.mxu3  ;;  %v557_v27 = vpop.f32.mrf.mxu1 }
 0x17b   : > { %1182 = vst.msk [vmem:[%s1577_s14 + $0xd8] sm:$0xff] %vm1154_vm3, %v1149_v23  ;;  %v558_v31 = vadd.f32 %v557_v27, %v412_v26 }
 0x17c   : > { %v1018_v28 = vadd.f32 %v980_v25, %v790_v24 }
 0x17e   : > { %v1054_v29 = vadd.f32 %v1568_v18, %v1018_v28 }
 0x180   : > { %vm1086_vm0 = vcmp.ge.f32.partialorder %v1054_v29, 0.0  ;;  %v1118_v30 = vmul.f32 0.2, %v1054_v29 }
 0x181   : > { %v754_v32 = vpop.f32.mrf.mxu2  ;;  %v415_v36 = vpop.f32.mrf.mxu0 }
 0x182   : > { %v1150_v33 = vsel %vm1086_vm0, %v1054_v29, %v1118_v30  ;;  %v791_v34 = vadd.f32 %v754_v32, %v558_v31  ;;  %v982_v35 = vpop.f32.mrf.mxu3  ;;  %v560_v37 = vpop.f32.mrf.mxu1 }
 0x183   : > { %1183 = vst.msk [vmem:[%s1577_s14 + $0xe0] sm:$0xff] %vm1154_vm3, %v1150_v33  ;;  %v561_v40 = vadd.f32 %v560_v37, %v415_v36 }
 0x184   : > { %v1019_v38 = vadd.f32 %v982_v35, %v791_v34 }
 0x186   : > { %v1055_v39 = vadd.f32 %v1568_v18, %v1019_v38 }
 0x188   : > { %vm1087_vm2 = vcmp.ge.f32.partialorder %v1055_v39, 0.0  ;;  %v1119_v41 = vmul.f32 0.2, %v1055_v39 }
 0x189   : > { %v757_v42 = vpop.f32.mrf.mxu2  ;;  %v417_v47 = vpop.f32.mrf.mxu0 }
 0x18a   : > { %v1151_v43 = vsel %vm1087_vm2, %v1055_v39, %v1119_v41  ;;  %v792_v44 = vadd.f32 %v757_v42, %v561_v40  ;;  %v985_v45 = vpop.f32.mrf.mxu3  ;;  %v562_v48 = vpop.f32.mrf.mxu1 }
 0x18b   : > { %1184 = vst.msk [vmem:[%s1577_s14 + $0xe8] sm:$0xff] %vm1154_vm3, %v1151_v43  ;;  %v563_v51 = vadd.f32 %v562_v48, %v417_v47 }
 0x18c   : > { %v1020_v46 = vadd.f32 %v985_v45, %v792_v44 }
 0x18e   : > { %v1056_v49 = vadd.f32 %v1568_v18, %v1020_v46 }
 0x190   : > { %vm1088_vm1 = vcmp.ge.f32.partialorder %v1056_v49, 0.0  ;;  %v1120_v50 = vmul.f32 0.2, %v1056_v49 }
 0x191   : > { %v759_v52 = vpop.f32.mrf.mxu2 }
 0x192   : > { %v1152_v53 = vsel %vm1088_vm1, %v1056_v49, %v1120_v50  ;;  %v793_v54 = vadd.f32 %v759_v52, %v563_v51  ;;  %v987_v55 = vpop.f32.mrf.mxu3 }
 0x193   : > { %1185 = vst.msk [vmem:[%s1577_s14 + $0xf0] sm:$0xff] %vm1154_vm3, %v1152_v53 }
 0x194   : > { %v1021_v56 = vadd.f32 %v987_v55, %v793_v54 }
 0x196   : > { %v1057_v57 = vadd.f32 %v1568_v18, %v1021_v56 }
 0x198   : > { %vm1089_vm4 = vcmp.ge.f32.partialorder %v1057_v57, 0.0  ;;  %v1121_v58 = vmul.f32 0.2, %v1057_v57 }
 0x19a   : > { %v1153_v59 = vsel %vm1089_vm4, %v1057_v57, %v1121_v58 }
 0x19b   : > { %1186 = vst.msk [vmem:[%s1577_s14 + $0xf8] sm:$0xff] %vm1154_vm3, %v1153_v59 }
 0x19c PF: > { %s13_s12 = sadd.s32 1, %s1423_s12  }
 0x19d   : > { %p10_p4 = scmp.ge.s32.totalorder %s13_s12, 4  }
 0x19f   :  { %12 = sbr.rel (!%p10_p4) target bundleno = 1 (0x1), region = 66 }

// kernel: patchgan_forward.6
= control target key start
LH: loop header
LB: loop body
LE: loop exit
PB: predicated region body
PF: predicated region fallthrough
CT: control target
= control target key end

     0   :  { %s1071_s21 = smov 0   ;;  %s1255_s0 = inlined_call_operand.vmem [shape: f32[2,9,9,64], index: 0, kind: input, shape index: {}]   ;;  %s1256_s1 = inlined_call_operand.vmem [shape: bf16[4,64,32], index: 1, kind: input, shape index: {}]   ;;  %s1257_s2 = inlined_call_operand.vmem [shape: f32[1,32], index: 2, kind: input, shape index: {}]   ;;  %s1258_s3 = inlined_call_operand.vmem [shape: f32[64,1], index: 3, kind: input, shape index: {}]   ;;  %s1259_s4 = inlined_call_operand.vmem [shape: f32[2,8,8,32], index: 4, kind: output, shape index: {0}]   ;;  %s1260_s5 = inlined_call_operand.vmem [shape: f32[2,1,32], index: 5, kind: output, shape index: {1}]   ;;  %s1261_s6 = inlined_call_operand.vmem [shape: f32[2,1,32], index: 6, kind: output, shape index: {2}]  }
   0x1 LB: > { %s866_s22 = sadd.s32 4294967295, %s1033_s21   ;;  %p870_p0 = scmp.ge.s32.totalorder %s1033_s21, 1  ;;  %s1033_s21 = sphi %s1071_s21, %s17_s21  }
   0x2   : > { %p217_p1 = scmp.lt.s32.totalorder %s1033_s21, 3 }
   0x4   : > { %p218_p2 = pnand %p870_p0, %p217_p1 }
   0x5   : > { %p253_p3 = scmp.lt.s32.totalorder (!%p218_p2), %s866_s22, 1 }
   0x6   : > { %221 = sbr.rel (%p218_p2) target bundleno = 243 (0xf3), region = 36 }
   0xb   : > { %v1004_v0 = vld [vmem:[%s1256_s1 + $0x38] sm:$0xff]  ;;  %v1003_v4 = vld [vmem:[%s1256_s1 + $0x30] sm:$0xff]  ;;  %s1263_s22 = smov (!%p253_p3, %s866_s22), 1  ;;  %v1035_v8 = vmov 0   ;;  %v643_v9 = vld [vmem:[%s1258_s3] sm:$0xff]  ;;  %vm335_vm0 = vcmask 523264  }
   0xc   : > { %v1000_v1 = vld [vmem:[%s1256_s1 + $0x18] sm:$0xff]  ;;  %352 = vmatpush.bf16.msra.mxu0 %v1004_v0  ;;  %v999_v5 = vld [vmem:[%s1256_s1 + $0x10] sm:$0xff]  ;;  %s1013_s15 = smul.u32 144, %s1263_s22  ;;  %1023 = vset.pattern.permute.xlu0 %v1035_v8  ;;  %v1002_v10 = vld [vmem:[%s1256_s1 + $0x28] sm:$0xff]  ;;  %vm699_vm1 = vcmask 261120   ;;  %vm721_vm2 = vcmask 253952   ;;  %s268_s18 = scalar_lea.vmem %s1261_s6, %s1263_s22 }
   0xd   : > { %v1008_v2 = vld [vmem:[%s1256_s1 + $0x58] sm:$0xff]  ;;  %417 = vmatpush.bf16.msra.mxu1 %v1000_v1  ;;  %v1007_v6 = vld [vmem:[%s1256_s1 + $0x50] sm:$0xff]  ;;  %1024 = vset.pattern.permute.xlu1 %v1035_v8  ;;  %v998_v11 = vld [vmem:[%s1256_s1 + $0x8] sm:$0xff] }
   0xe   : > { %v1012_v3 = vld [vmem:[%s1256_s1 + $0x78] sm:$0xff]  ;;  %504 = vmatpush.bf16.msra.mxu2 %v1008_v2  ;;  %v1011_v7 = vld [vmem:[%s1256_s1 + $0x70] sm:$0xff]  ;;  %1025 = vset.pattern.permute.xlu2 %v1035_v8  ;;  %s1118_s26 = scalar_lea.vmem %s1255_s0, %s1013_s15  ;;  %v1006_v12 = vld [vmem:[%s1256_s1 + $0x48] sm:$0xff]  ;;  %s265_s15 = scalar_lea.vmem %s1260_s5, %s1263_s22 }
   0xf   : > { %598 = vmatpush.bf16.msra.mxu3 %v1012_v3  ;;  %v1010_v13 = vld [vmem:[%s1256_s1 + $0x68] sm:$0xff]  ;;  %v1001_v14 = vld [vmem:[%s1256_s1 + $0x20] sm:$0xff]  ;;  %653 = vperm.xlu0 %1023, %v643_v9   ;;  %v291_v18 = vld [vmem:[%s1118_s26 + $0x11] sm:$0xff] }
  0x10   : > { %353 = vmatpush.bf16.msra.mxu0 %v1003_v4  ;;  %v997_v15 = vld [vmem:[%s1256_s1] sm:$0xff]  ;;  %v271_v20 = vld [vmem:[%s1118_s26 + $0x10] sm:$0xff]  ;;  %v644_v26 = vld [vmem:[%s1258_s3 + $0x8] sm:$0xff] }
  0x11   : > { %418 = vmatpush.bf16.msra.mxu1 %v999_v5  ;;  %v1005_v16 = vld [vmem:[%s1256_s1 + $0x40] sm:$0xff]  ;;  %v645_v29 = vld [vmem:[%s1258_s3 + $0x10] sm:$0xff]  ;;  %v646_v30 = vld [vmem:[%s1258_s3 + $0x18] sm:$0xff] }
  0x12   : > { %505 = vmatpush.bf16.msra.mxu2 %v1007_v6  ;;  %v290_v17 = vld [vmem:[%s1118_s26 + $0x1] sm:$0xff]  ;;  %663 = vperm.xlu1 %1024, %v645_v29   ;;  %v293_v31 = vld [vmem:[%s1118_s26 + $0x31] sm:$0xff]  ;;  %v1197_v3 = vld [vmem:[%s1257_s2] ss:$0 sm:$0xff] }
  0x13   : > { %599 = vmatpush.bf16.msra.mxu3 %v1011_v7  ;;  %v270_v19 = vld [vmem:[%s1118_s26] sm:$0xff]  ;;  %v298_v24 = vpack.c.bf16 %v291_v18, %v290_v17  ;;  %v273_v32 = vld [vmem:[%s1118_s26 + $0x30] sm:$0xff]  ;;  %v650_v40 = vld [vmem:[%s1258_s3 + $0x38] sm:$0xff] }
  0x14   : > { %354 = vmatpush.bf16.msra.mxu0 %v1002_v10  ;;  %v1009_v21 = vld [vmem:[%s1256_s1 + $0x60] sm:$0xff]  ;;  %v278_v25 = vpack.c.bf16 %v271_v20, %v270_v19  ;;  %v649_v39 = vld [vmem:[%s1258_s3 + $0x30] sm:$0xff]  ;;  %v648_v42 = vld [vmem:[%s1258_s3 + $0x28] sm:$0xff] }
  0x15   : > { %419 = vmatpush.bf16.msra.mxu1 %v998_v11  ;;  %v923_v22 = vld [vmem:[%s1118_s26 + $0x20] sm:$0xff]  ;;  %v295_v43 = vld [vmem:[%s1118_s26 + $0x51] sm:$0xff] }
  0x16   : > { %506 = vmatpush.bf16.msra.mxu2 %v1006_v12  ;;  %v959_v23 = vld [vmem:[%s1118_s26 + $0x21] sm:$0xff]  ;;  %v451_v27 = vpack.c.bf16 %v923_v22, %v271_v20  ;;  %v279_v36 = vpack.c.bf16 %v273_v32, %v923_v22  ;;  %v275_v44 = vld [vmem:[%s1118_s26 + $0x50] sm:$0xff] }
  0x17   : > { %600 = vmatpush.bf16.msra.mxu3 %v1010_v13  ;;  %v545_v28 = vpack.c.bf16 %v959_v23, %v291_v18  ;;  %658 = vperm.xlu0 %1023, %v644_v26   ;;  %v925_v33 = vld [vmem:[%s1118_s26 + $0x40] sm:$0xff]  ;;  %v299_v35 = vpack.c.bf16 %v293_v31, %v959_v23  ;;  %v297_v51 = vld [vmem:[%s1118_s26 + $0x71] sm:$0xff] }
  0x18   : > { %355 = vmatpush.bf16.msra.mxu0 %v1001_v14  ;;  %v961_v34 = vld [vmem:[%s1118_s26 + $0x41] sm:$0xff]  ;;  %v452_v37 = vpack.c.bf16 %v925_v33, %v273_v32  ;;  %v280_v48 = vpack.c.bf16 %v275_v44, %v925_v33  ;;  %v277_v52 = vld [vmem:[%s1118_s26 + $0x70] sm:$0xff] }
  0x19   : > { %420 = vmatpush.bf16.msra.mxu1 %v997_v15  ;;  %v546_v38 = vpack.c.bf16 %v961_v34, %v293_v31  ;;  %v647_v41 = vld [vmem:[%s1258_s3 + $0x20] sm:$0xff]  ;;  %v300_v47 = vpack.c.bf16 %v295_v43, %v961_v34 }
  0x1a   : > { %507 = vmatpush.bf16.msra.mxu2 %v1005_v16  ;;  %668 = vperm.xlu1 %1024, %v646_v30   ;;  %v927_v45 = vld [vmem:[%s1118_s26 + $0x60] sm:$0xff] }
  0x1b   : > { %601 = vmatpush.bf16.msra.mxu3 %v1009_v21  ;;  %898 = vmatmul.msk.bf16.vlgmr.msra.gmra.mxu0 %vm335_vm0, %v298_v24  ;;  %v963_v46 = vld [vmem:[%s1118_s26 + $0x61] sm:$0xff]  ;;  %v453_v49 = vpack.c.bf16 %v927_v45, %v275_v44  ;;  %v281_v56 = vpack.c.bf16 %v277_v52, %v927_v45 }
  0x1c   : > { %918 = vmatmul.msk.bf16.vlgmr.msra.gmra.mxu1 %vm335_vm0, %v278_v25  ;;  %673 = vperm.xlu2 %1025, %v647_v41   ;;  %v547_v50 = vpack.c.bf16 %v963_v46, %v295_v43  ;;  %v929_v53 = vld [vmem:[%s1118_s26 + $0x80] sm:$0xff]  ;;  %v301_v55 = vpack.c.bf16 %v297_v51, %v963_v46 }
  0x1d   : > { %954 = vmatmul.msk.bf16.vlgmr.msra.gmra.mxu2 %vm335_vm0, %v451_v27  ;;  %v965_v54 = vld [vmem:[%s1118_s26 + $0x81] sm:$0xff]  ;;  %v454_v57 = vpack.c.bf16 %v929_v53, %v277_v52  ;;  %s996_s26 = sshll.u32 %s1263_s22, 6 }
  0x1e   : > { %990 = vmatmul.msk.bf16.vlgmr.msra.gmra.mxu3 %vm335_vm0, %v545_v28  ;;  %v548_v58 = vpack.c.bf16 %v965_v54, %v297_v51  ;;  %s1202_s12 = scalar_lea.vmem %s1259_s4, %s996_s26 }
  0x1f   : > { %683 = vperm.xlu0 %1023, %v649_v39  }
  0x22   : > { %688 = vperm.xlu1 %1024, %v650_v40  }
  0x24   : > { %678 = vperm.xlu2 %1025, %v648_v42  }
  0x2b   : > { %899 = vmatmul.msk.bf16.gmra.mxu0 %vm335_vm0, %v299_v35 }
  0x2c   : > { %919 = vmatmul.msk.bf16.gmra.mxu1 %vm335_vm0, %v279_v36 }
  0x2d   : > { %955 = vmatmul.msk.bf16.gmra.mxu2 %vm335_vm0, %v452_v37 }
  0x2e   : > { %991 = vmatmul.msk.bf16.gmra.mxu3 %vm335_vm0, %v546_v38 }
  0x3b   : > { %900 = vmatmul.msk.bf16.gmra.mxu0 %vm335_vm0, %v300_v47 }
  0x3c   : > { %920 = vmatmul.msk.bf16.gmra.mxu1 %vm335_vm0, %v280_v48 }
  0x3d   : > { %956 = vmatmul.msk.bf16.gmra.mxu2 %vm335_vm0, %v453_v49 }
  0x3e   : > { %992 = vmatmul.msk.bf16.gmra.mxu3 %vm335_vm0, %v547_v50 }
  0x4b   : > { %901 = vmatmul.msk.bf16.gmra.mxu0 %vm335_vm0, %v301_v55 }
  0x4c   : > { %921 = vmatmul.msk.bf16.gmra.mxu1 %vm335_vm0, %v281_v56 }
  0x4d   : > { %957 = vmatmul.msk.bf16.gmra.mxu2 %vm335_vm0, %v454_v57 }
  0x4e   : > { %993 = vmatmul.msk.bf16.gmra.mxu3 %vm335_vm0, %v548_v58 }
  0x76   : > { %v674_v41 = vpop.permute.xlu2 %673 }
  0x81   : > { %v654_v31 = vpop.permute.xlu0 %653 }
  0x84   : > { %v664_v38 = vpop.permute.xlu1 %663 }
  0x89   : > { %v659_v44 = vpop.permute.xlu0 %658 }
  0x8c   : > { %v669_v54 = vpop.permute.xlu1 %668 }
  0x98   : > { %v357_v59 = vpop.f32.mrf.mxu0 }
  0x99   : > { %v422_v60 = vpop.f32.mrf.mxu1 }
  0x9a   : > { %v423_v61 = vadd.f32 %v422_v60, %v357_v59 }
  0xa0   : > { %v509_v62 = vpop.f32.mrf.mxu2  ;;  %v359_v1 = vpop.f32.mrf.mxu0 }
  0xa1   : > { %v603_v63 = vpop.f32.mrf.mxu3  ;;  %v529_v0 = vadd.f32 %v509_v62, %v423_v61  ;;  %v424_v2 = vpop.f32.mrf.mxu1 }
  0xa2   : > { %v425_v6 = vadd.f32 %v424_v2, %v359_v1  ;;  %v679_v62 = vpop.permute.xlu2 %678 }
  0xa3   : > { %v623_v4 = vadd.f32 %v603_v63, %v529_v0 }
  0xa5   : > { %v635_v5 = vadd.f32 %v1197_v3, %v623_v4 }
  0xa7   : > { %753 = vst.msk [vmem:[%s1202_s12] sm:$0xff] %vm699_vm1, %v635_v5  ;;  %v691_v52 = vmul.f32 %v654_v31, %v635_v5 }
  0xa8   : > { %v511_v7 = vpop.f32.mrf.mxu2  ;;  %v362_v10 = vpop.f32.mrf.mxu0 }
  0xa9   : > { %v605_v8 = vpop.f32.mrf.mxu3  ;;  %v530_v9 = vadd.f32 %v511_v7, %v425_v6  ;;  %v427_v11 = vpop.f32.mrf.mxu1  ;;  %v723_v60 = vmul.f32 %v691_v52, %v691_v52  ;;  %v700_v2 = vsel %vm699_vm1, %v691_v52, 0.0 }
  0xaa   : > { %v428_v13 = vadd.f32 %v427_v11, %v362_v10 }
  0xab   : > { %v624_v12 = vadd.f32 %v605_v8, %v530_v9  ;;  %v731_v11 = vsel %vm699_vm1, %v723_v60, 0.0 }
  0xad   : > { %v636_v14 = vadd.f32 %v1197_v3, %v624_v12 }
  0xaf   : > { %754 = vst.msk [vmem:[%s1202_s12 + $0x8] sm:$0xff] %vm699_vm1, %v636_v14  ;;  %v692_v49 = vmul.f32 %v659_v44, %v636_v14  ;;  %v684_v14 = vpop.permute.xlu0 %683 }
  0xb0   : > { %v514_v15 = vpop.f32.mrf.mxu2  ;;  %v364_v18 = vpop.f32.mrf.mxu0 }
  0xb1   : > { %v608_v16 = vpop.f32.mrf.mxu3  ;;  %v531_v17 = vadd.f32 %v514_v15, %v428_v13  ;;  %v429_v19 = vpop.f32.mrf.mxu1  ;;  %v724_v55 = vmul.f32 %v692_v49, %v692_v49  ;;  %v701_v63 = vsel %vm699_vm1, %v692_v49, 0.0 }
  0xb2   : > { %v430_v22 = vadd.f32 %v429_v19, %v364_v18  ;;  %v702_v12 = vadd.f32 %v701_v63, %v700_v2 }
  0xb3   : > { %v625_v20 = vadd.f32 %v608_v16, %v531_v17  ;;  %v732_v4 = vsel %vm699_vm1, %v724_v55, 0.0 }
  0xb4   : > { %v733_v19 = vadd.f32 %v732_v4, %v731_v11 }
  0xb5   : > { %v637_v21 = vadd.f32 %v1197_v3, %v625_v20 }
  0xb7   : > { %755 = vst.msk [vmem:[%s1202_s12 + $0x10] sm:$0xff] %vm699_vm1, %v637_v21  ;;  %v693_v53 = vmul.f32 %v664_v38, %v637_v21 }
  0xb8   : > { %v516_v23 = vpop.f32.mrf.mxu2  ;;  %v367_v26 = vpop.f32.mrf.mxu0 }
  0xb9   : > { %v610_v24 = vpop.f32.mrf.mxu3  ;;  %v532_v25 = vadd.f32 %v516_v23, %v430_v22  ;;  %v432_v27 = vpop.f32.mrf.mxu1  ;;  %v725_v61 = vmul.f32 %v693_v53, %v693_v53  ;;  %v703_v7 = vsel %vm699_vm1, %v693_v53, 0.0 }
  0xba   : > { %v433_v29 = vadd.f32 %v432_v27, %v367_v26  ;;  %v704_v20 = vadd.f32 %v703_v7, %v702_v12 }
  0xbb   : > { %v626_v28 = vadd.f32 %v610_v24, %v532_v25  ;;  %v734_v13 = vsel %vm699_vm1, %v725_v61, 0.0 }
  0xbc   : > { %v735_v26 = vadd.f32 %v734_v13, %v733_v19 }
  0xbd   : > { %v638_v30 = vadd.f32 %v1197_v3, %v626_v28 }
  0xbf   : > { %756 = vst.msk [vmem:[%s1202_s12 + $0x18] sm:$0xff] %vm699_vm1, %v638_v30  ;;  %v694_v58 = vmul.f32 %v669_v54, %v638_v30 }
  0xc0   : > { %v519_v32 = vpop.f32.mrf.mxu2  ;;  %v369_v35 = vpop.f32.mrf.mxu0 }
  0xc1   : > { %v613_v33 = vpop.f32.mrf.mxu3  ;;  %v533_v34 = vadd.f32 %v519_v32, %v433_v29  ;;  %v434_v36 = vpop.f32.mrf.mxu1  ;;  %v726_v8 = vmul.f32 %v694_v58, %v694_v58  ;;  %v705_v15 = vsel %vm699_vm1, %v694_v58, 0.0 }
  0xc2   : > { %v435_v40 = vadd.f32 %v434_v36, %v369_v35  ;;  %v706_v27 = vadd.f32 %v705_v15, %v704_v20 }
  0xc3   : > { %v627_v37 = vadd.f32 %v613_v33, %v533_v34  ;;  %v736_v22 = vsel %vm699_vm1, %v726_v8, 0.0 }
  0xc4   : > { %v737_v33 = vadd.f32 %v736_v22, %v735_v26 }
  0xc5   : > { %v639_v39 = vadd.f32 %v1197_v3, %v627_v37 }
  0xc7   : > { %757 = vst.msk [vmem:[%s1202_s12 + $0x20] sm:$0xff] %vm699_vm1, %v639_v39  ;;  %v695_v0 = vmul.f32 %v674_v41, %v639_v39 }
  0xc8   : > { %v521_v42 = vpop.f32.mrf.mxu2  ;;  %v372_v46 = vpop.f32.mrf.mxu0 }
  0xc9   : > { %v615_v43 = vpop.f32.mrf.mxu3  ;;  %v534_v45 = vadd.f32 %v521_v42, %v435_v40  ;;  %v437_v47 = vpop.f32.mrf.mxu1  ;;  %v727_v16 = vmul.f32 %v695_v0, %v695_v0  ;;  %v707_v23 = vsel %vm699_vm1, %v695_v0, 0.0 }
  0xca   : > { %v438_v50 = vadd.f32 %v437_v47, %v372_v46  ;;  %v708_v34 = vadd.f32 %v707_v23, %v706_v27  ;;  %v689_v40 = vpop.permute.xlu1 %688 }
  0xcb   : > { %v628_v48 = vadd.f32 %v615_v43, %v534_v45  ;;  %v738_v29 = vsel %vm699_vm1, %v727_v16, 0.0 }
  0xcc   : > { %v739_v38 = vadd.f32 %v738_v29, %v737_v33 }
  0xcd   : > { %v640_v51 = vadd.f32 %v1197_v3, %v628_v48 }
  0xcf   : > { %758 = vst.msk [vmem:[%s1202_s12 + $0x28] sm:$0xff] %vm699_vm1, %v640_v51  ;;  %v696_v9 = vmul.f32 %v679_v62, %v640_v51 }
  0xd0   : > { %v524_v56 = vpop.f32.mrf.mxu2  ;;  %v374_v5 = vpop.f32.mrf.mxu0 }
  0xd1   : > { %v618_v57 = vpop.f32.mrf.mxu3  ;;  %v535_v59 = vadd.f32 %v524_v56, %v438_v50  ;;  %v439_v6 = vpop.f32.mrf.mxu1  ;;  %v728_v24 = vmul.f32 %v696_v9, %v696_v9  ;;  %v709_v30 = vsel %vm699_vm1, %v696_v9, 0.0 }
  0xd2   : > { %v440_v18 = vadd.f32 %v439_v6, %v374_v5  ;;  %v710_v39 = vadd.f32 %v709_v30, %v708_v34 }
  0xd3   : > { %v629_v1 = vadd.f32 %v618_v57, %v535_v59  ;;  %v740_v35 = vsel %vm699_vm1, %v728_v24, 0.0 }
  0xd4   : > { %v741_v43 = vadd.f32 %v740_v35, %v739_v38 }
  0xd5   : > { %v641_v10 = vadd.f32 %v1197_v3, %v629_v1 }
  0xd7   : > { %v697_v17 = vmul.f32 %v684_v14, %v641_v10  ;;  %759 = vst.msk [vmem:[%s1202_s12 + $0x30] sm:$0xff] %vm699_vm1, %v641_v10 }
  0xd8   : > { %v526_v21 = vpop.f32.mrf.mxu2 }
  0xd9   : > { %v536_v25 = vadd.f32 %v526_v21, %v440_v18  ;;  %v620_v28 = vpop.f32.mrf.mxu3  ;;  %v729_v31 = vmul.f32 %v697_v17, %v697_v17  ;;  %v711_v36 = vsel %vm699_vm1, %v697_v17, 0.0 }
  0xda   : > { %v712_v44 = vadd.f32 %v711_v36, %v710_v39 }
  0xdb   : > { %v630_v32 = vadd.f32 %v620_v28, %v536_v25  ;;  %v742_v41 = vsel %vm699_vm1, %v729_v31, 0.0 }
  0xdc   : > { %v743_v47 = vadd.f32 %v742_v41, %v741_v43 }
  0xdd   : > { %v642_v37 = vadd.f32 %v1197_v3, %v630_v32 }
  0xdf   : > { %v698_v42 = vmul.f32 %v689_v40, %v642_v37  ;;  %760 = vst.msk [vmem:[%s1202_s12 + $0x38] sm:$0xff] %vm699_vm1, %v642_v37 }
  0xe1   : > { %v713_v45 = vsel %vm699_vm1, %v698_v42, 0.0  ;;  %v730_v46 = vmul.f32 %v698_v42, %v698_v42 }
  0xe2   : > { %v714_v48 = vadd.f32 %v713_v45, %v712_v44 }
  0xe3   : > { %v744_v49 = vsel %vm699_vm1, %v730_v46, 0.0 }
  0xe4   : > { %v715_v3 = vrot.slane %v714_v48, 4  ;;  %v745_v50 = vadd.f32 %v744_v49, %v743_v47 }
  0xe6   : > { %v716_v51 = vadd.f32 %v715_v3, %v714_v48  ;;  %v746_v52 = vrot.slane %v745_v50, 4 }
  0xe8   : > { %v717_v53 = vrot.slane %v716_v51, 2  ;;  %v747_v54 = vadd.f32 %v746_v52, %v745_v50 }
  0xea   : > { %v718_v55 = vadd.f32 %v717_v53, %v716_v51  ;;  %v748_v56 = vrot.slane %v747_v54, 2 }
  0xec   : > { %v719_v57 = vrot.slane %v718_v55, 1  ;;  %v749_v58 = vadd.f32 %v748_v56, %v747_v54 }
  0xee   : > { %v720_v59 = vadd.f32 %v719_v57, %v718_v55  ;;  %v750_v60 = vrot.slane %v749_v58, 1 }
  0xf0   : > { %722 = vst.msk [vmem:[%s265_s15] sm:$0x1] %vm721_vm2, %v720_v59  ;;  %v751_v61 = vadd.f32 %v750_v60, %v749_v58 }
  0xf2   : > { %752 = vst.msk [vmem:[%s268_s18] sm:$0x1] %vm721_vm2, %v751_v61 }
  0xf3 PF: > { %s17_s21 = sadd.s32 1, %s1033_s21  }
  0xf4   : > { %p14_p4 = scmp.ge.s32.totalorder %s17_s21, 4  }
  0xf6   :  { %16 = sbr.rel (!%p14_p4) target bundleno = 1 (0x1), region = 94 }

// kernel: patchgan_forward.7
= control target key start
LH: loop header
LB: loop body
LE: loop exit
PB: predicated region body
PF: predicated region fallthrough
CT: control target
= control target key end

     0   :  { %s1100_s21 = smov 0   ;;  %s1274_s0 = inlined_call_operand.vmem [shape: f32[2,5,9,128], index: 0, kind: input, shape index: {}]   ;;  %s1275_s1 = inlined_call_operand.vmem [shape: bf16[4,128,64], index: 1, kind: input, shape index: {}]   ;;  %s1276_s2 = inlined_call_operand.vmem [shape: f32[1,64], index: 2, kind: input, shape index: {}]   ;;  %s1277_s3 = inlined_call_operand.vmem [shape: f32[32,1], index: 3, kind: input, shape index: {}]   ;;  %s1278_s4 = inlined_call_operand.vmem [shape: f32[2,4,8,64], index: 4, kind: output, shape index: {0}]   ;;  %s1279_s5 = inlined_call_operand.vmem [shape: f32[2,1,64], index: 5, kind: output, shape index: {1}]   ;;  %s1280_s6 = inlined_call_operand.vmem [shape: f32[2,1,64], index: 6, kind: output, shape index: {2}]  }
   0x1 LB: > { %s816_s22 = sadd.s32 4294967295, %s1062_s21   ;;  %p820_p0 = scmp.ge.s32.totalorder %s1062_s21, 1  ;;  %s1062_s21 = sphi %s1100_s21, %s17_s21  }
   0x2   : > { %p217_p1 = scmp.lt.s32.totalorder %s1062_s21, 3 }
   0x4   : > { %p218_p2 = pnand %p820_p0, %p217_p1 }
   0x5   : > { %p253_p3 = scmp.lt.s32.totalorder (!%p218_p2), %s816_s22, 1 }
   0x6   : > { %221 = sbr.rel (%p218_p2) target bundleno = 227 (0xe3), region = 36 }
   0xb   : > { %v1026_v0 = vld [vmem:[%s1275_s1 + $0x78] sm:$0xff]  ;;  %v1025_v4 = vld [vmem:[%s1275_s1 + $0x70] sm:$0xff]  ;;  %v1024_v8 = vld [vmem:[%s1275_s1 + $0x68] sm:$0xff]  ;;  %s1282_s22 = smov (!%p253_p3, %s816_s22), 1  ;;  %v1064_v26 = vmov 0   ;;  %vm673_vm0 = vcmask 523264  }
   0xc   : > { %v1018_v1 = vld [vmem:[%s1275_s1 + $0x38] sm:$0xff]  ;;  %362 = vmatpush.bf16.msra.mxu0 %v1026_v0  ;;  %v1017_v5 = vld [vmem:[%s1275_s1 + $0x30] sm:$0xff]  ;;  %v1016_v9 = vld [vmem:[%s1275_s1 + $0x28] sm:$0xff]  ;;  %s1043_s23 = smul.u32 80, %s1282_s22  ;;  %1053 = vset.pattern.permute.xlu0 %v1064_v26  ;;  %s1010_s9 = sshll.u32 %s1282_s22, 5  ;;  %vm687_vm1 = vcmask 516096  }
   0xd   : > { %v1034_v2 = vld [vmem:[%s1275_s1 + $0xb8] sm:$0xff]  ;;  %429 = vmatpush.bf16.msra.mxu1 %v1018_v1  ;;  %v1033_v6 = vld [vmem:[%s1275_s1 + $0xb0] sm:$0xff]  ;;  %v1032_v10 = vld [vmem:[%s1275_s1 + $0xa8] sm:$0xff]  ;;  %1054 = vset.pattern.permute.xlu1 %v1064_v26  ;;  %s265_s17 = scalar_lea.vmem %s1279_s5, %s1282_s22  ;;  %s268_s20 = scalar_lea.vmem %s1280_s6, %s1282_s22 }
   0xe   : > { %v1042_v3 = vld [vmem:[%s1275_s1 + $0xf8] sm:$0xff]  ;;  %520 = vmatpush.bf16.msra.mxu2 %v1034_v2  ;;  %v1041_v7 = vld [vmem:[%s1275_s1 + $0xf0] sm:$0xff]  ;;  %v1040_v11 = vld [vmem:[%s1275_s1 + $0xe8] sm:$0xff]  ;;  %s1202_s14 = scalar_lea.vmem %s1274_s0, %s1043_s23 }
   0xf   : > { %614 = vmatpush.bf16.msra.mxu3 %v1042_v3  ;;  %v1023_v12 = vld [vmem:[%s1275_s1 + $0x60] sm:$0xff]  ;;  %v1022_v16 = vld [vmem:[%s1275_s1 + $0x58] sm:$0xff]  ;;  %v1021_v20 = vld [vmem:[%s1275_s1 + $0x50] sm:$0xff] }
  0x10   : > { %363 = vmatpush.bf16.msra.mxu0 %v1025_v4  ;;  %v1015_v13 = vld [vmem:[%s1275_s1 + $0x20] sm:$0xff]  ;;  %v1014_v17 = vld [vmem:[%s1275_s1 + $0x18] sm:$0xff]  ;;  %v1013_v21 = vld [vmem:[%s1275_s1 + $0x10] sm:$0xff] }
  0x11   : > { %430 = vmatpush.bf16.msra.mxu1 %v1017_v5  ;;  %v1031_v14 = vld [vmem:[%s1275_s1 + $0xa0] sm:$0xff]  ;;  %v1030_v18 = vld [vmem:[%s1275_s1 + $0x98] sm:$0xff]  ;;  %v647_v23 = vld [vmem:[%s1277_s3 + $0x10] sm:$0xff] }
  0x12   : > { %521 = vmatpush.bf16.msra.mxu2 %v1033_v6  ;;  %v1039_v15 = vld [vmem:[%s1275_s1 + $0xe0] sm:$0xff]  ;;  %v1038_v19 = vld [vmem:[%s1275_s1 + $0xd8] sm:$0xff]  ;;  %v1029_v24 = vld [vmem:[%s1275_s1 + $0x90] sm:$0xff]  ;;  %661 = vperm.xlu1 %1054, %v647_v23  }
  0x13   : > { %615 = vmatpush.bf16.msra.mxu3 %v1041_v7  ;;  %v645_v22 = vld [vmem:[%s1277_s3] sm:$0xff]  ;;  %v1037_v25 = vld [vmem:[%s1275_s1 + $0xd0] sm:$0xff]  ;;  %v1020_v27 = vld [vmem:[%s1275_s1 + $0x48] sm:$0xff] }
  0x14   : > { %364 = vmatpush.bf16.msra.mxu0 %v1024_v8  ;;  %651 = vperm.xlu0 %1053, %v645_v22   ;;  %v1012_v28 = vld [vmem:[%s1275_s1 + $0x8] sm:$0xff]  ;;  %v1019_v31 = vld [vmem:[%s1275_s1 + $0x40] sm:$0xff]  ;;  %v292_v35 = vld [vmem:[%s1202_s14 + $0x11] sm:$0xff] }
  0x15   : > { %431 = vmatpush.bf16.msra.mxu1 %v1016_v9  ;;  %v1028_v29 = vld [vmem:[%s1275_s1 + $0x88] sm:$0xff]  ;;  %v1011_v32 = vld [vmem:[%s1275_s1] sm:$0xff]  ;;  %v270_v37 = vld [vmem:[%s1202_s14 + $0x10] sm:$0xff] }
  0x16   : > { %522 = vmatpush.bf16.msra.mxu2 %v1032_v10  ;;  %v1036_v30 = vld [vmem:[%s1275_s1 + $0xc8] sm:$0xff]  ;;  %v1027_v33 = vld [vmem:[%s1275_s1 + $0x80] sm:$0xff]  ;;  %v648_v39 = vld [vmem:[%s1277_s3 + $0x18] sm:$0xff] }
  0x17   : > { %616 = vmatpush.bf16.msra.mxu3 %v1040_v11  ;;  %v291_v34 = vld [vmem:[%s1202_s14 + $0x1] sm:$0xff]  ;;  %v294_v47 = vld [vmem:[%s1202_s14 + $0x31] sm:$0xff]  ;;  %v1055_v63 = vld [vmem:[%s1276_s2] ss:$0 sm:$0xff] }
  0x18   : > { %365 = vmatpush.bf16.msra.mxu0 %v1023_v12  ;;  %v269_v36 = vld [vmem:[%s1202_s14] sm:$0xff]  ;;  %v646_v38 = vld [vmem:[%s1277_s3 + $0x8] sm:$0xff]  ;;  %v295_v43 = vpack.c.bf16 %v292_v35, %v291_v34  ;;  %v272_v48 = vld [vmem:[%s1202_s14 + $0x30] sm:$0xff] }
  0x19   : > { %432 = vmatpush.bf16.msra.mxu1 %v1015_v13  ;;  %v1035_v40 = vld [vmem:[%s1275_s1 + $0xc0] sm:$0xff]  ;;  %v273_v44 = vpack.c.bf16 %v270_v37, %v269_v36 }
  0x1a   : > { %523 = vmatpush.bf16.msra.mxu2 %v1031_v14  ;;  %v905_v41 = vld [vmem:[%s1202_s14 + $0x20] sm:$0xff]  ;;  %666 = vperm.xlu1 %1054, %v648_v39  }
  0x1b   : > { %617 = vmatpush.bf16.msra.mxu3 %v1039_v15  ;;  %v957_v42 = vld [vmem:[%s1202_s14 + $0x21] sm:$0xff]  ;;  %v453_v45 = vpack.c.bf16 %v905_v41, %v270_v37  ;;  %v274_v52 = vpack.c.bf16 %v272_v48, %v905_v41 }
  0x1c   : > { %366 = vmatpush.bf16.msra.mxu0 %v1022_v16  ;;  %656 = vperm.xlu0 %1053, %v646_v38   ;;  %v547_v46 = vpack.c.bf16 %v957_v42, %v292_v35  ;;  %v907_v49 = vld [vmem:[%s1202_s14 + $0x40] sm:$0xff]  ;;  %v296_v51 = vpack.c.bf16 %v294_v47, %v957_v42 }
  0x1d   : > { %433 = vmatpush.bf16.msra.mxu1 %v1014_v17  ;;  %v959_v50 = vld [vmem:[%s1202_s14 + $0x41] sm:$0xff]  ;;  %v454_v53 = vpack.c.bf16 %v907_v49, %v272_v48  ;;  %s1245_s14 = scalar_lea.vmem %s1278_s4, %s1010_s9 }
  0x1e   : > { %524 = vmatpush.bf16.msra.mxu2 %v1030_v18  ;;  %v548_v54 = vpack.c.bf16 %v959_v50, %v294_v47 }
  0x1f   : > { %618 = vmatpush.bf16.msra.mxu3 %v1038_v19 }
  0x20   : > { %367 = vmatpush.bf16.msra.mxu0 %v1021_v20 }
  0x21   : > { %434 = vmatpush.bf16.msra.mxu1 %v1013_v21 }
  0x22   : > { %525 = vmatpush.bf16.msra.mxu2 %v1029_v24 }
  0x23   : > { %619 = vmatpush.bf16.msra.mxu3 %v1037_v25 }
  0x24   : > { %368 = vmatpush.bf16.msra.mxu0 %v1020_v27 }
  0x25   : > { %435 = vmatpush.bf16.msra.mxu1 %v1012_v28 }
  0x26   : > { %526 = vmatpush.bf16.msra.mxu2 %v1028_v29 }
  0x27   : > { %620 = vmatpush.bf16.msra.mxu3 %v1036_v30 }
  0x28   : > { %369 = vmatpush.bf16.msra.mxu0 %v1019_v31 }
  0x29   : > { %436 = vmatpush.bf16.msra.mxu1 %v1011_v32 }
  0x2a   : > { %527 = vmatpush.bf16.msra.mxu2 %v1027_v33 }
  0x2b   : > { %621 = vmatpush.bf16.msra.mxu3 %v1035_v40  ;;  %370 = vmatmul.bf16.vlgmr.msra.gmra.mxu0 %v295_v43 }
  0x2c   : > { %437 = vmatmul.bf16.vlgmr.msra.gmra.mxu1 %v273_v44 }
  0x2d   : > { %528 = vmatmul.bf16.vlgmr.msra.gmra.mxu2 %v453_v45 }
  0x2e   : > { %622 = vmatmul.bf16.vlgmr.msra.gmra.mxu3 %v547_v46 }
  0x3b   : > { %375 = vmatmul.bf16.gmra.mxu0 %v296_v51 }
  0x3c   : > { %442 = vmatmul.bf16.gmra.mxu1 %v274_v52 }
  0x3d   : > { %533 = vmatmul.bf16.gmra.mxu2 %v454_v53 }
  0x3e   : > { %627 = vmatmul.bf16.gmra.mxu3 %v548_v54 }
  0x84   : > { %v662_v16 = vpop.permute.xlu1 %661 }
  0x86   : > { %v652_v3 = vpop.permute.xlu0 %651 }
  0x8c   : > { %v667_v38 = vpop.permute.xlu1 %666 }
  0x8e   : > { %v657_v15 = vpop.permute.xlu0 %656 }
  0xa8   : > { %v371_v55 = vpop.f32.mrf.mxu0 }
  0xa9   : > { %v438_v56 = vpop.f32.mrf.mxu1 }
  0xaa   : > { %v439_v57 = vadd.f32 %v438_v56, %v371_v55 }
  0xb0   : > { %v529_v58 = vpop.f32.mrf.mxu2  ;;  %v373_v61 = vpop.f32.mrf.mxu0 }
  0xb1   : > { %v623_v59 = vpop.f32.mrf.mxu3  ;;  %v539_v60 = vadd.f32 %v529_v58, %v439_v57  ;;  %v440_v62 = vpop.f32.mrf.mxu1 }
  0xb2   : > { %v441_v2 = vadd.f32 %v440_v62, %v373_v61 }
  0xb3   : > { %v633_v0 = vadd.f32 %v623_v59, %v539_v60 }
  0xb5   : > { %v641_v1 = vadd.f32 %v1055_v63, %v633_v0 }
  0xb7   : > { %707 = vst.msk [vmem:[%s1245_s14] sm:$0xff] %vm673_vm0, %v641_v1  ;;  %v669_v22 = vmul.f32 %v652_v3, %v641_v1 }
  0xb8   : > { %v531_v4 = vpop.f32.mrf.mxu2  ;;  %v376_v7 = vpop.f32.mrf.mxu0 }
  0xb9   : > { %v625_v5 = vpop.f32.mrf.mxu3  ;;  %v540_v6 = vadd.f32 %v531_v4, %v441_v2  ;;  %v443_v8 = vpop.f32.mrf.mxu1  ;;  %v689_v29 = vmul.f32 %v669_v22, %v669_v22  ;;  %v674_v33 = vsel %vm673_vm0, %v669_v22, 0.0 }
  0xba   : > { %v444_v10 = vadd.f32 %v443_v8, %v376_v7 }
  0xbb   : > { %v634_v9 = vadd.f32 %v625_v5, %v540_v6  ;;  %v693_v39 = vsel %vm673_vm0, %v689_v29, 0.0 }
  0xbd   : > { %v642_v11 = vadd.f32 %v1055_v63, %v634_v9 }
  0xbf   : > { %708 = vst.msk [vmem:[%s1245_s14 + $0x8] sm:$0xff] %vm673_vm0, %v642_v11  ;;  %v670_v20 = vmul.f32 %v657_v15, %v642_v11 }
  0xc0   : > { %v534_v12 = vpop.f32.mrf.mxu2  ;;  %v378_v18 = vpop.f32.mrf.mxu0 }
  0xc1   : > { %v628_v13 = vpop.f32.mrf.mxu3  ;;  %v541_v14 = vadd.f32 %v534_v12, %v444_v10  ;;  %v445_v19 = vpop.f32.mrf.mxu1  ;;  %v690_v26 = vmul.f32 %v670_v20, %v670_v20  ;;  %v675_v30 = vsel %vm673_vm0, %v670_v20, 0.0 }
  0xc2   : > { %v446_v24 = vadd.f32 %v445_v19, %v378_v18  ;;  %v676_v37 = vadd.f32 %v675_v30, %v674_v33 }
  0xc3   : > { %v635_v17 = vadd.f32 %v628_v13, %v541_v14  ;;  %v694_v34 = vsel %vm673_vm0, %v690_v26, 0.0 }
  0xc4   : > { %v695_v42 = vadd.f32 %v694_v34, %v693_v39 }
  0xc5   : > { %v643_v21 = vadd.f32 %v1055_v63, %v635_v17 }
  0xc7   : > { %v671_v23 = vmul.f32 %v662_v16, %v643_v21  ;;  %709 = vst.msk [vmem:[%s1245_s14 + $0x10] sm:$0xff] %vm673_vm0, %v643_v21 }
  0xc8   : > { %v536_v25 = vpop.f32.mrf.mxu2 }
  0xc9   : > { %v542_v27 = vadd.f32 %v536_v25, %v446_v24  ;;  %v630_v28 = vpop.f32.mrf.mxu3  ;;  %v691_v31 = vmul.f32 %v671_v23, %v671_v23  ;;  %v677_v35 = vsel %vm673_vm0, %v671_v23, 0.0 }
  0xca   : > { %v678_v43 = vadd.f32 %v677_v35, %v676_v37 }
  0xcb   : > { %v636_v32 = vadd.f32 %v630_v28, %v542_v27  ;;  %v696_v40 = vsel %vm673_vm0, %v691_v31, 0.0 }
  0xcc   : > { %v697_v46 = vadd.f32 %v696_v40, %v695_v42 }
  0xcd   : > { %v644_v36 = vadd.f32 %v1055_v63, %v636_v32 }
  0xcf   : > { %v672_v41 = vmul.f32 %v667_v38, %v644_v36  ;;  %710 = vst.msk [vmem:[%s1245_s14 + $0x18] sm:$0xff] %vm673_vm0, %v644_v36 }
  0xd1   : > { %v679_v44 = vsel %vm673_vm0, %v672_v41, 0.0  ;;  %v692_v45 = vmul.f32 %v672_v41, %v672_v41 }
  0xd2   : > { %v680_v47 = vadd.f32 %v679_v44, %v678_v43 }
  0xd3   : > { %v698_v48 = vsel %vm673_vm0, %v692_v45, 0.0 }
  0xd4   : > { %v681_v49 = vrot.slane %v680_v47, 4  ;;  %v699_v50 = vadd.f32 %v698_v48, %v697_v46 }
  0xd6   : > { %v682_v51 = vadd.f32 %v681_v49, %v680_v47  ;;  %v700_v52 = vrot.slane %v699_v50, 4 }
  0xd8   : > { %v683_v53 = vrot.slane %v682_v51, 2  ;;  %v701_v54 = vadd.f32 %v700_v52, %v699_v50 }
  0xda   : > { %v684_v55 = vadd.f32 %v683_v53, %v682_v51  ;;  %v702_v56 = vrot.slane %v701_v54, 2 }
  0xdc   : > { %v685_v57 = vrot.slane %v684_v55, 1  ;;  %v703_v58 = vadd.f32 %v702_v56, %v701_v54 }
  0xde   : > { %v686_v59 = vadd.f32 %v685_v57, %v684_v55  ;;  %v704_v60 = vrot.slane %v703_v58, 1 }
  0xe0   : > { %688 = vst.msk [vmem:[%s265_s17] sm:$0x1] %vm687_vm1, %v686_v59  ;;  %v705_v61 = vadd.f32 %v704_v60, %v703_v58 }
  0xe2   : > { %706 = vst.msk [vmem:[%s268_s20] sm:$0x1] %vm687_vm1, %v705_v61 }
  0xe3 PF: > { %s17_s21 = sadd.s32 1, %s1062_s21  }
  0xe4   : > { %p14_p4 = scmp.ge.s32.totalorder %s17_s21, 4  }
  0xe6   :  { %16 = sbr.rel (!%p14_p4) target bundleno = 1 (0x1), region = 94 }

// kernel: patchgan_forward.8
= control target key start
LH: loop header
LB: loop body
LE: loop exit
PB: predicated region body
PF: predicated region fallthrough
CT: control target
= control target key end

     0   :  { %s2039_s21 = smov 0   ;;  %s2375_s0 = inlined_call_operand.vmem [shape: f32[2,6,11,64], index: 0, kind: input, shape index: {}]   ;;  %s2376_s1 = inlined_call_operand.vmem [shape: bf16[16,64,128], index: 1, kind: input, shape index: {}]   ;;  %s2377_s2 = inlined_call_operand.vmem [shape: f32[1,128], index: 2, kind: input, shape index: {}]   ;;  %s2378_s3 = inlined_call_operand.vmem [shape: f32[24,1], index: 3, kind: input, shape index: {}]   ;;  %s2379_s4 = inlined_call_operand.vmem [shape: f32[2,3,8,128], index: 4, kind: output, shape index: {0}]   ;;  %s2380_s5 = inlined_call_operand.vmem [shape: f32[2,1,128], index: 5, kind: output, shape index: {1}]   ;;  %s2381_s6 = inlined_call_operand.vmem [shape: f32[2,1,128], index: 6, kind: output, shape index: {2}]  }
   0x1 LB: > { %s1464_s22 = sadd.s32 4294967295, %s2001_s21   ;;  %p1468_p0 = scmp.ge.s32.totalorder %s2001_s21, 1  ;;  %s2001_s21 = sphi %s2039_s21, %s17_s21  }
   0x2   : > { %p217_p1 = scmp.lt.s32.totalorder %s2001_s21, 3 }
   0x4   : > { %p218_p2 = pnand %p1468_p0, %p217_p1 }
   0x5   : > { %p253_p3 = scmp.lt.s32.totalorder (!%p218_p2), %s1464_s22, 1 }
   0x6   : > { %221 = sbr.rel (%p218_p2) target bundleno = 298 (0x12a), region = 36 }
   0xb   : > { %v1924_v0 = vld [vmem:[%s2376_s1 + $0x38] sm:$0xff]  ;;  %v1923_v4 = vld [vmem:[%s2376_s1 + $0x30] sm:$0xff]  ;;  %s2383_s22 = smov (!%p253_p3, %s1464_s22), 1  ;;  %v1922_v8 = vld [vmem:[%s2376_s1 + $0x28] sm:$0xff]  ;;  %vm321_vm0 = vcmask 523264  }
   0xc   : > { %v1920_v1 = vld [vmem:[%s2376_s1 + $0x18] sm:$0xff]  ;;  %332 = vmatpush.bf16.msra.mxu0 %v1924_v0  ;;  %v1919_v5 = vld [vmem:[%s2376_s1 + $0x10] sm:$0xff]  ;;  %s1981_s15 = smul.u32 96, %s2383_s22  ;;  %v1918_v9 = vld [vmem:[%s2376_s1 + $0x8] sm:$0xff]  ;;  %s265_s17 = scalar_lea.vmem %s2380_s5, %s2383_s22 }
   0xd   : > { %v1928_v2 = vld [vmem:[%s2376_s1 + $0x58] sm:$0xff]  ;;  %380 = vmatpush.bf16.msra.mxu1 %v1920_v1  ;;  %v1927_v6 = vld [vmem:[%s2376_s1 + $0x50] sm:$0xff]  ;;  %v1926_v10 = vld [vmem:[%s2376_s1 + $0x48] sm:$0xff]  ;;  %s268_s20 = scalar_lea.vmem %s2381_s6, %s2383_s22 }
   0xe   : > { %v1932_v3 = vld [vmem:[%s2376_s1 + $0x78] sm:$0xff]  ;;  %442 = vmatpush.bf16.msra.mxu2 %v1928_v2  ;;  %v1931_v7 = vld [vmem:[%s2376_s1 + $0x70] sm:$0xff]  ;;  %s2083_s24 = scalar_lea.vmem %s2375_s0, %s1981_s15  ;;  %v1930_v11 = vld [vmem:[%s2376_s1 + $0x68] sm:$0xff] }
   0xf   : > { %507 = vmatpush.bf16.msra.mxu3 %v1932_v3  ;;  %v1921_v12 = vld [vmem:[%s2376_s1 + $0x20] sm:$0xff]  ;;  %v2105_v17 = vld [vmem:[%s2083_s24 + $0x11] sm:$0xff]  ;;  %v1942_v36 = vld [vmem:[%s2376_s1 + $0xc8] sm:$0xff] }
  0x10   : > { %333 = vmatpush.bf16.msra.mxu0 %v1923_v4  ;;  %v1917_v13 = vld [vmem:[%s2376_s1] sm:$0xff]  ;;  %v2109_v19 = vld [vmem:[%s2083_s24 + $0x10] sm:$0xff]  ;;  %v1944_v24 = vld [vmem:[%s2376_s1 + $0xd8] sm:$0xff] }
  0x11   : > { %381 = vmatpush.bf16.msra.mxu1 %v1919_v5  ;;  %v1925_v14 = vld [vmem:[%s2376_s1 + $0x40] sm:$0xff]  ;;  %v2113_v21 = vld [vmem:[%s2083_s24 + $0x12] sm:$0xff]  ;;  %v1934_v37 = vld [vmem:[%s2376_s1 + $0x88] sm:$0xff] }
  0x12   : > { %443 = vmatpush.bf16.msra.mxu2 %v1927_v6  ;;  %v1929_v15 = vld [vmem:[%s2376_s1 + $0x60] sm:$0xff]  ;;  %v2117_v23 = vld [vmem:[%s2083_s24 + $0x13] sm:$0xff]  ;;  %v1946_v38 = vld [vmem:[%s2376_s1 + $0xe8] sm:$0xff] }
  0x13   : > { %508 = vmatpush.bf16.msra.mxu3 %v1931_v7  ;;  %v283_v16 = vld [vmem:[%s2083_s24 + $0x1] sm:$0xff]  ;;  %v1936_v25 = vld [vmem:[%s2376_s1 + $0x98] sm:$0xff]  ;;  %v1943_v32 = vld [vmem:[%s2376_s1 + $0xd0] sm:$0xff] }
  0x14   : > { %334 = vmatpush.bf16.msra.mxu0 %v1922_v8  ;;  %v270_v18 = vld [vmem:[%s2083_s24] sm:$0xff]  ;;  %v286_v26 = vpack.c.bf16 %v2105_v17, %v283_v16  ;;  %v1948_v30 = vld [vmem:[%s2376_s1 + $0xf8] sm:$0xff]  ;;  %v1935_v33 = vld [vmem:[%s2376_s1 + $0x90] sm:$0xff] }
  0x15   : > { %382 = vmatpush.bf16.msra.mxu1 %v1918_v9  ;;  %v394_v20 = vld [vmem:[%s2083_s24 + $0x2] sm:$0xff]  ;;  %v273_v27 = vpack.c.bf16 %v2109_v19, %v270_v18  ;;  %v1940_v31 = vld [vmem:[%s2376_s1 + $0xb8] sm:$0xff]  ;;  %v1947_v34 = vld [vmem:[%s2376_s1 + $0xf0] sm:$0xff] }
  0x16   : > { %444 = vmatpush.bf16.msra.mxu2 %v1926_v10  ;;  %v459_v22 = vld [vmem:[%s2083_s24 + $0x3] sm:$0xff]  ;;  %v397_v28 = vpack.c.bf16 %v2113_v21, %v394_v20  ;;  %v1939_v35 = vld [vmem:[%s2376_s1 + $0xb0] sm:$0xff]  ;;  %v1960_v42 = vld [vmem:[%s2376_s1 + $0x158] sm:$0xff] }
  0x17   : > { %509 = vmatpush.bf16.msra.mxu3 %v1930_v11  ;;  %v462_v29 = vpack.c.bf16 %v2117_v23, %v459_v22  ;;  %v1938_v39 = vld [vmem:[%s2376_s1 + $0xa8] sm:$0xff]  ;;  %v1941_v40 = vld [vmem:[%s2376_s1 + $0xc0] sm:$0xff]  ;;  %v1952_v43 = vld [vmem:[%s2376_s1 + $0x118] sm:$0xff] }
  0x18   : > { %335 = vmatpush.bf16.msra.mxu0 %v1921_v12  ;;  %v1933_v41 = vld [vmem:[%s2376_s1 + $0x80] sm:$0xff]  ;;  %v1964_v50 = vld [vmem:[%s2376_s1 + $0x178] sm:$0xff]  ;;  %v1959_v56 = vld [vmem:[%s2376_s1 + $0x150] sm:$0xff] }
  0x19   : > { %383 = vmatpush.bf16.msra.mxu1 %v1917_v13  ;;  %v2176_v44 = vld [vmem:[%s2083_s24 + $0x21] sm:$0xff]  ;;  %v1956_v51 = vld [vmem:[%s2376_s1 + $0x138] sm:$0xff]  ;;  %v1951_v57 = vld [vmem:[%s2376_s1 + $0x110] sm:$0xff] }
  0x1a   : > { %445 = vmatpush.bf16.msra.mxu2 %v1925_v14  ;;  %v2179_v45 = vld [vmem:[%s2083_s24 + $0x20] sm:$0xff]  ;;  %v287_v52 = vpack.c.bf16 %v2176_v44, %v2176_v44  ;;  %v1963_v58 = vld [vmem:[%s2376_s1 + $0x170] sm:$0xff]  ;;  %v1958_v60 = vld [vmem:[%s2376_s1 + $0x148] sm:$0xff]  ;;  %v593_v5 = vpack.c.bf16 %v2176_v44, %v2105_v17 }
  0x1b   : > { %510 = vmatpush.bf16.msra.mxu3 %v1929_v15  ;;  %1495 = vmatmul.msk.bf16.vlgmr.msra.gmra.mxu0 %vm321_vm0, %v286_v26  ;;  %v2182_v46 = vld [vmem:[%s2083_s24 + $0x22] sm:$0xff]  ;;  %v274_v53 = vpack.c.bf16 %v2179_v45, %v2179_v45  ;;  %v1955_v59 = vld [vmem:[%s2376_s1 + $0x130] sm:$0xff]  ;;  %v528_v4 = vpack.c.bf16 %v2179_v45, %v2109_v19  ;;  %v1976_v8 = vld [vmem:[%s2376_s1 + $0x1d8] sm:$0xff] }
  0x1c   : > { %573 = vmatpush.bf16.msrb.mxu0 %v1936_v25  ;;  %1513 = vmatmul.msk.bf16.vlgmr.msra.gmra.mxu1 %vm321_vm0, %v273_v27  ;;  %v2185_v47 = vld [vmem:[%s2083_s24 + $0x23] sm:$0xff]  ;;  %v398_v54 = vpack.c.bf16 %v2182_v46, %v2182_v46  ;;  %v658_v6 = vpack.c.bf16 %v2182_v46, %v2113_v21  ;;  %v1968_v9 = vld [vmem:[%s2376_s1 + $0x198] sm:$0xff]  ;;  %v1975_v12 = vld [vmem:[%s2376_s1 + $0x1d0] sm:$0xff] }
  0x1d   : > { %1539 = vmatmul.msk.bf16.vlgmr.msra.gmra.mxu2 %vm321_vm0, %v397_v28  ;;  %638 = vmatpush.bf16.msrb.mxu1 %v1940_v31  ;;  %v1945_v48 = vld [vmem:[%s2376_s1 + $0xe0] sm:$0xff]  ;;  %v463_v55 = vpack.c.bf16 %v2185_v47, %v2185_v47  ;;  %v1950_v61 = vld [vmem:[%s2376_s1 + $0x108] sm:$0xff]  ;;  %v723_v7 = vpack.c.bf16 %v2185_v47, %v2117_v23  ;;  %v1980_v10 = vld [vmem:[%s2376_s1 + $0x1f8] sm:$0xff] }
  0x1e   : > { %703 = vmatpush.bf16.msrb.mxu2 %v1944_v24  ;;  %1565 = vmatmul.msk.bf16.vlgmr.msra.gmra.mxu3 %vm321_vm0, %v462_v29  ;;  %v1937_v49 = vld [vmem:[%s2376_s1 + $0xa0] sm:$0xff]  ;;  %v1962_v62 = vld [vmem:[%s2376_s1 + $0x168] sm:$0xff]  ;;  %v1972_v11 = vld [vmem:[%s2376_s1 + $0x1b8] sm:$0xff] }
  0x1f   : > { %768 = vmatpush.bf16.msrb.mxu3 %v1948_v30  ;;  %v1954_v63 = vld [vmem:[%s2376_s1 + $0x128] sm:$0xff]  ;;  %v1957_v0 = vld [vmem:[%s2376_s1 + $0x140] sm:$0xff]  ;;  %v1967_v13 = vld [vmem:[%s2376_s1 + $0x190] sm:$0xff] }
  0x20   : > { %574 = vmatpush.bf16.msrb.mxu0 %v1935_v33  ;;  %v1949_v1 = vld [vmem:[%s2376_s1 + $0x100] sm:$0xff]  ;;  %v1979_v14 = vld [vmem:[%s2376_s1 + $0x1f0] sm:$0xff]  ;;  %v1974_v24 = vld [vmem:[%s2376_s1 + $0x1c8] sm:$0xff] }
  0x21   : > { %639 = vmatpush.bf16.msrb.mxu1 %v1939_v35  ;;  %v1961_v2 = vld [vmem:[%s2376_s1 + $0x160] sm:$0xff]  ;;  %v1971_v15 = vld [vmem:[%s2376_s1 + $0x1b0] sm:$0xff]  ;;  %v1966_v25 = vld [vmem:[%s2376_s1 + $0x188] sm:$0xff] }
  0x22   : > { %704 = vmatpush.bf16.msrb.mxu2 %v1943_v32  ;;  %v1953_v3 = vld [vmem:[%s2376_s1 + $0x120] sm:$0xff]  ;;  %v1569_v16 = vld [vmem:[%s2083_s24 + $0x30] sm:$0xff]  ;;  %v1978_v26 = vld [vmem:[%s2376_s1 + $0x1e8] sm:$0xff] }
  0x23   : > { %769 = vmatpush.bf16.msrb.mxu3 %v1947_v34  ;;  %v1598_v17 = vld [vmem:[%s2083_s24 + $0x31] sm:$0xff]  ;;  %v529_v20 = vpack.c.bf16 %v1569_v16, %v1569_v16  ;;  %v1970_v27 = vld [vmem:[%s2376_s1 + $0x1a8] sm:$0xff]  ;;  %v1973_v28 = vld [vmem:[%s2376_s1 + $0x1c0] sm:$0xff]  ;;  %v789_v32 = vpack.c.bf16 %v1569_v16, %v2179_v45  ;;  %v2003_v45 = vmov 0  }
  0x24   : > { %575 = vmatpush.bf16.msrb.mxu0 %v1934_v37  ;;  %v1627_v18 = vld [vmem:[%s2083_s24 + $0x32] sm:$0xff]  ;;  %v594_v21 = vpack.c.bf16 %v1598_v17, %v1598_v17  ;;  %v1965_v29 = vld [vmem:[%s2376_s1 + $0x180] sm:$0xff]  ;;  %v854_v33 = vpack.c.bf16 %v1598_v17, %v2176_v44  ;;  %1992 = vset.pattern.permute.xlu0 %v2003_v45 }
  0x25   : > { %640 = vmatpush.bf16.msrb.mxu1 %v1938_v39  ;;  %v1656_v19 = vld [vmem:[%s2083_s24 + $0x33] sm:$0xff]  ;;  %v659_v22 = vpack.c.bf16 %v1627_v18, %v1627_v18  ;;  %v1977_v30 = vld [vmem:[%s2376_s1 + $0x1e0] sm:$0xff]  ;;  %v919_v34 = vpack.c.bf16 %v1627_v18, %v2182_v46  ;;  %1993 = vset.pattern.permute.xlu1 %v2003_v45  ;;  %v1315_v46 = vld [vmem:[%s2378_s3 + $0x8] sm:$0xff] }
  0x26   : > { %705 = vmatpush.bf16.msrb.mxu2 %v1942_v36  ;;  %v724_v23 = vpack.c.bf16 %v1656_v19, %v1656_v19  ;;  %v1969_v31 = vld [vmem:[%s2376_s1 + $0x1a0] sm:$0xff]  ;;  %v984_v35 = vpack.c.bf16 %v1656_v19, %v2185_v47 }
  0x27   : > { %770 = vmatpush.bf16.msrb.mxu3 %v1946_v38  ;;  %v1685_v36 = vld [vmem:[%s2083_s24 + $0x40] sm:$0xff] }
  0x28   : > { %576 = vmatpush.bf16.msrb.mxu0 %v1933_v41  ;;  %v1714_v37 = vld [vmem:[%s2083_s24 + $0x41] sm:$0xff]  ;;  %v1050_v47 = vpack.c.bf16 %v1685_v36, %v1569_v16 }
  0x29   : > { %641 = vmatpush.bf16.msrb.mxu1 %v1937_v49  ;;  %v1743_v38 = vld [vmem:[%s2083_s24 + $0x42] sm:$0xff]  ;;  %v855_v41 = vpack.c.bf16 %v1714_v37, %v1714_v37 }
  0x2a   : > { %706 = vmatpush.bf16.msrb.mxu2 %v1941_v40  ;;  %v1772_v39 = vld [vmem:[%s2083_s24 + $0x43] sm:$0xff]  ;;  %v790_v40 = vpack.c.bf16 %v1685_v36, %v1685_v36  ;;  %v1180_v49 = vpack.c.bf16 %v1743_v38, %v1627_v18 }
  0x2b   : > { %771 = vmatpush.bf16.msrb.mxu3 %v1945_v48  ;;  %1496 = vmatmul.msk.bf16.gmra.mxu0 %vm321_vm0, %v287_v52  ;;  %v1314_v44 = vld [vmem:[%s2378_s3] sm:$0xff]  ;;  %v1115_v48 = vpack.c.bf16 %v1714_v37, %v1598_v17  ;;  %v1801_v52 = vld [vmem:[%s2083_s24 + $0x50] sm:$0xff] }
  0x2c   : > { %834 = vmatpush.bf16.msra.mxu0 %v1952_v43  ;;  %1514 = vmatmul.msk.bf16.gmra.mxu1 %vm321_vm0, %v274_v53  ;;  %v985_v43 = vpack.c.bf16 %v1772_v39, %v1772_v39  ;;  %v1830_v53 = vld [vmem:[%s2083_s24 + $0x51] sm:$0xff] }
  0x2d   : > { %899 = vmatpush.bf16.msra.mxu1 %v1956_v51  ;;  %1540 = vmatmul.msk.bf16.gmra.mxu2 %vm321_vm0, %v398_v54  ;;  %v1316_v51 = vld [vmem:[%s2378_s3 + $0x10] sm:$0xff] }
  0x2e   : > { %964 = vmatpush.bf16.msra.mxu2 %v1960_v42  ;;  %1566 = vmatmul.msk.bf16.gmra.mxu3 %vm321_vm0, %v463_v55  ;;  %v920_v42 = vpack.c.bf16 %v1743_v38, %v1743_v38  ;;  %v1859_v54 = vld [vmem:[%s2083_s24 + $0x52] sm:$0xff] }
  0x2f   : > { %1029 = vmatpush.bf16.msra.mxu3 %v1964_v50  ;;  %1319 = vperm.xlu0 %1992, %v1314_v44   ;;  %v1245_v50 = vpack.c.bf16 %v1772_v39, %v1656_v19  ;;  %v1888_v55 = vld [vmem:[%s2083_s24 + $0x53] sm:$0xff]  ;;  %s1982_s24 = smul.u32 24, %s2383_s22 }
  0x30   : > { %835 = vmatpush.bf16.msra.mxu0 %v1951_v57  ;;  %1329 = vperm.xlu1 %1993, %v1316_v51   ;;  %v1116_v57 = vpack.c.bf16 %v1830_v53, %v1830_v53 }
  0x31   : > { %900 = vmatpush.bf16.msra.mxu1 %v1955_v59  ;;  %v1246_v59 = vpack.c.bf16 %v1888_v55, %v1888_v55  ;;  %s2359_s14 = scalar_lea.vmem %s2379_s4, %s1982_s24 }
  0x32   : > { %965 = vmatpush.bf16.msra.mxu2 %v1959_v56  ;;  %v1051_v56 = vpack.c.bf16 %v1801_v52, %v1801_v52 }
  0x33   : > { %1030 = vmatpush.bf16.msra.mxu3 %v1963_v58  ;;  %v1181_v58 = vpack.c.bf16 %v1859_v54, %v1859_v54 }
  0x34   : > { %836 = vmatpush.bf16.msra.mxu0 %v1950_v61 }
  0x35   : > { %901 = vmatpush.bf16.msra.mxu1 %v1954_v63 }
  0x36   : > { %966 = vmatpush.bf16.msra.mxu2 %v1958_v60 }
  0x37   : > { %1031 = vmatpush.bf16.msra.mxu3 %v1962_v62  ;;  %1324 = vperm.xlu0 %1992, %v1315_v46  }
  0x38   : > { %837 = vmatpush.bf16.msra.mxu0 %v1949_v1 }
  0x39   : > { %902 = vmatpush.bf16.msra.mxu1 %v1953_v3 }
  0x3a   : > { %967 = vmatpush.bf16.msra.mxu2 %v1957_v0 }
  0x3b   : > { %1032 = vmatpush.bf16.msra.mxu3 %v1961_v2  ;;  %1594 = vmatmul.msk.bf16.vlgmr.msrb.gmra.mxu0 %vm321_vm0, %v528_v4 }
  0x3c   : > { %1623 = vmatmul.msk.bf16.vlgmr.msrb.gmra.mxu1 %vm321_vm0, %v593_v5  ;;  %1095 = vmatpush.bf16.msrb.mxu0 %v1968_v9 }
  0x3d   : > { %1652 = vmatmul.msk.bf16.vlgmr.msrb.gmra.mxu2 %vm321_vm0, %v658_v6  ;;  %1160 = vmatpush.bf16.msrb.mxu1 %v1972_v11 }
  0x3e   : > { %1681 = vmatmul.msk.bf16.vlgmr.msrb.gmra.mxu3 %vm321_vm0, %v723_v7  ;;  %1225 = vmatpush.bf16.msrb.mxu2 %v1976_v8 }
  0x3f   : > { %1290 = vmatpush.bf16.msrb.mxu3 %v1980_v10 }
  0x40   : > { %1096 = vmatpush.bf16.msrb.mxu0 %v1967_v13 }
  0x41   : > { %1161 = vmatpush.bf16.msrb.mxu1 %v1971_v15 }
  0x42   : > { %1226 = vmatpush.bf16.msrb.mxu2 %v1975_v12 }
  0x43   : > { %1291 = vmatpush.bf16.msrb.mxu3 %v1979_v14 }
  0x44   : > { %1097 = vmatpush.bf16.msrb.mxu0 %v1966_v25 }
  0x45   : > { %1162 = vmatpush.bf16.msrb.mxu1 %v1970_v27 }
  0x46   : > { %1227 = vmatpush.bf16.msrb.mxu2 %v1974_v24 }
  0x47   : > { %1292 = vmatpush.bf16.msrb.mxu3 %v1978_v26 }
  0x48   : > { %1098 = vmatpush.bf16.msrb.mxu0 %v1965_v29 }
  0x49   : > { %1163 = vmatpush.bf16.msrb.mxu1 %v1969_v31 }
  0x4a   : > { %1228 = vmatpush.bf16.msrb.mxu2 %v1973_v28 }
  0x4b   : > { %1595 = vmatmul.msk.bf16.gmra.mxu0 %vm321_vm0, %v529_v20  ;;  %1293 = vmatpush.bf16.msrb.mxu3 %v1977_v30 }
  0x4c   : > { %1624 = vmatmul.msk.bf16.gmra.mxu1 %vm321_vm0, %v594_v21 }
  0x4d   : > { %1653 = vmatmul.msk.bf16.gmra.mxu2 %vm321_vm0, %v659_v22 }
  0x4e   : > { %1682 = vmatmul.msk.bf16.gmra.mxu3 %vm321_vm0, %v724_v23 }
  0x5b   : > { %1710 = vmatmul.msk.bf16.vlgmr.msra.gmra.mxu0 %vm321_vm0, %v789_v32 }
  0x5c   : > { %1739 = vmatmul.msk.bf16.vlgmr.msra.gmra.mxu1 %vm321_vm0, %v854_v33 }
  0x5d   : > { %1768 = vmatmul.msk.bf16.vlgmr.msra.gmra.mxu2 %vm321_vm0, %v919_v34 }
  0x5e   : > { %1797 = vmatmul.msk.bf16.vlgmr.msra.gmra.mxu3 %vm321_vm0, %v984_v35 }
  0x6b   : > { %1711 = vmatmul.msk.bf16.gmra.mxu0 %vm321_vm0, %v790_v40 }
  0x6c   : > { %1740 = vmatmul.msk.bf16.gmra.mxu1 %vm321_vm0, %v855_v41 }
  0x6d   : > { %1769 = vmatmul.msk.bf16.gmra.mxu2 %vm321_vm0, %v920_v42 }
  0x6e   : > { %1798 = vmatmul.msk.bf16.gmra.mxu3 %vm321_vm0, %v985_v43 }
  0x7b   : > { %1826 = vmatmul.msk.bf16.vlgmr.msrb.gmra.mxu0 %vm321_vm0, %v1050_v47 }
  0x7c   : > { %1855 = vmatmul.msk.bf16.vlgmr.msrb.gmra.mxu1 %vm321_vm0, %v1115_v48 }
  0x7d   : > { %1884 = vmatmul.msk.bf16.vlgmr.msrb.gmra.mxu2 %vm321_vm0, %v1180_v49 }
  0x7e   : > { %1913 = vmatmul.msk.bf16.vlgmr.msrb.gmra.mxu3 %vm321_vm0, %v1245_v50 }
  0x8b   : > { %1827 = vmatmul.msk.bf16.gmra.mxu0 %vm321_vm0, %v1051_v56 }
  0x8c   : > { %1856 = vmatmul.msk.bf16.gmra.mxu1 %vm321_vm0, %v1116_v57 }
  0x8d   : > { %1885 = vmatmul.msk.bf16.gmra.mxu2 %vm321_vm0, %v1181_v58 }
  0x8e   : > { %1914 = vmatmul.msk.bf16.gmra.mxu3 %vm321_vm0, %v1246_v59 }
  0x98   : > { %v337_v60 = vpop.f32.mrf.mxu0 }
  0x99   : > { %v385_v61 = vpop.f32.mrf.mxu1 }
  0x9a   : > { %v386_v62 = vadd.f32 %v385_v61, %v337_v60 }
  0xa0   : > { %v447_v63 = vpop.f32.mrf.mxu2  ;;  %v339_v2 = vpop.f32.mrf.mxu0 }
  0xa1   : > { %v512_v0 = vpop.f32.mrf.mxu3  ;;  %v456_v1 = vadd.f32 %v447_v63, %v386_v62  ;;  %v387_v3 = vpop.f32.mrf.mxu1 }
  0xa2   : > { %v388_v4 = vadd.f32 %v387_v3, %v339_v2 }
  0xa3   : > { %v521_v5 = vadd.f32 %v512_v0, %v456_v1 }
  0xa8   : > { %v449_v6 = vpop.f32.mrf.mxu2  ;;  %v342_v9 = vpop.f32.mrf.mxu0 }
  0xa9   : > { %v514_v7 = vpop.f32.mrf.mxu3  ;;  %v457_v8 = vadd.f32 %v449_v6, %v388_v4  ;;  %v390_v10 = vpop.f32.mrf.mxu1 }
  0xaa   : > { %v391_v11 = vadd.f32 %v390_v10, %v342_v9 }
  0xab   : > { %v522_v12 = vadd.f32 %v514_v7, %v457_v8 }
  0xb0   : > { %v452_v13 = vpop.f32.mrf.mxu2  ;;  %v344_v16 = vpop.f32.mrf.mxu0 }
  0xb1   : > { %v517_v14 = vpop.f32.mrf.mxu3  ;;  %v458_v15 = vadd.f32 %v452_v13, %v391_v11  ;;  %v392_v17 = vpop.f32.mrf.mxu1 }
  0xb3   : > { %v523_v18 = vadd.f32 %v517_v14, %v458_v15 }
  0xb8   : > { %v454_v19 = vpop.f32.mrf.mxu2  ;;  %v578_v21 = vpop.f32.mrf.mxu0 }
  0xb9   : > { %v519_v20 = vpop.f32.mrf.mxu3  ;;  %v643_v22 = vpop.f32.mrf.mxu1  ;;  %v587_v43 = vadd.f32 %v578_v21, %v521_v5  ;;  %v1994_v19 = vld [vmem:[%s2377_s2] ss:$0 sm:$0xff] }
  0xbb   : > { %v652_v44 = vadd.f32 %v643_v22, %v587_v43 }
  0xc0   : > { %v708_v23 = vpop.f32.mrf.mxu2  ;;  %v580_v25 = vpop.f32.mrf.mxu0 }
  0xc1   : > { %v773_v24 = vpop.f32.mrf.mxu3  ;;  %v645_v26 = vpop.f32.mrf.mxu1  ;;  %v717_v47 = vadd.f32 %v708_v23, %v652_v44  ;;  %v588_v50 = vadd.f32 %v580_v25, %v522_v12 }
  0xc2   : > { %v1320_v23 = vpop.permute.xlu0 %1319 }
  0xc3   : > { %v782_v51 = vadd.f32 %v773_v24, %v717_v47  ;;  %v653_v52 = vadd.f32 %v645_v26, %v588_v50  ;;  %v1330_v50 = vpop.permute.xlu1 %1329 }
  0xc8   : > { %v710_v27 = vpop.f32.mrf.mxu2  ;;  %v583_v29 = vpop.f32.mrf.mxu0 }
  0xc9   : > { %v775_v28 = vpop.f32.mrf.mxu3  ;;  %v648_v30 = vpop.f32.mrf.mxu1  ;;  %v718_v56 = vadd.f32 %v710_v27, %v653_v52  ;;  %v589_v59 = vadd.f32 %v583_v29, %v523_v18 }
  0xcb   : > { %v783_v61 = vadd.f32 %v775_v28, %v718_v56  ;;  %v654_v63 = vadd.f32 %v648_v30, %v589_v59 }
  0xd0   : > { %v713_v31 = vpop.f32.mrf.mxu2  ;;  %v585_v33 = vpop.f32.mrf.mxu0 }
  0xd1   : > { %v778_v32 = vpop.f32.mrf.mxu3  ;;  %v650_v34 = vpop.f32.mrf.mxu1  ;;  %v719_v3 = vadd.f32 %v713_v31, %v654_v63 }
  0xd3   : > { %v784_v9 = vadd.f32 %v778_v32, %v719_v3 }
  0xd8   : > { %v715_v35 = vpop.f32.mrf.mxu2  ;;  %v839_v37 = vpop.f32.mrf.mxu0 }
  0xd9   : > { %v780_v36 = vpop.f32.mrf.mxu3  ;;  %v904_v38 = vpop.f32.mrf.mxu1  ;;  %v848_v53 = vadd.f32 %v839_v37, %v782_v51 }
  0xda   : > { %v1325_v37 = vpop.permute.xlu0 %1324 }
  0xdb   : > { %v913_v60 = vadd.f32 %v904_v38, %v848_v53 }
  0xe0   : > { %v969_v39 = vpop.f32.mrf.mxu2  ;;  %v841_v41 = vpop.f32.mrf.mxu0 }
  0xe1   : > { %v1034_v40 = vpop.f32.mrf.mxu3  ;;  %v906_v42 = vpop.f32.mrf.mxu1  ;;  %v978_v62 = vadd.f32 %v969_v39, %v913_v60  ;;  %v849_v0 = vadd.f32 %v841_v41, %v783_v61 }
  0xe3   : > { %v1043_v4 = vadd.f32 %v1034_v40, %v978_v62  ;;  %v914_v7 = vadd.f32 %v906_v42, %v849_v0 }
  0xe8   : > { %v971_v45 = vpop.f32.mrf.mxu2  ;;  %v844_v48 = vpop.f32.mrf.mxu0 }
  0xe9   : > { %v1036_v46 = vpop.f32.mrf.mxu3  ;;  %v909_v49 = vpop.f32.mrf.mxu1  ;;  %v979_v10 = vadd.f32 %v971_v45, %v914_v7  ;;  %v850_v11 = vadd.f32 %v844_v48, %v784_v9 }
  0xeb   : > { %v1044_v15 = vadd.f32 %v1036_v46, %v979_v10  ;;  %v915_v20 = vadd.f32 %v909_v49, %v850_v11 }
  0xf0   : > { %v974_v54 = vpop.f32.mrf.mxu2  ;;  %v846_v57 = vpop.f32.mrf.mxu0 }
  0xf1   : > { %v1039_v55 = vpop.f32.mrf.mxu3  ;;  %v911_v58 = vpop.f32.mrf.mxu1  ;;  %v980_v24 = vadd.f32 %v974_v54, %v915_v20 }
  0xf3   : > { %v1045_v29 = vadd.f32 %v1039_v55, %v980_v24 }
  0xf8   : > { %v976_v1 = vpop.f32.mrf.mxu2  ;;  %v1100_v5 = vpop.f32.mrf.mxu0 }
  0xf9   : > { %v1041_v2 = vpop.f32.mrf.mxu3  ;;  %v1165_v6 = vpop.f32.mrf.mxu1  ;;  %v1109_v8 = vadd.f32 %v1100_v5, %v1043_v4 }
  0xfb   : > { %v1174_v12 = vadd.f32 %v1165_v6, %v1109_v8 }
 0x100   : > { %v1230_v13 = vpop.f32.mrf.mxu2  ;;  %v1102_v17 = vpop.f32.mrf.mxu0 }
 0x101   : > { %v1295_v14 = vpop.f32.mrf.mxu3  ;;  %v1239_v16 = vadd.f32 %v1230_v13, %v1174_v12  ;;  %v1167_v18 = vpop.f32.mrf.mxu1  ;;  %v1110_v22 = vadd.f32 %v1102_v17, %v1044_v15 }
 0x103   : > { %v1304_v21 = vadd.f32 %v1295_v14, %v1239_v16  ;;  %v1175_v26 = vadd.f32 %v1167_v18, %v1110_v22 }
 0x105   : > { %v1311_v25 = vadd.f32 %v1994_v19, %v1304_v21 }
 0x107   : > { %1356 = vst [vmem:[%s2359_s14] sm:$0xff] %v1311_v25  ;;  %v1332_v35 = vmul.f32 %v1320_v23, %v1311_v25 }
 0x108   : > { %v1232_v27 = vpop.f32.mrf.mxu2  ;;  %v1105_v31 = vpop.f32.mrf.mxu0 }
 0x109   : > { %v1297_v28 = vpop.f32.mrf.mxu3  ;;  %v1240_v30 = vadd.f32 %v1232_v27, %v1175_v26  ;;  %v1170_v32 = vpop.f32.mrf.mxu1  ;;  %v1111_v34 = vadd.f32 %v1105_v31, %v1045_v29  ;;  %v1344_v42 = vmul.f32 %v1332_v35, %v1332_v35 }
 0x10b   : > { %v1305_v33 = vadd.f32 %v1297_v28, %v1240_v30  ;;  %v1176_v38 = vadd.f32 %v1170_v32, %v1111_v34 }
 0x10d   : > { %v1312_v36 = vadd.f32 %v1994_v19, %v1305_v33 }
 0x10f   : > { %v1333_v39 = vmul.f32 %v1325_v37, %v1312_v36  ;;  %1357 = vst [vmem:[%s2359_s14 + $0x8] sm:$0xff] %v1312_v36 }
 0x110   : > { %v1235_v40 = vpop.f32.mrf.mxu2  ;;  %v1107_v46 = vpop.f32.mrf.mxu0 }
 0x111   : > { %v1300_v41 = vpop.f32.mrf.mxu3  ;;  %v1335_v43 = vadd.f32 %v1333_v39, %v1332_v35  ;;  %v1345_v44 = vmul.f32 %v1333_v39, %v1333_v39  ;;  %v1241_v45 = vadd.f32 %v1235_v40, %v1176_v38  ;;  %v1172_v47 = vpop.f32.mrf.mxu1 }
 0x113   : > { %v1347_v48 = vadd.f32 %v1345_v44, %v1344_v42  ;;  %v1306_v49 = vadd.f32 %v1300_v41, %v1241_v45 }
 0x115   : > { %v1313_v51 = vadd.f32 %v1994_v19, %v1306_v49 }
 0x117   : > { %v1334_v52 = vmul.f32 %v1330_v50, %v1313_v51  ;;  %1358 = vst [vmem:[%s2359_s14 + $0x10] sm:$0xff] %v1313_v51 }
 0x118   : > { %v1237_v53 = vpop.f32.mrf.mxu2 }
 0x119   : > { %v1302_v54 = vpop.f32.mrf.mxu3  ;;  %v1336_v55 = vadd.f32 %v1335_v43, %v1334_v52  ;;  %v1346_v56 = vmul.f32 %v1334_v52, %v1334_v52 }
 0x11b   : > { %v1337_v57 = vrot.slane %v1336_v55, 4  ;;  %v1348_v58 = vadd.f32 %v1347_v48, %v1346_v56 }
 0x11d   : > { %v1338_v59 = vadd.f32 %v1337_v57, %v1336_v55  ;;  %v1349_v60 = vrot.slane %v1348_v58, 4 }
 0x11f   : > { %v1339_v61 = vrot.slane %v1338_v59, 2  ;;  %v1350_v62 = vadd.f32 %v1349_v60, %v1348_v58 }
 0x121   : > { %v1340_v63 = vadd.f32 %v1339_v61, %v1338_v59  ;;  %v1351_v0 = vrot.slane %v1350_v62, 2 }
 0x123   : > { %v1341_v1 = vrot.slane %v1340_v63, 1  ;;  %v1352_v2 = vadd.f32 %v1351_v0, %v1350_v62 }
 0x125   : > { %v1342_v3 = vadd.f32 %v1341_v1, %v1340_v63  ;;  %v1353_v4 = vrot.slane %v1352_v2, 1 }
 0x127   : > { %1343 = vst [vmem:[%s265_s17] sm:$0x1] %v1342_v3  ;;  %v1354_v5 = vadd.f32 %v1353_v4, %v1352_v2 }
 0x129   : > { %1355 = vst [vmem:[%s268_s20] sm:$0x1] %v1354_v5 }
 0x12a PF: > { %s17_s21 = sadd.s32 1, %s2001_s21  }
 0x12b   : > { %p14_p4 = scmp.ge.s32.totalorder %s17_s21, 4  }
 0x12d   :  { %16 = sbr.rel (!%p14_p4) target bundleno = 1 (0x1), region = 108 }

// kernel: patchgan_forward.9
= control target key start
LH: loop header
LB: loop body
LE: loop exit
PB: predicated region body
PF: predicated region fallthrough
CT: control target
= control target key end

     0   :  { %s2535_s14 = smov 0   ;;  %s3014_s0 = inlined_call_operand.vmem [shape: f32[2,5,11,128], index: 0, kind: input, shape index: {}]   ;;  %s3015_s1 = inlined_call_operand.vmem [shape: bf16[16,128,1], index: 1, kind: input, shape index: {}]   ;;  %s3016_s2 = inlined_call_operand.<no memory space> [shape: f32[1,1], index: 2, kind: input, shape index: {}]   ;;  %s3017_s3 = inlined_call_operand.vmem [shape: f32[2,2,8,1], index: 3, kind: output, shape index: {}]  }
   0x1   :  { %v8_v0 = vstv %s3016_s2 }
   0x2   :  { %9 = vst [vmem:[#allocation2] sm:$0x1] %v8_v0 }
   0x3 LB: > { %s1579_s15 = sadd.s32 4294967295, %s2510_s14   ;;  %p1583_p0 = scmp.ge.s32.totalorder %s2510_s14, 1  ;;  %s2510_s14 = sphi %s2535_s14, %s15_s14  }
   0x4   : > { %p139_p1 = scmp.lt.s32.totalorder %s2510_s14, 3 }
   0x6   : > { %p140_p2 = pnand %p1583_p0, %p139_p1 }
   0x7   : > { %p163_p3 = scmp.lt.s32.totalorder (!%p140_p2), %s1579_s15, 1 }
   0x8   : > { %143 = sbr.rel (%p140_p2) target bundleno = 290 (0x122), region = 32 }
   0xd   : > { %v2381_v1 = vld [vmem:[%s3015_s1 + $0x78] sm:$0xff]  ;;  %v2380_v5 = vld [vmem:[%s3015_s1 + $0x70] sm:$0xff]  ;;  %v2379_v9 = vld [vmem:[%s3015_s1 + $0x68] sm:$0xff]  ;;  %s3019_s15 = smov (!%p163_p3, %s1579_s15), 1  ;;  %vm1521_vm0 = vcmask 7168  }
   0xe   : > { %v2373_v2 = vld [vmem:[%s3015_s1 + $0x38] sm:$0xff]  ;;  %260 = vmatpush.bf16.msra.mxu0 %v2381_v1  ;;  %v2372_v6 = vld [vmem:[%s3015_s1 + $0x30] sm:$0xff]  ;;  %v2371_v10 = vld [vmem:[%s3015_s1 + $0x28] sm:$0xff]  ;;  %s2494_s10 = smul.u32 80, %s3019_s15 }
   0xf   : > { %v2389_v3 = vld [vmem:[%s3015_s1 + $0xb8] sm:$0xff]  ;;  %322 = vmatpush.bf16.msra.mxu1 %v2373_v2  ;;  %v2388_v7 = vld [vmem:[%s3015_s1 + $0xb0] sm:$0xff]  ;;  %v2387_v11 = vld [vmem:[%s3015_s1 + $0xa8] sm:$0xff] }
  0x10   : > { %v2397_v4 = vld [vmem:[%s3015_s1 + $0xf8] sm:$0xff]  ;;  %404 = vmatpush.bf16.msra.mxu2 %v2389_v3  ;;  %v2396_v8 = vld [vmem:[%s3015_s1 + $0xf0] sm:$0xff]  ;;  %v2395_v12 = vld [vmem:[%s3015_s1 + $0xe8] sm:$0xff]  ;;  %s2637_s22 = scalar_lea.vmem %s3014_s0, %s2494_s10 }
  0x11   : > { %488 = vmatpush.bf16.msra.mxu3 %v2397_v4  ;;  %v2378_v13 = vld [vmem:[%s3015_s1 + $0x60] sm:$0xff]  ;;  %v2377_v17 = vld [vmem:[%s3015_s1 + $0x58] sm:$0xff]  ;;  %v2376_v21 = vld [vmem:[%s3015_s1 + $0x50] sm:$0xff] }
  0x12   : > { %261 = vmatpush.bf16.msra.mxu0 %v2380_v5  ;;  %v2370_v14 = vld [vmem:[%s3015_s1 + $0x20] sm:$0xff]  ;;  %v2369_v18 = vld [vmem:[%s3015_s1 + $0x18] sm:$0xff]  ;;  %v2368_v22 = vld [vmem:[%s3015_s1 + $0x10] sm:$0xff] }
  0x13   : > { %323 = vmatpush.bf16.msra.mxu1 %v2372_v6  ;;  %v2386_v15 = vld [vmem:[%s3015_s1 + $0xa0] sm:$0xff]  ;;  %v2385_v19 = vld [vmem:[%s3015_s1 + $0x98] sm:$0xff]  ;;  %v2384_v23 = vld [vmem:[%s3015_s1 + $0x90] sm:$0xff] }
  0x14   : > { %405 = vmatpush.bf16.msra.mxu2 %v2388_v7  ;;  %v2394_v16 = vld [vmem:[%s3015_s1 + $0xe0] sm:$0xff]  ;;  %v2393_v20 = vld [vmem:[%s3015_s1 + $0xd8] sm:$0xff]  ;;  %v2392_v24 = vld [vmem:[%s3015_s1 + $0xd0] sm:$0xff] }
  0x15   : > { %489 = vmatpush.bf16.msra.mxu3 %v2396_v8  ;;  %v2375_v25 = vld [vmem:[%s3015_s1 + $0x48] sm:$0xff]  ;;  %v2374_v29 = vld [vmem:[%s3015_s1 + $0x40] sm:$0xff]  ;;  %v2405_v33 = vld [vmem:[%s3015_s1 + $0x138] sm:$0xff] }
  0x16   : > { %262 = vmatpush.bf16.msra.mxu0 %v2379_v9  ;;  %v2367_v26 = vld [vmem:[%s3015_s1 + $0x8] sm:$0xff]  ;;  %v2366_v30 = vld [vmem:[%s3015_s1] sm:$0xff]  ;;  %v2413_v34 = vld [vmem:[%s3015_s1 + $0x178] sm:$0xff] }
  0x17   : > { %324 = vmatpush.bf16.msra.mxu1 %v2371_v10  ;;  %v2383_v27 = vld [vmem:[%s3015_s1 + $0x88] sm:$0xff]  ;;  %v2382_v31 = vld [vmem:[%s3015_s1 + $0x80] sm:$0xff]  ;;  %v2659_v36 = vld [vmem:[%s2637_s22 + $0x11] sm:$0xff] }
  0x18   : > { %406 = vmatpush.bf16.msra.mxu2 %v2387_v11  ;;  %v2391_v28 = vld [vmem:[%s3015_s1 + $0xc8] sm:$0xff]  ;;  %v2390_v32 = vld [vmem:[%s3015_s1 + $0xc0] sm:$0xff]  ;;  %v2663_v38 = vld [vmem:[%s2637_s22 + $0x12] sm:$0xff] }
  0x19   : > { %490 = vmatpush.bf16.msra.mxu3 %v2395_v12  ;;  %v192_v35 = vld [vmem:[%s2637_s22 + $0x1] sm:$0xff]  ;;  %v2667_v40 = vld [vmem:[%s2637_s22 + $0x10] sm:$0xff]  ;;  %v2421_v43 = vld [vmem:[%s3015_s1 + $0x1b8] sm:$0xff] }
  0x1a   : > { %263 = vmatpush.bf16.msra.mxu0 %v2378_v13  ;;  %v336_v37 = vld [vmem:[%s2637_s22 + $0x2] sm:$0xff]  ;;  %v2671_v42 = vld [vmem:[%s2637_s22 + $0x13] sm:$0xff]  ;;  %v194_v45 = vpack.c.bf16 %v2659_v36, %v192_v35 }
  0x1b   : > { %325 = vmatpush.bf16.msra.mxu1 %v2370_v14  ;;  %v173_v39 = vld [vmem:[%s2637_s22] sm:$0xff]  ;;  %v2429_v44 = vld [vmem:[%s3015_s1 + $0x1f8] sm:$0xff]  ;;  %v338_v46 = vpack.c.bf16 %v2663_v38, %v336_v37  ;;  %v2404_v49 = vld [vmem:[%s3015_s1 + $0x130] sm:$0xff] }
  0x1c   : > { %407 = vmatpush.bf16.msra.mxu2 %v2386_v15  ;;  %v420_v41 = vld [vmem:[%s2637_s22 + $0x3] sm:$0xff]  ;;  %v175_v47 = vpack.c.bf16 %v2667_v40, %v173_v39  ;;  %v2412_v50 = vld [vmem:[%s3015_s1 + $0x170] sm:$0xff]  ;;  %v2401_v61 = vld [vmem:[%s3015_s1 + $0x118] sm:$0xff] }
  0x1d   : > { %491 = vmatpush.bf16.msra.mxu3 %v2394_v16  ;;  %v422_v48 = vpack.c.bf16 %v2671_v42, %v420_v41  ;;  %v2420_v51 = vld [vmem:[%s3015_s1 + $0x1b0] sm:$0xff]  ;;  %v2403_v53 = vld [vmem:[%s3015_s1 + $0x128] sm:$0xff]  ;;  %v2402_v57 = vld [vmem:[%s3015_s1 + $0x120] sm:$0xff] }
  0x1e   : > { %264 = vmatpush.bf16.msra.mxu0 %v2377_v17  ;;  %v2428_v52 = vld [vmem:[%s3015_s1 + $0x1f0] sm:$0xff]  ;;  %v2411_v54 = vld [vmem:[%s3015_s1 + $0x168] sm:$0xff]  ;;  %v2410_v58 = vld [vmem:[%s3015_s1 + $0x160] sm:$0xff] }
  0x1f   : > { %326 = vmatpush.bf16.msra.mxu1 %v2369_v18  ;;  %v2419_v55 = vld [vmem:[%s3015_s1 + $0x1a8] sm:$0xff]  ;;  %v2418_v59 = vld [vmem:[%s3015_s1 + $0x1a0] sm:$0xff]  ;;  %v2409_v62 = vld [vmem:[%s3015_s1 + $0x158] sm:$0xff] }
  0x20   : > { %408 = vmatpush.bf16.msra.mxu2 %v2385_v19  ;;  %v2427_v56 = vld [vmem:[%s3015_s1 + $0x1e8] sm:$0xff]  ;;  %v2426_v60 = vld [vmem:[%s3015_s1 + $0x1e0] sm:$0xff]  ;;  %v2417_v63 = vld [vmem:[%s3015_s1 + $0x198] sm:$0xff] }
  0x21   : > { %492 = vmatpush.bf16.msra.mxu3 %v2393_v20  ;;  %v2425_v0 = vld [vmem:[%s3015_s1 + $0x1d8] sm:$0xff]  ;;  %v2400_v1 = vld [vmem:[%s3015_s1 + $0x110] sm:$0xff]  ;;  %v2399_v5 = vld [vmem:[%s3015_s1 + $0x108] sm:$0xff] }
  0x22   : > { %265 = vmatpush.bf16.msra.mxu0 %v2376_v21  ;;  %v2408_v2 = vld [vmem:[%s3015_s1 + $0x150] sm:$0xff]  ;;  %v2407_v6 = vld [vmem:[%s3015_s1 + $0x148] sm:$0xff]  ;;  %v2398_v9 = vld [vmem:[%s3015_s1 + $0x100] sm:$0xff] }
  0x23   : > { %327 = vmatpush.bf16.msra.mxu1 %v2368_v22  ;;  %v2416_v3 = vld [vmem:[%s3015_s1 + $0x190] sm:$0xff]  ;;  %v2415_v7 = vld [vmem:[%s3015_s1 + $0x188] sm:$0xff]  ;;  %v2406_v10 = vld [vmem:[%s3015_s1 + $0x140] sm:$0xff] }
  0x24   : > { %409 = vmatpush.bf16.msra.mxu2 %v2384_v23  ;;  %v2424_v4 = vld [vmem:[%s3015_s1 + $0x1d0] sm:$0xff]  ;;  %v2423_v8 = vld [vmem:[%s3015_s1 + $0x1c8] sm:$0xff]  ;;  %v2414_v11 = vld [vmem:[%s3015_s1 + $0x180] sm:$0xff] }
  0x25   : > { %493 = vmatpush.bf16.msra.mxu3 %v2392_v24  ;;  %v2422_v12 = vld [vmem:[%s3015_s1 + $0x1c0] sm:$0xff]  ;;  %v2437_v13 = vld [vmem:[%s3015_s1 + $0x238] sm:$0xff]  ;;  %v2432_v41 = vld [vmem:[%s3015_s1 + $0x210] sm:$0xff] }
  0x26   : > { %266 = vmatpush.bf16.msra.mxu0 %v2375_v25  ;;  %v2771_v14 = vld [vmem:[%s2637_s22 + $0x20] sm:$0xff]  ;;  %v2445_v16 = vld [vmem:[%s3015_s1 + $0x278] sm:$0xff]  ;;  %v2436_v25 = vld [vmem:[%s3015_s1 + $0x230] sm:$0xff] }
  0x27   : > { %328 = vmatpush.bf16.msra.mxu1 %v2367_v26  ;;  %v2774_v15 = vld [vmem:[%s2637_s22 + $0x22] sm:$0xff]  ;;  %v2453_v19 = vld [vmem:[%s3015_s1 + $0x2b8] sm:$0xff]  ;;  %v507_v21 = vpack.c.bf16 %v2771_v14, %v2667_v40  ;;  %v2444_v26 = vld [vmem:[%s3015_s1 + $0x270] sm:$0xff] }
  0x28   : > { %410 = vmatpush.bf16.msra.mxu2 %v2383_v27  ;;  %v2780_v17 = vld [vmem:[%s2637_s22 + $0x21] sm:$0xff]  ;;  %v2461_v20 = vld [vmem:[%s3015_s1 + $0x2f8] sm:$0xff]  ;;  %v675_v22 = vpack.c.bf16 %v2774_v15, %v2663_v38  ;;  %v2452_v27 = vld [vmem:[%s3015_s1 + $0x2b0] sm:$0xff] }
  0x29   : > { %494 = vmatpush.bf16.msra.mxu3 %v2391_v28  ;;  %v2783_v18 = vld [vmem:[%s2637_s22 + $0x23] sm:$0xff]  ;;  %v591_v23 = vpack.c.bf16 %v2780_v17, %v2659_v36  ;;  %v2460_v28 = vld [vmem:[%s3015_s1 + $0x2f0] sm:$0xff]  ;;  %v2433_v37 = vld [vmem:[%s3015_s1 + $0x218] sm:$0xff] }
  0x2a   : > { %267 = vmatpush.bf16.msra.mxu0 %v2374_v29  ;;  %v759_v24 = vpack.c.bf16 %v2783_v18, %v2671_v42  ;;  %v2435_v29 = vld [vmem:[%s3015_s1 + $0x228] sm:$0xff]  ;;  %v2450_v35 = vld [vmem:[%s3015_s1 + $0x2a0] sm:$0xff]  ;;  %v2441_v38 = vld [vmem:[%s3015_s1 + $0x258] sm:$0xff] }
  0x2b   : > { %329 = vmatpush.bf16.msra.mxu1 %v2366_v30  ;;  %v2443_v30 = vld [vmem:[%s3015_s1 + $0x268] sm:$0xff]  ;;  %v2458_v36 = vld [vmem:[%s3015_s1 + $0x2e0] sm:$0xff]  ;;  %v2449_v39 = vld [vmem:[%s3015_s1 + $0x298] sm:$0xff] }
  0x2c   : > { %411 = vmatpush.bf16.msra.mxu2 %v2382_v31  ;;  %v2451_v31 = vld [vmem:[%s3015_s1 + $0x2a8] sm:$0xff]  ;;  %v2457_v40 = vld [vmem:[%s3015_s1 + $0x2d8] sm:$0xff]  ;;  %v2440_v42 = vld [vmem:[%s3015_s1 + $0x250] sm:$0xff] }
  0x2d   : > { %495 = vmatpush.bf16.msra.mxu3 %v2390_v32  ;;  %268 = vmatmul.bf16.vlgmr.msra.gmra.mxu0 %v194_v45  ;;  %v2459_v32 = vld [vmem:[%s3015_s1 + $0x2e8] sm:$0xff] }
  0x2e   : > { %573 = vmatpush.bf16.msrb.mxu0 %v2405_v33  ;;  %330 = vmatmul.bf16.vlgmr.msra.gmra.mxu1 %v175_v47  ;;  %v2434_v33 = vld [vmem:[%s3015_s1 + $0x220] sm:$0xff]  ;;  %v2431_v45 = vld [vmem:[%s3015_s1 + $0x208] sm:$0xff] }
  0x2f   : > { %657 = vmatpush.bf16.msrb.mxu1 %v2413_v34  ;;  %412 = vmatmul.bf16.vlgmr.msra.gmra.mxu2 %v338_v46  ;;  %v2442_v34 = vld [vmem:[%s3015_s1 + $0x260] sm:$0xff]  ;;  %v2439_v46 = vld [vmem:[%s3015_s1 + $0x248] sm:$0xff] }
  0x30   : > { %741 = vmatpush.bf16.msrb.mxu2 %v2421_v43  ;;  %496 = vmatmul.bf16.vlgmr.msra.gmra.mxu3 %v422_v48  ;;  %v2448_v43 = vld [vmem:[%s3015_s1 + $0x290] sm:$0xff]  ;;  %v2447_v47 = vld [vmem:[%s3015_s1 + $0x288] sm:$0xff] }
  0x31   : > { %825 = vmatpush.bf16.msrb.mxu3 %v2429_v44  ;;  %v2456_v44 = vld [vmem:[%s3015_s1 + $0x2d0] sm:$0xff]  ;;  %v2455_v48 = vld [vmem:[%s3015_s1 + $0x2c8] sm:$0xff] }
  0x32   : > { %574 = vmatpush.bf16.msrb.mxu0 %v2404_v49  ;;  %v2430_v49 = vld [vmem:[%s3015_s1 + $0x200] sm:$0xff] }
  0x33   : > { %658 = vmatpush.bf16.msrb.mxu1 %v2412_v50  ;;  %v2438_v50 = vld [vmem:[%s3015_s1 + $0x240] sm:$0xff] }
  0x34   : > { %742 = vmatpush.bf16.msrb.mxu2 %v2420_v51  ;;  %v2446_v51 = vld [vmem:[%s3015_s1 + $0x280] sm:$0xff] }
  0x35   : > { %826 = vmatpush.bf16.msrb.mxu3 %v2428_v52  ;;  %v2454_v52 = vld [vmem:[%s3015_s1 + $0x2c0] sm:$0xff] }
  0x36   : > { %575 = vmatpush.bf16.msrb.mxu0 %v2403_v53  ;;  %v2469_v53 = vld [vmem:[%s3015_s1 + $0x338] sm:$0xff] }
  0x37   : > { %659 = vmatpush.bf16.msrb.mxu1 %v2411_v54  ;;  %v2887_v54 = vld [vmem:[%s2637_s22 + $0x30] sm:$0xff] }
  0x38   : > { %743 = vmatpush.bf16.msrb.mxu2 %v2419_v55  ;;  %v2890_v55 = vld [vmem:[%s2637_s22 + $0x32] sm:$0xff] }
  0x39   : > { %827 = vmatpush.bf16.msrb.mxu3 %v2427_v56  ;;  %v2477_v56 = vld [vmem:[%s3015_s1 + $0x378] sm:$0xff] }
  0x3a   : > { %576 = vmatpush.bf16.msrb.mxu0 %v2402_v57  ;;  %v2896_v57 = vld [vmem:[%s2637_s22 + $0x31] sm:$0xff] }
  0x3b   : > { %660 = vmatpush.bf16.msrb.mxu1 %v2410_v58  ;;  %v2899_v58 = vld [vmem:[%s2637_s22 + $0x33] sm:$0xff] }
  0x3c   : > { %744 = vmatpush.bf16.msrb.mxu2 %v2418_v59  ;;  %v2485_v59 = vld [vmem:[%s3015_s1 + $0x3b8] sm:$0xff] }
  0x3d   : > { %828 = vmatpush.bf16.msrb.mxu3 %v2426_v60  ;;  %v2493_v60 = vld [vmem:[%s3015_s1 + $0x3f8] sm:$0xff] }
  0x3e   : > { %577 = vmatpush.bf16.msrb.mxu0 %v2401_v61  ;;  %v844_v61 = vpack.c.bf16 %v2887_v54, %v2771_v14  ;;  %v2473_v14 = vld [vmem:[%s3015_s1 + $0x358] sm:$0xff] }
  0x3f   : > { %661 = vmatpush.bf16.msrb.mxu1 %v2409_v62  ;;  %v1012_v62 = vpack.c.bf16 %v2890_v55, %v2774_v15  ;;  %v2481_v15 = vld [vmem:[%s3015_s1 + $0x398] sm:$0xff] }
  0x40   : > { %745 = vmatpush.bf16.msrb.mxu2 %v2417_v63  ;;  %v928_v63 = vpack.c.bf16 %v2896_v57, %v2780_v17  ;;  %v2464_v17 = vld [vmem:[%s3015_s1 + $0x310] sm:$0xff] }
  0x41   : > { %829 = vmatpush.bf16.msrb.mxu3 %v2425_v0  ;;  %v1096_v0 = vpack.c.bf16 %v2899_v58, %v2783_v18  ;;  %v2472_v18 = vld [vmem:[%s3015_s1 + $0x350] sm:$0xff] }
  0x42   : > { %578 = vmatpush.bf16.msrb.mxu0 %v2400_v1  ;;  %v2468_v1 = vld [vmem:[%s3015_s1 + $0x330] sm:$0xff] }
  0x43   : > { %662 = vmatpush.bf16.msrb.mxu1 %v2408_v2  ;;  %v2476_v2 = vld [vmem:[%s3015_s1 + $0x370] sm:$0xff] }
  0x44   : > { %746 = vmatpush.bf16.msrb.mxu2 %v2416_v3  ;;  %v2484_v3 = vld [vmem:[%s3015_s1 + $0x3b0] sm:$0xff] }
  0x45   : > { %830 = vmatpush.bf16.msrb.mxu3 %v2424_v4  ;;  %v2492_v4 = vld [vmem:[%s3015_s1 + $0x3f0] sm:$0xff] }
  0x46   : > { %579 = vmatpush.bf16.msrb.mxu0 %v2399_v5  ;;  %v2467_v5 = vld [vmem:[%s3015_s1 + $0x328] sm:$0xff] }
  0x47   : > { %663 = vmatpush.bf16.msrb.mxu1 %v2407_v6  ;;  %v2475_v6 = vld [vmem:[%s3015_s1 + $0x368] sm:$0xff] }
  0x48   : > { %747 = vmatpush.bf16.msrb.mxu2 %v2415_v7  ;;  %v2483_v7 = vld [vmem:[%s3015_s1 + $0x3a8] sm:$0xff] }
  0x49   : > { %831 = vmatpush.bf16.msrb.mxu3 %v2423_v8  ;;  %v2491_v8 = vld [vmem:[%s3015_s1 + $0x3e8] sm:$0xff] }
  0x4a   : > { %580 = vmatpush.bf16.msrb.mxu0 %v2398_v9  ;;  %v2466_v9 = vld [vmem:[%s3015_s1 + $0x320] sm:$0xff] }
  0x4b   : > { %664 = vmatpush.bf16.msrb.mxu1 %v2406_v10  ;;  %v2474_v10 = vld [vmem:[%s3015_s1 + $0x360] sm:$0xff] }
  0x4c   : > { %748 = vmatpush.bf16.msrb.mxu2 %v2414_v11  ;;  %v2482_v11 = vld [vmem:[%s3015_s1 + $0x3a0] sm:$0xff] }
  0x4d   : > { %832 = vmatpush.bf16.msrb.mxu3 %v2422_v12  ;;  %581 = vmatmul.bf16.vlgmr.msrb.gmra.mxu0 %v507_v21  ;;  %v2490_v12 = vld [vmem:[%s3015_s1 + $0x3e0] sm:$0xff]  ;;  %v2463_v21 = vld [vmem:[%s3015_s1 + $0x308] sm:$0xff] }
  0x4e   : > { %910 = vmatpush.bf16.msra.mxu0 %v2437_v13  ;;  %665 = vmatmul.bf16.vlgmr.msrb.gmra.mxu1 %v591_v23  ;;  %v2465_v13 = vld [vmem:[%s3015_s1 + $0x318] sm:$0xff]  ;;  %v2479_v23 = vld [vmem:[%s3015_s1 + $0x388] sm:$0xff] }
  0x4f   : > { %994 = vmatpush.bf16.msra.mxu1 %v2445_v16  ;;  %749 = vmatmul.bf16.vlgmr.msrb.gmra.mxu2 %v675_v22  ;;  %v2489_v16 = vld [vmem:[%s3015_s1 + $0x3d8] sm:$0xff]  ;;  %v2471_v22 = vld [vmem:[%s3015_s1 + $0x348] sm:$0xff] }
  0x50   : > { %1078 = vmatpush.bf16.msra.mxu2 %v2453_v19  ;;  %833 = vmatmul.bf16.vlgmr.msrb.gmra.mxu3 %v759_v24  ;;  %v2480_v19 = vld [vmem:[%s3015_s1 + $0x390] sm:$0xff]  ;;  %v2487_v24 = vld [vmem:[%s3015_s1 + $0x3c8] sm:$0xff] }
  0x51   : > { %1162 = vmatpush.bf16.msra.mxu3 %v2461_v20  ;;  %v2488_v20 = vld [vmem:[%s3015_s1 + $0x3d0] sm:$0xff] }
  0x52   : > { %911 = vmatpush.bf16.msra.mxu0 %v2436_v25  ;;  %v2462_v25 = vld [vmem:[%s3015_s1 + $0x300] sm:$0xff] }
  0x53   : > { %995 = vmatpush.bf16.msra.mxu1 %v2444_v26  ;;  %v2470_v26 = vld [vmem:[%s3015_s1 + $0x340] sm:$0xff] }
  0x54   : > { %1079 = vmatpush.bf16.msra.mxu2 %v2452_v27  ;;  %v2478_v27 = vld [vmem:[%s3015_s1 + $0x380] sm:$0xff] }
  0x55   : > { %1163 = vmatpush.bf16.msra.mxu3 %v2460_v28  ;;  %v2164_v28 = vld [vmem:[%s2637_s22 + $0x40] sm:$0xff] }
  0x56   : > { %912 = vmatpush.bf16.msra.mxu0 %v2435_v29  ;;  %v2214_v29 = vld [vmem:[%s2637_s22 + $0x41] sm:$0xff] }
  0x57   : > { %996 = vmatpush.bf16.msra.mxu1 %v2443_v30  ;;  %v2486_v30 = vld [vmem:[%s3015_s1 + $0x3c0] sm:$0xff] }
  0x58   : > { %1080 = vmatpush.bf16.msra.mxu2 %v2451_v31  ;;  %v2264_v31 = vld [vmem:[%s2637_s22 + $0x42] sm:$0xff] }
  0x59   : > { %1164 = vmatpush.bf16.msra.mxu3 %v2459_v32  ;;  %v2314_v32 = vld [vmem:[%s2637_s22 + $0x43] sm:$0xff]  ;;  %s2365_s22 = sshll.u32 %s3019_s15, 4 }
  0x5a   : > { %913 = vmatpush.bf16.msra.mxu0 %v2434_v33  ;;  %v1181_v33 = vpack.c.bf16 %v2164_v28, %v2887_v54  ;;  %s172_s25 = scalar_lea.vmem %s3017_s3, %s2365_s22 }
  0x5b   : > { %997 = vmatpush.bf16.msra.mxu1 %v2442_v34  ;;  %v1265_v34 = vpack.c.bf16 %v2214_v29, %v2896_v57 }
  0x5c   : > { %1081 = vmatpush.bf16.msra.mxu2 %v2450_v35  ;;  %v1349_v35 = vpack.c.bf16 %v2264_v31, %v2890_v55 }
  0x5d   : > { %1165 = vmatpush.bf16.msra.mxu3 %v2458_v36  ;;  %v1433_v36 = vpack.c.bf16 %v2314_v32, %v2899_v58 }
  0x5e   : > { %914 = vmatpush.bf16.msra.mxu0 %v2433_v37 }
  0x5f   : > { %998 = vmatpush.bf16.msra.mxu1 %v2441_v38 }
  0x60   : > { %1082 = vmatpush.bf16.msra.mxu2 %v2449_v39 }
  0x61   : > { %1166 = vmatpush.bf16.msra.mxu3 %v2457_v40 }
  0x62   : > { %915 = vmatpush.bf16.msra.mxu0 %v2432_v41 }
  0x63   : > { %999 = vmatpush.bf16.msra.mxu1 %v2440_v42 }
  0x64   : > { %1083 = vmatpush.bf16.msra.mxu2 %v2448_v43 }
  0x65   : > { %1167 = vmatpush.bf16.msra.mxu3 %v2456_v44 }
  0x66   : > { %916 = vmatpush.bf16.msra.mxu0 %v2431_v45 }
  0x67   : > { %1000 = vmatpush.bf16.msra.mxu1 %v2439_v46 }
  0x68   : > { %1084 = vmatpush.bf16.msra.mxu2 %v2447_v47 }
  0x69   : > { %1168 = vmatpush.bf16.msra.mxu3 %v2455_v48 }
  0x6a   : > { %917 = vmatpush.bf16.msra.mxu0 %v2430_v49 }
  0x6b   : > { %1001 = vmatpush.bf16.msra.mxu1 %v2438_v50 }
  0x6c   : > { %1085 = vmatpush.bf16.msra.mxu2 %v2446_v51 }
  0x6d   : > { %1169 = vmatpush.bf16.msra.mxu3 %v2454_v52  ;;  %918 = vmatmul.bf16.vlgmr.msra.gmra.mxu0 %v844_v61 }
  0x6e   : > { %1247 = vmatpush.bf16.msrb.mxu0 %v2469_v53  ;;  %1002 = vmatmul.bf16.vlgmr.msra.gmra.mxu1 %v928_v63 }
  0x6f   : > { %1331 = vmatpush.bf16.msrb.mxu1 %v2477_v56  ;;  %1086 = vmatmul.bf16.vlgmr.msra.gmra.mxu2 %v1012_v62 }
  0x70   : > { %1415 = vmatpush.bf16.msrb.mxu2 %v2485_v59  ;;  %1170 = vmatmul.bf16.vlgmr.msra.gmra.mxu3 %v1096_v0 }
  0x71   : > { %1499 = vmatpush.bf16.msrb.mxu3 %v2493_v60 }
  0x72   : > { %1248 = vmatpush.bf16.msrb.mxu0 %v2468_v1 }
  0x73   : > { %1332 = vmatpush.bf16.msrb.mxu1 %v2476_v2 }
  0x74   : > { %1416 = vmatpush.bf16.msrb.mxu2 %v2484_v3 }
  0x75   : > { %1500 = vmatpush.bf16.msrb.mxu3 %v2492_v4 }
  0x76   : > { %1249 = vmatpush.bf16.msrb.mxu0 %v2467_v5 }
  0x77   : > { %1333 = vmatpush.bf16.msrb.mxu1 %v2475_v6 }
  0x78   : > { %1417 = vmatpush.bf16.msrb.mxu2 %v2483_v7 }
  0x79   : > { %1501 = vmatpush.bf16.msrb.mxu3 %v2491_v8 }
  0x7a   : > { %1250 = vmatpush.bf16.msrb.mxu0 %v2466_v9 }
  0x7b   : > { %1334 = vmatpush.bf16.msrb.mxu1 %v2474_v10 }
  0x7c   : > { %1418 = vmatpush.bf16.msrb.mxu2 %v2482_v11 }
  0x7d   : > { %1502 = vmatpush.bf16.msrb.mxu3 %v2490_v12 }
  0x7e   : > { %1251 = vmatpush.bf16.msrb.mxu0 %v2465_v13 }
  0x7f   : > { %1335 = vmatpush.bf16.msrb.mxu1 %v2473_v14 }
  0x80   : > { %1419 = vmatpush.bf16.msrb.mxu2 %v2481_v15 }
  0x81   : > { %1503 = vmatpush.bf16.msrb.mxu3 %v2489_v16 }
  0x82   : > { %1252 = vmatpush.bf16.msrb.mxu0 %v2464_v17 }
  0x83   : > { %1336 = vmatpush.bf16.msrb.mxu1 %v2472_v18 }
  0x84   : > { %1420 = vmatpush.bf16.msrb.mxu2 %v2480_v19 }
  0x85   : > { %1504 = vmatpush.bf16.msrb.mxu3 %v2488_v20 }
  0x86   : > { %1253 = vmatpush.bf16.msrb.mxu0 %v2463_v21 }
  0x87   : > { %1337 = vmatpush.bf16.msrb.mxu1 %v2471_v22 }
  0x88   : > { %1421 = vmatpush.bf16.msrb.mxu2 %v2479_v23 }
  0x89   : > { %1505 = vmatpush.bf16.msrb.mxu3 %v2487_v24 }
  0x8a   : > { %1254 = vmatpush.bf16.msrb.mxu0 %v2462_v25 }
  0x8b   : > { %1338 = vmatpush.bf16.msrb.mxu1 %v2470_v26  ;;  %v2503_v26 = vld [vmem:[#allocation2] ss:$0 sm:$0xff] }
  0x8c   : > { %1422 = vmatpush.bf16.msrb.mxu2 %v2478_v27 }
  0x8d   : > { %1506 = vmatpush.bf16.msrb.mxu3 %v2486_v30  ;;  %1255 = vmatmul.bf16.vlgmr.msrb.gmra.mxu0 %v1181_v33 }
  0x8e   : > { %1339 = vmatmul.bf16.vlgmr.msrb.gmra.mxu1 %v1265_v34 }
  0x8f   : > { %1423 = vmatmul.bf16.vlgmr.msrb.gmra.mxu2 %v1349_v35 }
  0x90   : > { %1507 = vmatmul.bf16.vlgmr.msrb.gmra.mxu3 %v1433_v36 }
  0xaa   : > { %v269_v37 = vpop.f32.mrf.mxu0 }
  0xab   : > { %v331_v38 = vpop.f32.mrf.mxu1 }
  0xac   : > { %v332_v45 = vadd.f32 %v331_v38, %v269_v37 }
  0xb2   : > { %v413_v39 = vpop.f32.mrf.mxu2  ;;  %v271_v41 = vpop.f32.mrf.mxu0 }
  0xb3   : > { %v497_v40 = vpop.f32.mrf.mxu3  ;;  %v333_v42 = vpop.f32.mrf.mxu1  ;;  %v418_v48 = vadd.f32 %v413_v39, %v332_v45 }
  0xb4   : > { %v334_v53 = vadd.f32 %v333_v42, %v271_v41 }
  0xb5   : > { %v502_v51 = vadd.f32 %v497_v40, %v418_v48 }
  0xba   : > { %v415_v43 = vpop.f32.mrf.mxu2 }
  0xbb   : > { %v499_v44 = vpop.f32.mrf.mxu3  ;;  %v419_v56 = vadd.f32 %v415_v43, %v334_v53 }
  0xbd   : > { %v503_v61 = vadd.f32 %v499_v44, %v419_v56 }
  0xca   : > { %v582_v46 = vpop.f32.mrf.mxu0 }
  0xcb   : > { %v666_v47 = vpop.f32.mrf.mxu1  ;;  %v587_v54 = vadd.f32 %v582_v46, %v502_v51 }
  0xcd   : > { %v671_v57 = vadd.f32 %v666_v47, %v587_v54 }
  0xd2   : > { %v750_v49 = vpop.f32.mrf.mxu2  ;;  %v584_v52 = vpop.f32.mrf.mxu0 }
  0xd3   : > { %v834_v50 = vpop.f32.mrf.mxu3  ;;  %v668_v55 = vpop.f32.mrf.mxu1  ;;  %v755_v62 = vadd.f32 %v750_v49, %v671_v57  ;;  %v588_v0 = vadd.f32 %v584_v52, %v503_v61 }
  0xd5   : > { %v839_v1 = vadd.f32 %v834_v50, %v755_v62  ;;  %v672_v4 = vadd.f32 %v668_v55, %v588_v0 }
  0xda   : > { %v752_v58 = vpop.f32.mrf.mxu2 }
  0xdb   : > { %v836_v59 = vpop.f32.mrf.mxu3  ;;  %v756_v6 = vadd.f32 %v752_v58, %v672_v4 }
  0xdd   : > { %v840_v10 = vadd.f32 %v836_v59, %v756_v6 }
  0xea   : > { %v919_v60 = vpop.f32.mrf.mxu0 }
  0xeb   : > { %v1003_v63 = vpop.f32.mrf.mxu1  ;;  %v924_v5 = vadd.f32 %v919_v60, %v839_v1 }
  0xed   : > { %v1008_v8 = vadd.f32 %v1003_v63, %v924_v5 }
  0xf2   : > { %v1087_v2 = vpop.f32.mrf.mxu2  ;;  %v921_v7 = vpop.f32.mrf.mxu0 }
  0xf3   : > { %v1171_v3 = vpop.f32.mrf.mxu3  ;;  %v1005_v9 = vpop.f32.mrf.mxu1  ;;  %v1092_v11 = vadd.f32 %v1087_v2, %v1008_v8  ;;  %v925_v12 = vadd.f32 %v921_v7, %v840_v10 }
  0xf5   : > { %v1176_v15 = vadd.f32 %v1171_v3, %v1092_v11  ;;  %v1009_v17 = vadd.f32 %v1005_v9, %v925_v12 }
  0xfa   : > { %v1089_v13 = vpop.f32.mrf.mxu2 }
  0xfb   : > { %v1173_v14 = vpop.f32.mrf.mxu3  ;;  %v1093_v20 = vadd.f32 %v1089_v13, %v1009_v17 }
  0xfd   : > { %v1177_v24 = vadd.f32 %v1173_v14, %v1093_v20 }
 0x10a   : > { %v1256_v16 = vpop.f32.mrf.mxu0 }
 0x10b   : > { %v1261_v18 = vadd.f32 %v1256_v16, %v1176_v15  ;;  %v1340_v19 = vpop.f32.mrf.mxu1 }
 0x10d   : > { %v1345_v21 = vadd.f32 %v1340_v19, %v1261_v18 }
 0x112   : > { %v1424_v22 = vpop.f32.mrf.mxu2  ;;  %v1258_v27 = vpop.f32.mrf.mxu0 }
 0x113   : > { %v1508_v23 = vpop.f32.mrf.mxu3  ;;  %v1429_v25 = vadd.f32 %v1424_v22, %v1345_v21  ;;  %v1262_v29 = vadd.f32 %v1258_v27, %v1177_v24  ;;  %v1342_v31 = vpop.f32.mrf.mxu1 }
 0x115   : > { %v1513_v28 = vadd.f32 %v1508_v23, %v1429_v25  ;;  %v1346_v32 = vadd.f32 %v1342_v31, %v1262_v29 }
 0x117   : > { %v1519_v30 = vadd.f32 %v2503_v26, %v1513_v28 }
 0x119   : > { %1522 = vst.msk [vmem:[%s172_s25] sm:$0xff] %vm1521_vm0, %v1519_v30 }
 0x11a   : > { %v1426_v33 = vpop.f32.mrf.mxu2 }
 0x11b   : > { %v1430_v34 = vadd.f32 %v1426_v33, %v1346_v32  ;;  %v1510_v35 = vpop.f32.mrf.mxu3 }
 0x11d   : > { %v1514_v36 = vadd.f32 %v1510_v35, %v1430_v34 }
 0x11f   : > { %v1520_v37 = vadd.f32 %v2503_v26, %v1514_v36 }
 0x121   : > { %1523 = vst.msk [vmem:[%s172_s25 + $0x8] sm:$0xff] %vm1521_vm0, %v1520_v37 }
 0x122 PF: > { %s15_s14 = sadd.s32 1, %s2510_s14  }
 0x123   : > { %p12_p4 = scmp.ge.s32.totalorder %s15_s14, 4  }
 0x125   :  { %14 = sbr.rel (!%p12_p4) target bundleno = 3 (0x3), region = 80 }

</bundles_post_ra>
